<compile_context>
chip_gen: v7x
topology: tpu7x:2x2x1
jax: 0.10.0
libtpu: 0.0.40
codegen_flags: <defaults>
</compile_context>

<pallas_src>
import functools
import math

import jax
import jax.numpy as jnp
from jax import lax
from jax.experimental import pallas as pl
from jax.experimental.pallas import tpu as pltpu

EPS = 1e-5
LANE = 128


def _round_up(x, m):
    return (x + m - 1) // m * m


def _pick_row_tile(Ho, Wo, c_p, target_bytes=1 << 20):
    """Largest divisor TH of Ho such that the (TH*Wo, 9*c_p) bf16 tap scratch
    stays around `target_bytes`."""
    max_rows = max(Wo, target_bytes // (9 * c_p * 2))
    best = 1
    for th in range(1, Ho + 1):
        if Ho % th == 0 and th * Wo <= max_rows:
            best = th
    return best


def _vmem_limit_bytes():
    cap = 64 << 20
    try:
        info = pltpu.get_tpu_info()
        cap = int(getattr(info, "vmem_capacity_bytes", cap))
    except Exception:
        pass
    return max(32 << 20, (cap * 3) // 4)          # ~25% headroom below physical


_VMEM_LIMIT = _vmem_limit_bytes()


# ---------------------------------------------------------------------------
# Kernels
# ---------------------------------------------------------------------------
def _pass1_kernel(xp_ref, w1_ref, *rest, s, Hq, Ho, Wo, TH, has_proj):
    """conv1 (3x3, stride s) raw output + BN1 partial stats
    (+ 1x1 stride-s shortcut conv raw + its partial stats when has_proj).

    xp_ref : (1, s*s*Hq, Wq, Cin_p) bf16  -- zero-padded input, space-to-depth by s.
    w1_ref : (9*Cin_p, Cout_p) bf16       -- tap-major weights (resident).
    Row-tiled in-kernel: taps scratch is (TH*Wo, 9*Cin_p).
    """
    if has_proj:
        wsc_ref, y1_ref, sh_ref, st1_ref, stsc_ref, taps_ref = rest
    else:
        y1_ref, st1_ref, taps_ref = rest

    cin_p = xp_ref.shape[-1]
    cout_p = st1_ref.shape[-1]
    R = Ho // TH
    tile_m = TH * Wo

    sum1 = jnp.zeros((1, cout_p), jnp.float32)
    sq1 = jnp.zeros((1, cout_p), jnp.float32)
    if has_proj:
        sums = jnp.zeros((1, cout_p), jnp.float32)
        sqs = jnp.zeros((1, cout_p), jnp.float32)

    for rt in range(R):
        r0 = rt * TH
        # Gather the 9 shifted windows of this row tile into one (TH*Wo, 9*Cin_p)
        # operand: the conv becomes a single MXU contraction with K = 9*Cin_p.
        for kh in range(3):
            for kw in range(3):
                t = kh * 3 + kw
                base = ((kh % s) * s + (kw % s)) * Hq + kh // s + r0  # phase band + row
                col = kw // s
                win = xp_ref[0, base:base + TH, col:col + Wo, :]      # (TH, Wo, Cin_p)
                taps_ref[:, t * cin_p:(t + 1) * cin_p] = win.reshape(tile_m, cin_p)

        acc = jnp.dot(taps_ref[...], w1_ref[...],
                      preferred_element_type=jnp.float32)             # (TH*Wo, Cout_p)
        y = acc.astype(jnp.bfloat16)
        y1_ref[0, r0 * Wo:(r0 + TH) * Wo, :] = y
        # Stats from the bf16-rounded values (consistent with what pass 2 normalizes).
        yf = y.astype(jnp.float32)
        sum1 = sum1 + jnp.sum(yf, axis=0, keepdims=True)
        sq1 = sq1 + jnp.sum(yf * yf, axis=0, keepdims=True)

        if has_proj:
            # The 1x1 stride-s shortcut conv reads exactly the centre tap (kh=kw=1).
            centre = taps_ref[:, 4 * cin_p:5 * cin_p]
            sraw = jnp.dot(centre, wsc_ref[...], preferred_element_type=jnp.float32)
            sb = sraw.astype(jnp.bfloat16)
            sh_ref[0, r0 * Wo:(r0 + TH) * Wo, :] = sb
            sf = sb.astype(jnp.float32)
            sums = sums + jnp.sum(sf, axis=0, keepdims=True)
            sqs = sqs + jnp.sum(sf * sf, axis=0, keepdims=True)

    st1_ref[0, 0:1, :] = sum1
    st1_ref[0, 1:2, :] = sq1
    if has_proj:
        stsc_ref[0, 0:1, :] = sums
        stsc_ref[0, 1:2, :] = sqs


def _pass2_kernel(y1_ref, sc1_ref, sf1_ref, w2_ref, y2_ref, st2_ref,
                  ypad_ref, taps_ref, *, Ho, Wo, TH):
    """BN1 (folded scale/shift) + ReLU, then conv2 (3x3, stride 1) raw + BN2 stats.

    The normalized activation is written into a zero-border VMEM tile so conv2's
    taps never round-trip through HBM. conv2 is row-tiled: taps is (TH*Wo, 9*C_p).
    """
    cp = y1_ref.shape[-1]
    R = Ho // TH
    tile_m = TH * Wo

    # Zero ONLY the 1-pixel border (interior is fully overwritten below).
    ypad_ref[0:1, :, :] = jnp.zeros((1, Wo + 2, cp), jnp.bfloat16)
    ypad_ref[Ho + 1:Ho + 2, :, :] = jnp.zeros((1, Wo + 2, cp), jnp.bfloat16)
    ypad_ref[:, 0:1, :] = jnp.zeros((Ho + 2, 1, cp), jnp.bfloat16)
    ypad_ref[:, Wo + 1:Wo + 2, :] = jnp.zeros((Ho + 2, 1, cp), jnp.bfloat16)

    sc = sc1_ref[...]
    sf = sf1_ref[...]
    for rt in range(R):
        r0 = rt * TH
        yt = y1_ref[0, r0 * Wo:(r0 + TH) * Wo, :].astype(jnp.float32)
        yn = jnp.maximum(yt * sc + sf, 0.0)
        ypad_ref[r0 + 1:r0 + 1 + TH, 1:Wo + 1, :] = (
            yn.astype(jnp.bfloat16).reshape(TH, Wo, cp))

    sum2 = jnp.zeros((1, cp), jnp.float32)
    sq2 = jnp.zeros((1, cp), jnp.float32)
    for rt in range(R):
        r0 = rt * TH
        for kh in range(3):
            for kw in range(3):
                t = kh * 3 + kw
                win = ypad_ref[r0 + kh:r0 + kh + TH, kw:kw + Wo, :]
                taps_ref[:, t * cp:(t + 1) * cp] = win.reshape(tile_m, cp)
        acc = jnp.dot(taps_ref[...], w2_ref[...], preferred_element_type=jnp.float32)
        y = acc.astype(jnp.bfloat16)
        y2_ref[0, r0 * Wo:(r0 + TH) * Wo, :] = y
        yf = y.astype(jnp.float32)
        sum2 = sum2 + jnp.sum(yf, axis=0, keepdims=True)
        sq2 = sq2 + jnp.sum(yf * yf, axis=0, keepdims=True)

    st2_ref[0, 0:1, :] = sum2
    st2_ref[0, 1:2, :] = sq2


def _pass3_kernel(y2_ref, sh_ref, sc2_ref, sf2_ref, scs_ref, sfs_ref, out_ref):
    """BN2 + shortcut scale/shift (identity => scale=1, shift=0) + add + ReLU.
    Inputs are bf16 (halved HBM read traffic); math and output in f32."""
    y = y2_ref[0].astype(jnp.float32) * sc2_ref[...] + sf2_ref[...]
    s = sh_ref[0].astype(jnp.float32) * scs_ref[...] + sfs_ref[...]
    out_ref[0] = jnp.maximum(y + s, 0.0)


# ---------------------------------------------------------------------------
# Wrapper glue (layout prep + tiny per-channel BN reductions between kernels)
# ---------------------------------------------------------------------------
def _prep_w3x3(w, cin_p, cout_p):
    """(Cout, Cin, 3, 3) -> tap-major (9*Cin_p, Cout_p) bf16, zero lane-padded."""
    cout, cin = w.shape[0], w.shape[1]
    w = jnp.transpose(w, (2, 3, 1, 0))                        # (3, 3, Cin, Cout)
    w = jnp.pad(w, ((0, 0), (0, 0), (0, cin_p - cin), (0, cout_p - cout)))
    return w.reshape(9 * cin_p, cout_p).astype(jnp.bfloat16)


def _scale_shift(stat, gamma, beta, count):
    """Combine per-image [sum, sumsq] partials -> per-channel (scale, shift)."""
    sums = jnp.sum(stat[:, 0, :], axis=0)
    sqs = jnp.sum(stat[:, 1, :], axis=0)
    mean = sums / count
    var = jnp.maximum(sqs / count - mean * mean, 0.0)
    inv = lax.rsqrt(var + EPS)
    scale = gamma * inv
    shift = beta - mean * scale
    return (scale.reshape(1, -1).astype(jnp.float32),
            shift.reshape(1, -1).astype(jnp.float32))


def init_simple_block(key, indim, outdim):
    """Matches init_layer: conv ~ N(0, sqrt(2/(k*k*outdim))), BN weight=1, bias=0."""
    k1, k2, k3 = jax.random.split(key, 3)
    std3 = math.sqrt(2.0 / (3 * 3 * outdim))
    params = {
        "w1": std3 * jax.random.normal(k1, (outdim, indim, 3, 3), jnp.float32),
        "w2": std3 * jax.random.normal(k2, (outdim, outdim, 3, 3), jnp.float32),
        "bn1_w": jnp.ones((outdim,), jnp.float32),
        "bn1_b": jnp.zeros((outdim,), jnp.float32),
        "bn2_w": jnp.ones((outdim,), jnp.float32),
        "bn2_b": jnp.zeros((outdim,), jnp.float32),
    }
    if indim != outdim:
        std1 = math.sqrt(2.0 / (1 * 1 * outdim))
        params["wsc"] = std1 * jax.random.normal(k3, (outdim, indim, 1, 1), jnp.float32)
        params["bnsc_w"] = jnp.ones((outdim,), jnp.float32)
        params["bnsc_b"] = jnp.zeros((outdim,), jnp.float32)
    return params


@functools.partial(jax.jit, static_argnames=("half_res",))
def simple_block_forward(x_nchw, params, half_res):
    N, Cin, H, W = x_nchw.shape
    Cout = params["w1"].shape[0]
    s = 2 if half_res else 1
    Ho = (H - 1) // s + 1
    Wo = (W - 1) // s + 1
    M = Ho * Wo
    count = float(N * M)
    cin_p = _round_up(Cin, LANE)
    cout_p = _round_up(Cout, LANE)
    has_proj = "wsc" in params
    if not has_proj:
        assert s == 1 and Cin == Cout, "identity shortcut requires stride 1, Cin==Cout"

    TH1 = _pick_row_tile(Ho, Wo, cin_p)     # row tile for conv1 tap scratch
    TH2 = _pick_row_tile(Ho, Wo, cout_p)    # row tile for conv2 tap scratch

    # NCHW -> NHWC, lane-pad channels, cast to bf16 once (matmul operand dtype).
    x = jnp.transpose(x_nchw, (0, 2, 3, 1))
    x = jnp.pad(x, ((0, 0), (0, 0), (0, 0), (0, cin_p - Cin))).astype(jnp.bfloat16)

    # Zero-pad spatially (pad=1), round up to a multiple of the stride, then
    # space-to-depth by the stride so every conv tap is a contiguous in-kernel slice.
    Hq = -(-(H + 2) // s)
    Wq = -(-(W + 2) // s)
    xp = jnp.pad(x, ((0, 0), (1, Hq * s - H - 1), (1, Wq * s - W - 1), (0, 0)))
    xp = xp.reshape(N, Hq, s, Wq, s, cin_p).transpose(0, 2, 4, 1, 3, 5)
    xp = xp.reshape(N, s * s * Hq, Wq, cin_p)

    w1 = _prep_w3x3(params["w1"], cin_p, cout_p)
    w2 = _prep_w3x3(params["w2"], cout_p, cout_p)
    g1 = jnp.pad(params["bn1_w"].astype(jnp.float32), (0, cout_p - Cout), constant_values=1.0)
    b1 = jnp.pad(params["bn1_b"].astype(jnp.float32), (0, cout_p - Cout))
    g2 = jnp.pad(params["bn2_w"].astype(jnp.float32), (0, cout_p - Cout), constant_values=1.0)
    b2 = jnp.pad(params["bn2_b"].astype(jnp.float32), (0, cout_p - Cout))

    cparams = pltpu.CompilerParams(dimension_semantics=("parallel",),
                                   vmem_limit_bytes=_VMEM_LIMIT)
    xp_spec = pl.BlockSpec((1, s * s * Hq, Wq, cin_p), lambda n: (n, 0, 0, 0))
    w1_spec = pl.BlockSpec((9 * cin_p, cout_p), lambda n: (0, 0))       # resident
    w2_spec = pl.BlockSpec((9 * cout_p, cout_p), lambda n: (0, 0))      # resident
    row_spec = pl.BlockSpec((1, M, cout_p), lambda n: (n, 0, 0))
    stat_spec = pl.BlockSpec((1, 2, cout_p), lambda n: (n, 0, 0))
    vec_spec = pl.BlockSpec((1, cout_p), lambda n: (0, 0))              # resident

    # ---- Pass 1: conv1 raw (+ shortcut conv raw) + partial BN stats ----------
    kern1 = functools.partial(_pass1_kernel, s=s, Hq=Hq, Ho=Ho, Wo=Wo, TH=TH1,
                              has_proj=has_proj)
    taps1_scratch = pltpu.VMEM((TH1 * Wo, 9 * cin_p), jnp.bfloat16)
    if has_proj:
        wsc = jnp.pad(params["wsc"][:, :, 0, 0].T,
                      ((0, cin_p - Cin), (0, cout_p - Cout))).astype(jnp.bfloat16)
        y1raw, shraw, st1, stsc = pl.pallas_call(
            kern1,
            grid=(N,),
            in_specs=[xp_spec, w1_spec, pl.BlockSpec((cin_p, cout_p), lambda n: (0, 0))],
            out_specs=(row_spec, row_spec, stat_spec, stat_spec),
            out_shape=(jax.ShapeDtypeStruct((N, M, cout_p), jnp.bfloat16),
                       jax.ShapeDtypeStruct((N, M, cout_p), jnp.bfloat16),
                       jax.ShapeDtypeStruct((N, 2, cout_p), jnp.float32),
                       jax.ShapeDtypeStruct((N, 2, cout_p), jnp.float32)),
            scratch_shapes=[taps1_scratch],
            compiler_params=cparams,
        )(xp, w1, wsc)
    else:
        y1raw, st1 = pl.pallas_call(
            kern1,
            grid=(N,),
            in_specs=[xp_spec, w1_spec],
            out_specs=(row_spec, stat_spec),
            out_shape=(jax.ShapeDtypeStruct((N, M, cout_p), jnp.bfloat16),
                       jax.ShapeDtypeStruct((N, 2, cout_p), jnp.float32)),
            scratch_shapes=[taps1_scratch],
            compiler_params=cparams,
        )(xp, w1)

    sc1, sf1 = _scale_shift(st1, g1, b1, count)

    # ---- Pass 2: BN1 + ReLU + conv2 raw + partial BN2 stats -------------------
    kern2 = functools.partial(_pass2_kernel, Ho=Ho, Wo=Wo, TH=TH2)
    y2raw, st2 = pl.pallas_call(
        kern2,
        grid=(N,),
        in_specs=[row_spec, vec_spec, vec_spec, w2_spec],
        out_specs=(row_spec, stat_spec),
        out_shape=(jax.ShapeDtypeStruct((N, M, cout_p), jnp.bfloat16),
                   jax.ShapeDtypeStruct((N, 2, cout_p), jnp.float32)),
        scratch_shapes=[pltpu.VMEM((Ho + 2, Wo + 2, cout_p), jnp.bfloat16),
                        pltpu.VMEM((TH2 * Wo, 9 * cout_p), jnp.bfloat16)],
        compiler_params=cparams,
    )(y1raw, sc1, sf1, w2)

    sc2, sf2 = _scale_shift(st2, g2, b2, count)

    if has_proj:
        gsc = jnp.pad(params["bnsc_w"].astype(jnp.float32), (0, cout_p - Cout),
                      constant_values=1.0)
        bsc = jnp.pad(params["bnsc_b"].astype(jnp.float32), (0, cout_p - Cout))
        scs, sfs = _scale_shift(stsc, gsc, bsc, count)
        short = shraw
    else:
        short = x.reshape(N, M, cin_p)                       # bf16 identity shortcut
        scs = jnp.ones((1, cout_p), jnp.float32)
        sfs = jnp.zeros((1, cout_p), jnp.float32)

    # ---- Pass 3: BN2 + shortcut + add + ReLU ---------------------------------
    out = pl.pallas_call(
        _pass3_kernel,
        grid=(N,),
        in_specs=[row_spec, row_spec, vec_spec, vec_spec, vec_spec, vec_spec],
        out_specs=row_spec,
        out_shape=jax.ShapeDtypeStruct((N, M, cout_p), jnp.float32),
        compiler_params=cparams,
    )(y2raw, short, sc2, sf2, scs, sfs)

    # Lane-dense (N, M, C_p) out of the kernel; XLA does the cheap NCHW restore.
    out = out.reshape(N, Ho, Wo, cout_p)[:, :, :, :Cout]
    return jnp.transpose(out, (0, 3, 1, 2))                  # back to NCHW


# ---------------------------------------------------------------------------
# Pure-JAX reference (correctness check only)
# ---------------------------------------------------------------------------
def _bn_ref(y, g, b):
    mean = jnp.mean(y, axis=(0, 2, 3), keepdims=True)
    var = jnp.mean((y - mean) ** 2, axis=(0, 2, 3), keepdims=True)
    return ((y - mean) * lax.rsqrt(var + EPS) * g.reshape(1, -1, 1, 1)
            + b.reshape(1, -1, 1, 1))


def simple_block_reference(x, params, half_res):
    s = (2, 2) if half_res else (1, 1)
    dn = ("NCHW", "OIHW", "NCHW")
    out = lax.conv_general_dilated(x, params["w1"], s, ((1, 1), (1, 1)),
                                   dimension_numbers=dn)
    out = jax.nn.relu(_bn_ref(out, params["bn1_w"], params["bn1_b"]))
    out = lax.conv_general_dilated(out, params["w2"], (1, 1), ((1, 1), (1, 1)),
                                   dimension_numbers=dn)
    out = _bn_ref(out, params["bn2_w"], params["bn2_b"])
    if "wsc" in params:
        short = lax.conv_general_dilated(x, params["wsc"], s, ((0, 0), (0, 0)),
                                         dimension_numbers=dn)
        short = _bn_ref(short, params["bnsc_w"], params["bnsc_b"])
    else:
        short = x
    return jax.nn.relu(out + short)


# ---------------------------------------------------------------------------
if __name__ == "__main__":
    key = jax.random.PRNGKey(0)
    kx, kp, kx2, kp2, kx3 = jax.random.split(key, 5)

    # Config A: indim=4 != outdim=8, half_res=True -> 1x1 projection shortcut, stride 2
    x = jax.random.normal(kx, (2, 4, 16, 16), jnp.float32)
    params = init_simple_block(kp, 4, 8)
    out = jax.block_until_ready(simple_block_forward(x, params, half_res=True))
    ref = simple_block_reference(x, params, half_res=True)
    assert out.shape == (2, 8, 8, 8), out.shape
    err = float(jnp.abs(out - ref).max())
    assert jnp.allclose(out, ref, atol=3e-2, rtol=3e-2), f"max abs err = {err}"

    # Config B: indim == outdim = 8, half_res=False -> identity shortcut
    x2 = jax.random.normal(kx2, (2, 8, 16, 16), jnp.float32)
    params2 = init_simple_block(kp2, 8, 8)
    out2 = jax.block_until_ready(simple_block_forward(x2, params2, half_res=False))
    ref2 = simple_block_reference(x2, params2, half_res=False)
    assert out2.shape == (2, 8, 16, 16), out2.shape
    err2 = float(jnp.abs(out2 - ref2).max())
    assert jnp.allclose(out2, ref2, atol=3e-2, rtol=3e-2), f"max abs err = {err2}"

    # Config C: odd spatial size with stride 2 (validates stride-2 tap indexing
    # for H,W not divisible by the stride).
    x3 = jax.random.normal(kx3, (2, 4, 15, 15), jnp.float32)
    out3 = jax.block_until_ready(simple_block_forward(x3, params, half_res=True))
    ref3 = simple_block_reference(x3, params, half_res=True)
    assert out3.shape == (2, 8, 8, 8), out3.shape
    err3 = float(jnp.abs(out3 - ref3).max())
    assert jnp.allclose(out3, ref3, atol=3e-2, rtol=3e-2), f"max abs err = {err3}"

    print("KERNEL_OK")
</pallas_src>

<mosaic_0001>
module attributes {stable_mosaic.version = 11 : i64} {
  func.func @_pass1_kernel(%arg0: i32, %arg1: memref<1x36x9x128xbf16, #tpu.memory_space<vmem>>, %arg2: memref<1152x128xbf16, #tpu.memory_space<vmem>>, %arg3: memref<128x128xbf16, #tpu.memory_space<vmem>>, %arg4: memref<1x64x128xbf16, #tpu.memory_space<vmem>>, %arg5: memref<1x64x128xbf16, #tpu.memory_space<vmem>>, %arg6: memref<1x2x128xf32, #tpu.memory_space<vmem>>, %arg7: memref<1x2x128xf32, #tpu.memory_space<vmem>>, %arg8: memref<64x1152xbf16, #tpu.memory_space<vmem>>) attributes {dimension_semantics = [#tpu.dimension_semantics<parallel>], iteration_bounds = array<i64: 2>, scalar_prefetch = 0 : i64, scratch_operands = 1 : i64, tpu.core_type = #tpu.core_type<tc>, window_params = [{transform_indices = @transform_0, window_bounds = array<i64: 1, 36, 9, 128>}, {pipeline_mode = #tpu.pipeline_mode<synchronous>, transform_indices = @transform_1, window_bounds = array<i64: 1152, 128>}, {pipeline_mode = #tpu.pipeline_mode<synchronous>, transform_indices = @transform_2, window_bounds = array<i64: 128, 128>}, {transform_indices = @transform_3, window_bounds = array<i64: 1, 64, 128>}, {transform_indices = @transform_4, window_bounds = array<i64: 1, 64, 128>}, {transform_indices = @transform_5, window_bounds = array<i64: 1, 2, 128>}, {transform_indices = @transform_6, window_bounds = array<i64: 1, 2, 128>}]} {
    %cst = arith.constant 0.000000e+00 : f32
    %0 = vector.broadcast %cst : f32 to vector<1x128xf32>
    %cst_0 = arith.constant 0.000000e+00 : f32
    %1 = vector.broadcast %cst_0 : f32 to vector<1x128xf32>
    %cst_1 = arith.constant 0.000000e+00 : f32
    %2 = vector.broadcast %cst_1 : f32 to vector<1x128xf32>
    %cst_2 = arith.constant 0.000000e+00 : f32
    %3 = vector.broadcast %cst_2 : f32 to vector<1x128xf32>
    %c0 = arith.constant 0 : index
    %c0_3 = arith.constant 0 : index
    %c0_4 = arith.constant 0 : index
    %c0_5 = arith.constant 0 : index
    %4 = vector.load %arg1[%c0, %c0_3, %c0_4, %c0_5] : memref<1x36x9x128xbf16, #tpu.memory_space<vmem>>, vector<1x8x8x128xbf16>
    %5 = vector.shape_cast %4 : vector<1x8x8x128xbf16> to vector<8x8x128xbf16>
    %6 = vector.shape_cast %5 : vector<8x8x128xbf16> to vector<64x128xbf16>
    %c0_6 = arith.constant 0 : index
    %c0_7 = arith.constant 0 : index
    %7 = vector.load %arg8[%c0_6, %c0_7] : memref<64x1152xbf16, #tpu.memory_space<vmem>>, vector<64x128xbf16>
    tpu.vector_store %arg8[%c0_6, %c0_7], %6 {strides = array<i32>} : memref<64x1152xbf16, #tpu.memory_space<vmem>>, vector<64x128xbf16>,
    %c0_8 = arith.constant 0 : index
    %c9 = arith.constant 9 : index
    %c0_9 = arith.constant 0 : index
    %c0_10 = arith.constant 0 : index
    %8 = vector.load %arg1[%c0_8, %c9, %c0_9, %c0_10] : memref<1x36x9x128xbf16, #tpu.memory_space<vmem>>, vector<1x8x8x128xbf16>
    %9 = vector.shape_cast %8 : vector<1x8x8x128xbf16> to vector<8x8x128xbf16>
    %10 = vector.shape_cast %9 : vector<8x8x128xbf16> to vector<64x128xbf16>
    %c0_11 = arith.constant 0 : index
    %c128 = arith.constant 128 : index
    %11 = vector.load %arg8[%c0_11, %c128] : memref<64x1152xbf16, #tpu.memory_space<vmem>>, vector<64x128xbf16>
    tpu.vector_store %arg8[%c0_11, %c128], %10 {strides = array<i32>} : memref<64x1152xbf16, #tpu.memory_space<vmem>>, vector<64x128xbf16>,
    %c0_12 = arith.constant 0 : index
    %c0_13 = arith.constant 0 : index
    %c1 = arith.constant 1 : index
    %c0_14 = arith.constant 0 : index
    %12 = vector.load %arg1[%c0_12, %c0_13, %c1, %c0_14] : memref<1x36x9x128xbf16, #tpu.memory_space<vmem>>, vector<1x8x8x128xbf16>
    %13 = vector.shape_cast %12 : vector<1x8x8x128xbf16> to vector<8x8x128xbf16>
    %14 = vector.shape_cast %13 : vector<8x8x128xbf16> to vector<64x128xbf16>
    %c0_15 = arith.constant 0 : index
    %c256 = arith.constant 256 : index
    %15 = vector.load %arg8[%c0_15, %c256] : memref<64x1152xbf16, #tpu.memory_space<vmem>>, vector<64x128xbf16>
    tpu.vector_store %arg8[%c0_15, %c256], %14 {strides = array<i32>} : memref<64x1152xbf16, #tpu.memory_space<vmem>>, vector<64x128xbf16>,
    %c0_16 = arith.constant 0 : index
    %c18 = arith.constant 18 : index
    %c0_17 = arith.constant 0 : index
    %c0_18 = arith.constant 0 : index
    %16 = vector.load %arg1[%c0_16, %c18, %c0_17, %c0_18] : memref<1x36x9x128xbf16, #tpu.memory_space<vmem>>, vector<1x8x8x128xbf16>
    %17 = vector.shape_cast %16 : vector<1x8x8x128xbf16> to vector<8x8x128xbf16>
    %18 = vector.shape_cast %17 : vector<8x8x128xbf16> to vector<64x128xbf16>
    %c0_19 = arith.constant 0 : index
    %c384 = arith.constant 384 : index
    %19 = vector.load %arg8[%c0_19, %c384] : memref<64x1152xbf16, #tpu.memory_space<vmem>>, vector<64x128xbf16>
    tpu.vector_store %arg8[%c0_19, %c384], %18 {strides = array<i32>} : memref<64x1152xbf16, #tpu.memory_space<vmem>>, vector<64x128xbf16>,
    %c0_20 = arith.constant 0 : index
    %c27 = arith.constant 27 : index
    %c0_21 = arith.constant 0 : index
    %c0_22 = arith.constant 0 : index
    %20 = vector.load %arg1[%c0_20, %c27, %c0_21, %c0_22] : memref<1x36x9x128xbf16, #tpu.memory_space<vmem>>, vector<1x8x8x128xbf16>
    %21 = vector.shape_cast %20 : vector<1x8x8x128xbf16> to vector<8x8x128xbf16>
    %22 = vector.shape_cast %21 : vector<8x8x128xbf16> to vector<64x128xbf16>
    %c0_23 = arith.constant 0 : index
    %c512 = arith.constant 512 : index
    %23 = vector.load %arg8[%c0_23, %c512] : memref<64x1152xbf16, #tpu.memory_space<vmem>>, vector<64x128xbf16>
    tpu.vector_store %arg8[%c0_23, %c512], %22 {strides = array<i32>} : memref<64x1152xbf16, #tpu.memory_space<vmem>>, vector<64x128xbf16>,
    %c0_24 = arith.constant 0 : index
    %c18_25 = arith.constant 18 : index
    %c1_26 = arith.constant 1 : index
    %c0_27 = arith.constant 0 : index
    %24 = vector.load %arg1[%c0_24, %c18_25, %c1_26, %c0_27] : memref<1x36x9x128xbf16, #tpu.memory_space<vmem>>, vector<1x8x8x128xbf16>
    %25 = vector.shape_cast %24 : vector<1x8x8x128xbf16> to vector<8x8x128xbf16>
    %26 = vector.shape_cast %25 : vector<8x8x128xbf16> to vector<64x128xbf16>
    %c0_28 = arith.constant 0 : index
    %c640 = arith.constant 640 : index
    %27 = vector.load %arg8[%c0_28, %c640] : memref<64x1152xbf16, #tpu.memory_space<vmem>>, vector<64x128xbf16>
    tpu.vector_store %arg8[%c0_28, %c640], %26 {strides = array<i32>} : memref<64x1152xbf16, #tpu.memory_space<vmem>>, vector<64x128xbf16>,
    %c0_29 = arith.constant 0 : index
    %c1_30 = arith.constant 1 : index
    %c0_31 = arith.constant 0 : index
    %c0_32 = arith.constant 0 : index
    %28 = vector.load %arg1[%c0_29, %c1_30, %c0_31, %c0_32] : memref<1x36x9x128xbf16, #tpu.memory_space<vmem>>, vector<1x8x8x128xbf16>
    %29 = vector.shape_cast %28 : vector<1x8x8x128xbf16> to vector<8x8x128xbf16>
    %30 = vector.shape_cast %29 : vector<8x8x128xbf16> to vector<64x128xbf16>
    %c0_33 = arith.constant 0 : index
    %c768 = arith.constant 768 : index
    %31 = vector.load %arg8[%c0_33, %c768] : memref<64x1152xbf16, #tpu.memory_space<vmem>>, vector<64x128xbf16>
    tpu.vector_store %arg8[%c0_33, %c768], %30 {strides = array<i32>} : memref<64x1152xbf16, #tpu.memory_space<vmem>>, vector<64x128xbf16>,
    %c0_34 = arith.constant 0 : index
    %c10 = arith.constant 10 : index
    %c0_35 = arith.constant 0 : index
    %c0_36 = arith.constant 0 : index
    %32 = vector.load %arg1[%c0_34, %c10, %c0_35, %c0_36] : memref<1x36x9x128xbf16, #tpu.memory_space<vmem>>, vector<1x8x8x128xbf16>
    %33 = vector.shape_cast %32 : vector<1x8x8x128xbf16> to vector<8x8x128xbf16>
    %34 = vector.shape_cast %33 : vector<8x8x128xbf16> to vector<64x128xbf16>
    %c0_37 = arith.constant 0 : index
    %c896 = arith.constant 896 : index
    %35 = vector.load %arg8[%c0_37, %c896] : memref<64x1152xbf16, #tpu.memory_space<vmem>>, vector<64x128xbf16>
    tpu.vector_store %arg8[%c0_37, %c896], %34 {strides = array<i32>} : memref<64x1152xbf16, #tpu.memory_space<vmem>>, vector<64x128xbf16>,
    %c0_38 = arith.constant 0 : index
    %c1_39 = arith.constant 1 : index
    %c1_40 = arith.constant 1 : index
    %c0_41 = arith.constant 0 : index
    %36 = vector.load %arg1[%c0_38, %c1_39, %c1_40, %c0_41] : memref<1x36x9x128xbf16, #tpu.memory_space<vmem>>, vector<1x8x8x128xbf16>
    %37 = vector.shape_cast %36 : vector<1x8x8x128xbf16> to vector<8x8x128xbf16>
    %38 = vector.shape_cast %37 : vector<8x8x128xbf16> to vector<64x128xbf16>
    %c0_42 = arith.constant 0 : index
    %c1024 = arith.constant 1024 : index
    %39 = vector.load %arg8[%c0_42, %c1024] : memref<64x1152xbf16, #tpu.memory_space<vmem>>, vector<64x128xbf16>
    tpu.vector_store %arg8[%c0_42, %c1024], %38 {strides = array<i32>} : memref<64x1152xbf16, #tpu.memory_space<vmem>>, vector<64x128xbf16>,
    %c0_43 = arith.constant 0 : index
    %c0_44 = arith.constant 0 : index
    %40 = vector.load %arg8[%c0_43, %c0_44] : memref<64x1152xbf16, #tpu.memory_space<vmem>>, vector<64x1152xbf16>
    %c0_45 = arith.constant 0 : index
    %c0_46 = arith.constant 0 : index
    %41 = vector.load %arg2[%c0_45, %c0_46] : memref<1152x128xbf16, #tpu.memory_space<vmem>>, vector<1152x128xbf16>
    %cst_47 = arith.constant dense<0.000000e+00> : vector<64x128xf32>
    %42 = tpu.matmul %40, %41, %cst_47 {dimension_numbers = #tpu.dot_dimension_numbers<[1], [0], [0], [1], [0, 0, 1, 1], [], []>} : vector<64x1152xbf16>, vector<1152x128xbf16>, vector<64x128xf32> -> vector<64x128xf32>
    %43 = arith.truncf %42 : vector<64x128xf32> to vector<64x128xbf16>
    %c0_48 = arith.constant 0 : index
    %c0_49 = arith.constant 0 : index
    %c0_50 = arith.constant 0 : index
    %44 = vector.load %arg4[%c0_48, %c0_49, %c0_50] : memref<1x64x128xbf16, #tpu.memory_space<vmem>>, vector<1x64x128xbf16>
    %45 = vector.shape_cast %44 : vector<1x64x128xbf16> to vector<64x128xbf16>
    %46 = vector.shape_cast %43 : vector<64x128xbf16> to vector<1x64x128xbf16>
    tpu.vector_store %arg4[%c0_48, %c0_49, %c0_50], %46 {strides = array<i32>} : memref<1x64x128xbf16, #tpu.memory_space<vmem>>, vector<1x64x128xbf16>,
    %47 = arith.extf %43 : vector<64x128xbf16> to vector<64x128xf32>
    %cst_51 = arith.constant dense<0.000000e+00> : vector<128xf32>
    %48 = vector.multi_reduction <add>, %47, %cst_51 [0] : vector<64x128xf32> to vector<128xf32>
    %49 = vector.shape_cast %48 : vector<128xf32> to vector<1x128xf32>
    %50 = arith.addf %0, %49 : vector<1x128xf32>
    %51 = arith.mulf %47, %47 : vector<64x128xf32>
    %cst_52 = arith.constant dense<0.000000e+00> : vector<128xf32>
    %52 = vector.multi_reduction <add>, %51, %cst_52 [0] : vector<64x128xf32> to vector<128xf32>
    %53 = vector.shape_cast %52 : vector<128xf32> to vector<1x128xf32>
    %54 = arith.addf %1, %53 : vector<1x128xf32>
    %c0_53 = arith.constant 0 : index
    %c512_54 = arith.constant 512 : index
    %55 = vector.load %arg8[%c0_53, %c512_54] : memref<64x1152xbf16, #tpu.memory_space<vmem>>, vector<64x128xbf16>
    %c0_55 = arith.constant 0 : index
    %c0_56 = arith.constant 0 : index
    %56 = vector.load %arg3[%c0_55, %c0_56] : memref<128x128xbf16, #tpu.memory_space<vmem>>, vector<128x128xbf16>
    %cst_57 = arith.constant dense<0.000000e+00> : vector<64x128xf32>
    %57 = tpu.matmul %55, %56, %cst_57 {dimension_numbers = #tpu.dot_dimension_numbers<[1], [0], [0], [1], [0, 0, 1, 1], [], []>} : vector<64x128xbf16>, vector<128x128xbf16>, vector<64x128xf32> -> vector<64x128xf32>
    %58 = arith.truncf %57 : vector<64x128xf32> to vector<64x128xbf16>
    %c0_58 = arith.constant 0 : index
    %c0_59 = arith.constant 0 : index
    %c0_60 = arith.constant 0 : index
    %59 = vector.load %arg5[%c0_58, %c0_59, %c0_60] : memref<1x64x128xbf16, #tpu.memory_space<vmem>>, vector<1x64x128xbf16>
    %60 = vector.shape_cast %59 : vector<1x64x128xbf16> to vector<64x128xbf16>
    %61 = vector.shape_cast %58 : vector<64x128xbf16> to vector<1x64x128xbf16>
    tpu.vector_store %arg5[%c0_58, %c0_59, %c0_60], %61 {strides = array<i32>} : memref<1x64x128xbf16, #tpu.memory_space<vmem>>, vector<1x64x128xbf16>,
    %62 = arith.extf %58 : vector<64x128xbf16> to vector<64x128xf32>
    %cst_61 = arith.constant dense<0.000000e+00> : vector<128xf32>
    %63 = vector.multi_reduction <add>, %62, %cst_61 [0] : vector<64x128xf32> to vector<128xf32>
    %64 = vector.shape_cast %63 : vector<128xf32> to vector<1x128xf32>
    %65 = arith.addf %2, %64 : vector<1x128xf32>
    %66 = arith.mulf %62, %62 : vector<64x128xf32>
    %cst_62 = arith.constant dense<0.000000e+00> : vector<128xf32>
    %67 = vector.multi_reduction <add>, %66, %cst_62 [0] : vector<64x128xf32> to vector<128xf32>
    %68 = vector.shape_cast %67 : vector<128xf32> to vector<1x128xf32>
    %69 = arith.addf %3, %68 : vector<1x128xf32>
    %c0_63 = arith.constant 0 : index
    %c0_64 = arith.constant 0 : index
    %c0_65 = arith.constant 0 : index
    %70 = vector.load %arg6[%c0_63, %c0_64, %c0_65] : memref<1x2x128xf32, #tpu.memory_space<vmem>>, vector<1x1x128xf32>
    %71 = vector.shape_cast %70 : vector<1x1x128xf32> to vector<1x128xf32>
    %72 = vector.shape_cast %50 : vector<1x128xf32> to vector<1x1x128xf32>
    tpu.vector_store %arg6[%c0_63, %c0_64, %c0_65], %72 {strides = array<i32>} : memref<1x2x128xf32, #tpu.memory_space<vmem>>, vector<1x1x128xf32>,
    %c0_66 = arith.constant 0 : index
    %c1_67 = arith.constant 1 : index
    %c0_68 = arith.constant 0 : index
    %73 = vector.load %arg6[%c0_66, %c1_67, %c0_68] : memref<1x2x128xf32, #tpu.memory_space<vmem>>, vector<1x1x128xf32>
    %74 = vector.shape_cast %73 : vector<1x1x128xf32> to vector<1x128xf32>
    %75 = vector.shape_cast %54 : vector<1x128xf32> to vector<1x1x128xf32>
    tpu.vector_store %arg6[%c0_66, %c1_67, %c0_68], %75 {strides = array<i32>} : memref<1x2x128xf32, #tpu.memory_space<vmem>>, vector<1x1x128xf32>,
    %c0_69 = arith.constant 0 : index
    %c0_70 = arith.constant 0 : index
    %c0_71 = arith.constant 0 : index
    %76 = vector.load %arg7[%c0_69, %c0_70, %c0_71] : memref<1x2x128xf32, #tpu.memory_space<vmem>>, vector<1x1x128xf32>
    %77 = vector.shape_cast %76 : vector<1x1x128xf32> to vector<1x128xf32>
    %78 = vector.shape_cast %65 : vector<1x128xf32> to vector<1x1x128xf32>
    tpu.vector_store %arg7[%c0_69, %c0_70, %c0_71], %78 {strides = array<i32>} : memref<1x2x128xf32, #tpu.memory_space<vmem>>, vector<1x1x128xf32>,
    %c0_72 = arith.constant 0 : index
    %c1_73 = arith.constant 1 : index
    %c0_74 = arith.constant 0 : index
    %79 = vector.load %arg7[%c0_72, %c1_73, %c0_74] : memref<1x2x128xf32, #tpu.memory_space<vmem>>, vector<1x1x128xf32>
    %80 = vector.shape_cast %79 : vector<1x1x128xf32> to vector<1x128xf32>
    %81 = vector.shape_cast %69 : vector<1x128xf32> to vector<1x1x128xf32>
    tpu.vector_store %arg7[%c0_72, %c1_73, %c0_74], %81 {strides = array<i32>} : memref<1x2x128xf32, #tpu.memory_space<vmem>>, vector<1x1x128xf32>,
    return
  }
  func.func @transform_0(%arg0: i32) -> (i32, i32, i32, i32) {
    %c0_i32 = arith.constant 0 : i32
    %c0_i32_0 = arith.constant 0 : i32
    %c0_i32_1 = arith.constant 0 : i32
    %c0_i32_2 = arith.constant 0 : i32
    return %arg0, %c0_i32, %c0_i32_0, %c0_i32_1 : i32, i32, i32, i32
  }
  func.func @transform_1(%arg0: i32) -> (i32, i32) {
    %c0_i32 = arith.constant 0 : i32
    %c0_i32_0 = arith.constant 0 : i32
    %c0_i32_1 = arith.constant 0 : i32
    return %c0_i32, %c0_i32_0 : i32, i32
  }
  func.func @transform_2(%arg0: i32) -> (i32, i32) {
    %c0_i32 = arith.constant 0 : i32
    %c0_i32_0 = arith.constant 0 : i32
    %c0_i32_1 = arith.constant 0 : i32
    return %c0_i32, %c0_i32_0 : i32, i32
  }
  func.func @transform_3(%arg0: i32) -> (i32, i32, i32) {
    %c0_i32 = arith.constant 0 : i32
    %c0_i32_0 = arith.constant 0 : i32
    %c0_i32_1 = arith.constant 0 : i32
    return %arg0, %c0_i32, %c0_i32_0 : i32, i32, i32
  }
  func.func @transform_4(%arg0: i32) -> (i32, i32, i32) {
    %c0_i32 = arith.constant 0 : i32
    %c0_i32_0 = arith.constant 0 : i32
    %c0_i32_1 = arith.constant 0 : i32
    return %arg0, %c0_i32, %c0_i32_0 : i32, i32, i32
  }
  func.func @transform_5(%arg0: i32) -> (i32, i32, i32) {
    %c0_i32 = arith.constant 0 : i32
    %c0_i32_0 = arith.constant 0 : i32
    %c0_i32_1 = arith.constant 0 : i32
    return %arg0, %c0_i32, %c0_i32_0 : i32, i32, i32
  }
  func.func @transform_6(%arg0: i32) -> (i32, i32, i32) {
    %c0_i32 = arith.constant 0 : i32
    %c0_i32_0 = arith.constant 0 : i32
    %c0_i32_1 = arith.constant 0 : i32
    return %arg0, %c0_i32, %c0_i32_0 : i32, i32, i32
  }
}

module attributes {stable_mosaic.version = 11 : i64} {
  func.func @_pass2_kernel(%arg0: i32, %arg1: memref<1x64x128xbf16, #tpu.memory_space<vmem>>, %arg2: memref<1x128xf32, #tpu.memory_space<vmem>>, %arg3: memref<1x128xf32, #tpu.memory_space<vmem>>, %arg4: memref<1152x128xbf16, #tpu.memory_space<vmem>>, %arg5: memref<1x64x128xbf16, #tpu.memory_space<vmem>>, %arg6: memref<1x2x128xf32, #tpu.memory_space<vmem>>, %arg7: memref<10x10x128xbf16, #tpu.memory_space<vmem>>, %arg8: memref<64x1152xbf16, #tpu.memory_space<vmem>>) attributes {dimension_semantics = [#tpu.dimension_semantics<parallel>], iteration_bounds = array<i64: 2>, scalar_prefetch = 0 : i64, scratch_operands = 2 : i64, tpu.core_type = #tpu.core_type<tc>, window_params = [{transform_indices = @transform_0, window_bounds = array<i64: 1, 64, 128>}, {pipeline_mode = #tpu.pipeline_mode<synchronous>, transform_indices = @transform_1, window_bounds = array<i64: 1, 128>}, {pipeline_mode = #tpu.pipeline_mode<synchronous>, transform_indices = @transform_2, window_bounds = array<i64: 1, 128>}, {pipeline_mode = #tpu.pipeline_mode<synchronous>, transform_indices = @transform_3, window_bounds = array<i64: 1152, 128>}, {transform_indices = @transform_4, window_bounds = array<i64: 1, 64, 128>}, {transform_indices = @transform_5, window_bounds = array<i64: 1, 2, 128>}]} {
    %cst = arith.constant 0.000000e+00 : bf16
    %0 = vector.broadcast %cst : bf16 to vector<1x10x128xbf16>
    %c0 = arith.constant 0 : index
    %c0_0 = arith.constant 0 : index
    %c0_1 = arith.constant 0 : index
    %1 = vector.load %arg7[%c0, %c0_0, %c0_1] : memref<10x10x128xbf16, #tpu.memory_space<vmem>>, vector<1x10x128xbf16>
    tpu.vector_store %arg7[%c0, %c0_0, %c0_1], %0 {strides = array<i32>} : memref<10x10x128xbf16, #tpu.memory_space<vmem>>, vector<1x10x128xbf16>,
    %cst_2 = arith.constant 0.000000e+00 : bf16
    %2 = vector.broadcast %cst_2 : bf16 to vector<1x10x128xbf16>
    %c9 = arith.constant 9 : index
    %c0_3 = arith.constant 0 : index
    %c0_4 = arith.constant 0 : index
    %3 = vector.load %arg7[%c9, %c0_3, %c0_4] : memref<10x10x128xbf16, #tpu.memory_space<vmem>>, vector<1x10x128xbf16>
    tpu.vector_store %arg7[%c9, %c0_3, %c0_4], %2 {strides = array<i32>} : memref<10x10x128xbf16, #tpu.memory_space<vmem>>, vector<1x10x128xbf16>,
    %cst_5 = arith.constant 0.000000e+00 : bf16
    %4 = vector.broadcast %cst_5 : bf16 to vector<10x1x128xbf16>
    %c0_6 = arith.constant 0 : index
    %c0_7 = arith.constant 0 : index
    %c0_8 = arith.constant 0 : index
    %5 = vector.load %arg7[%c0_6, %c0_7, %c0_8] : memref<10x10x128xbf16, #tpu.memory_space<vmem>>, vector<10x1x128xbf16>
    tpu.vector_store %arg7[%c0_6, %c0_7, %c0_8], %4 {strides = array<i32>} : memref<10x10x128xbf16, #tpu.memory_space<vmem>>, vector<10x1x128xbf16>,
    %cst_9 = arith.constant 0.000000e+00 : bf16
    %6 = vector.broadcast %cst_9 : bf16 to vector<10x1x128xbf16>
    %c0_10 = arith.constant 0 : index
    %c9_11 = arith.constant 9 : index
    %c0_12 = arith.constant 0 : index
    %7 = vector.load %arg7[%c0_10, %c9_11, %c0_12] : memref<10x10x128xbf16, #tpu.memory_space<vmem>>, vector<10x1x128xbf16>
    tpu.vector_store %arg7[%c0_10, %c9_11, %c0_12], %6 {strides = array<i32>} : memref<10x10x128xbf16, #tpu.memory_space<vmem>>, vector<10x1x128xbf16>,
    %c0_13 = arith.constant 0 : index
    %c0_14 = arith.constant 0 : index
    %8 = vector.load %arg2[%c0_13, %c0_14] : memref<1x128xf32, #tpu.memory_space<vmem>>, vector<1x128xf32>
    %c0_15 = arith.constant 0 : index
    %c0_16 = arith.constant 0 : index
    %9 = vector.load %arg3[%c0_15, %c0_16] : memref<1x128xf32, #tpu.memory_space<vmem>>, vector<1x128xf32>
    %c0_17 = arith.constant 0 : index
    %c0_18 = arith.constant 0 : index
    %c0_19 = arith.constant 0 : index
    %10 = vector.load %arg1[%c0_17, %c0_18, %c0_19] : memref<1x64x128xbf16, #tpu.memory_space<vmem>>, vector<1x64x128xbf16>
    %11 = vector.shape_cast %10 : vector<1x64x128xbf16> to vector<64x128xbf16>
    %12 = arith.extf %11 : vector<64x128xbf16> to vector<64x128xf32>
    %13 = vector.broadcast %8 : vector<1x128xf32> to vector<64x128xf32>
    %14 = arith.mulf %12, %13 : vector<64x128xf32>
    %15 = vector.broadcast %9 : vector<1x128xf32> to vector<64x128xf32>
    %16 = arith.addf %14, %15 : vector<64x128xf32>
    %cst_20 = arith.constant 0.000000e+00 : f32
    %17 = vector.broadcast %cst_20 : f32 to vector<64x128xf32>
    %18 = arith.maximumf %16, %17 : vector<64x128xf32>
    %19 = arith.truncf %18 : vector<64x128xf32> to vector<64x128xbf16>
    %20 = vector.shape_cast %19 : vector<64x128xbf16> to vector<8x8x128xbf16>
    %c1 = arith.constant 1 : index
    %c1_21 = arith.constant 1 : index
    %c0_22 = arith.constant 0 : index
    %21 = vector.load %arg7[%c1, %c1_21, %c0_22] : memref<10x10x128xbf16, #tpu.memory_space<vmem>>, vector<8x8x128xbf16>
    tpu.vector_store %arg7[%c1, %c1_21, %c0_22], %20 {strides = array<i32>} : memref<10x10x128xbf16, #tpu.memory_space<vmem>>, vector<8x8x128xbf16>,
    %cst_23 = arith.constant 0.000000e+00 : f32
    %22 = vector.broadcast %cst_23 : f32 to vector<1x128xf32>
    %cst_24 = arith.constant 0.000000e+00 : f32
    %23 = vector.broadcast %cst_24 : f32 to vector<1x128xf32>
    %c0_25 = arith.constant 0 : index
    %c0_26 = arith.constant 0 : index
    %c0_27 = arith.constant 0 : index
    %24 = vector.load %arg7[%c0_25, %c0_26, %c0_27] : memref<10x10x128xbf16, #tpu.memory_space<vmem>>, vector<8x8x128xbf16>
    %25 = vector.shape_cast %24 : vector<8x8x128xbf16> to vector<64x128xbf16>
    %c0_28 = arith.constant 0 : index
    %c0_29 = arith.constant 0 : index
    %26 = vector.load %arg8[%c0_28, %c0_29] : memref<64x1152xbf16, #tpu.memory_space<vmem>>, vector<64x128xbf16>
    tpu.vector_store %arg8[%c0_28, %c0_29], %25 {strides = array<i32>} : memref<64x1152xbf16, #tpu.memory_space<vmem>>, vector<64x128xbf16>,
    %c0_30 = arith.constant 0 : index
    %c1_31 = arith.constant 1 : index
    %c0_32 = arith.constant 0 : index
    %27 = vector.load %arg7[%c0_30, %c1_31, %c0_32] : memref<10x10x128xbf16, #tpu.memory_space<vmem>>, vector<8x8x128xbf16>
    %28 = vector.shape_cast %27 : vector<8x8x128xbf16> to vector<64x128xbf16>
    %c0_33 = arith.constant 0 : index
    %c128 = arith.constant 128 : index
    %29 = vector.load %arg8[%c0_33, %c128] : memref<64x1152xbf16, #tpu.memory_space<vmem>>, vector<64x128xbf16>
    tpu.vector_store %arg8[%c0_33, %c128], %28 {strides = array<i32>} : memref<64x1152xbf16, #tpu.memory_space<vmem>>, vector<64x128xbf16>,
    %c0_34 = arith.constant 0 : index
    %c2 = arith.constant 2 : index
    %c0_35 = arith.constant 0 : index
    %30 = vector.load %arg7[%c0_34, %c2, %c0_35] : memref<10x10x128xbf16, #tpu.memory_space<vmem>>, vector<8x8x128xbf16>
    %31 = vector.shape_cast %30 : vector<8x8x128xbf16> to vector<64x128xbf16>
    %c0_36 = arith.constant 0 : index
    %c256 = arith.constant 256 : index
    %32 = vector.load %arg8[%c0_36, %c256] : memref<64x1152xbf16, #tpu.memory_space<vmem>>, vector<64x128xbf16>
    tpu.vector_store %arg8[%c0_36, %c256], %31 {strides = array<i32>} : memref<64x1152xbf16, #tpu.memory_space<vmem>>, vector<64x128xbf16>,
    %c1_37 = arith.constant 1 : index
    %c0_38 = arith.constant 0 : index
    %c0_39 = arith.constant 0 : index
    %33 = vector.load %arg7[%c1_37, %c0_38, %c0_39] : memref<10x10x128xbf16, #tpu.memory_space<vmem>>, vector<8x8x128xbf16>
    %34 = vector.shape_cast %33 : vector<8x8x128xbf16> to vector<64x128xbf16>
    %c0_40 = arith.constant 0 : index
    %c384 = arith.constant 384 : index
    %35 = vector.load %arg8[%c0_40, %c384] : memref<64x1152xbf16, #tpu.memory_space<vmem>>, vector<64x128xbf16>
    tpu.vector_store %arg8[%c0_40, %c384], %34 {strides = array<i32>} : memref<64x1152xbf16, #tpu.memory_space<vmem>>, vector<64x128xbf16>,
    %c1_41 = arith.constant 1 : index
    %c1_42 = arith.constant 1 : index
    %c0_43 = arith.constant 0 : index
    %36 = vector.load %arg7[%c1_41, %c1_42, %c0_43] : memref<10x10x128xbf16, #tpu.memory_space<vmem>>, vector<8x8x128xbf16>
    %37 = vector.shape_cast %36 : vector<8x8x128xbf16> to vector<64x128xbf16>
    %c0_44 = arith.constant 0 : index
    %c512 = arith.constant 512 : index
    %38 = vector.load %arg8[%c0_44, %c512] : memref<64x1152xbf16, #tpu.memory_space<vmem>>, vector<64x128xbf16>
    tpu.vector_store %arg8[%c0_44, %c512], %37 {strides = array<i32>} : memref<64x1152xbf16, #tpu.memory_space<vmem>>, vector<64x128xbf16>,
    %c1_45 = arith.constant 1 : index
    %c2_46 = arith.constant 2 : index
    %c0_47 = arith.constant 0 : index
    %39 = vector.load %arg7[%c1_45, %c2_46, %c0_47] : memref<10x10x128xbf16, #tpu.memory_space<vmem>>, vector<8x8x128xbf16>
    %40 = vector.shape_cast %39 : vector<8x8x128xbf16> to vector<64x128xbf16>
    %c0_48 = arith.constant 0 : index
    %c640 = arith.constant 640 : index
    %41 = vector.load %arg8[%c0_48, %c640] : memref<64x1152xbf16, #tpu.memory_space<vmem>>, vector<64x128xbf16>
    tpu.vector_store %arg8[%c0_48, %c640], %40 {strides = array<i32>} : memref<64x1152xbf16, #tpu.memory_space<vmem>>, vector<64x128xbf16>,
    %c2_49 = arith.constant 2 : index
    %c0_50 = arith.constant 0 : index
    %c0_51 = arith.constant 0 : index
    %42 = vector.load %arg7[%c2_49, %c0_50, %c0_51] : memref<10x10x128xbf16, #tpu.memory_space<vmem>>, vector<8x8x128xbf16>
    %43 = vector.shape_cast %42 : vector<8x8x128xbf16> to vector<64x128xbf16>
    %c0_52 = arith.constant 0 : index
    %c768 = arith.constant 768 : index
    %44 = vector.load %arg8[%c0_52, %c768] : memref<64x1152xbf16, #tpu.memory_space<vmem>>, vector<64x128xbf16>
    tpu.vector_store %arg8[%c0_52, %c768], %43 {strides = array<i32>} : memref<64x1152xbf16, #tpu.memory_space<vmem>>, vector<64x128xbf16>,
    %c2_53 = arith.constant 2 : index
    %c1_54 = arith.constant 1 : index
    %c0_55 = arith.constant 0 : index
    %45 = vector.load %arg7[%c2_53, %c1_54, %c0_55] : memref<10x10x128xbf16, #tpu.memory_space<vmem>>, vector<8x8x128xbf16>
    %46 = vector.shape_cast %45 : vector<8x8x128xbf16> to vector<64x128xbf16>
    %c0_56 = arith.constant 0 : index
    %c896 = arith.constant 896 : index
    %47 = vector.load %arg8[%c0_56, %c896] : memref<64x1152xbf16, #tpu.memory_space<vmem>>, vector<64x128xbf16>
    tpu.vector_store %arg8[%c0_56, %c896], %46 {strides = array<i32>} : memref<64x1152xbf16, #tpu.memory_space<vmem>>, vector<64x128xbf16>,
    %c2_57 = arith.constant 2 : index
    %c2_58 = arith.constant 2 : index
    %c0_59 = arith.constant 0 : index
    %48 = vector.load %arg7[%c2_57, %c2_58, %c0_59] : memref<10x10x128xbf16, #tpu.memory_space<vmem>>, vector<8x8x128xbf16>
    %49 = vector.shape_cast %48 : vector<8x8x128xbf16> to vector<64x128xbf16>
    %c0_60 = arith.constant 0 : index
    %c1024 = arith.constant 1024 : index
    %50 = vector.load %arg8[%c0_60, %c1024] : memref<64x1152xbf16, #tpu.memory_space<vmem>>, vector<64x128xbf16>
    tpu.vector_store %arg8[%c0_60, %c1024], %49 {strides = array<i32>} : memref<64x1152xbf16, #tpu.memory_space<vmem>>, vector<64x128xbf16>,
    %c0_61 = arith.constant 0 : index
    %c0_62 = arith.constant 0 : index
    %51 = vector.load %arg8[%c0_61, %c0_62] : memref<64x1152xbf16, #tpu.memory_space<vmem>>, vector<64x1152xbf16>
    %c0_63 = arith.constant 0 : index
    %c0_64 = arith.constant 0 : index
    %52 = vector.load %arg4[%c0_63, %c0_64] : memref<1152x128xbf16, #tpu.memory_space<vmem>>, vector<1152x128xbf16>
    %cst_65 = arith.constant dense<0.000000e+00> : vector<64x128xf32>
    %53 = tpu.matmul %51, %52, %cst_65 {dimension_numbers = #tpu.dot_dimension_numbers<[1], [0], [0], [1], [0, 0, 1, 1], [], []>} : vector<64x1152xbf16>, vector<1152x128xbf16>, vector<64x128xf32> -> vector<64x128xf32>
    %54 = arith.truncf %53 : vector<64x128xf32> to vector<64x128xbf16>
    %c0_66 = arith.constant 0 : index
    %c0_67 = arith.constant 0 : index
    %c0_68 = arith.constant 0 : index
    %55 = vector.load %arg5[%c0_66, %c0_67, %c0_68] : memref<1x64x128xbf16, #tpu.memory_space<vmem>>, vector<1x64x128xbf16>
    %56 = vector.shape_cast %55 : vector<1x64x128xbf16> to vector<64x128xbf16>
    %57 = vector.shape_cast %54 : vector<64x128xbf16> to vector<1x64x128xbf16>
    tpu.vector_store %arg5[%c0_66, %c0_67, %c0_68], %57 {strides = array<i32>} : memref<1x64x128xbf16, #tpu.memory_space<vmem>>, vector<1x64x128xbf16>,
    %58 = arith.extf %54 : vector<64x128xbf16> to vector<64x128xf32>
    %cst_69 = arith.constant dense<0.000000e+00> : vector<128xf32>
    %59 = vector.multi_reduction <add>, %58, %cst_69 [0] : vector<64x128xf32> to vector<128xf32>
    %60 = vector.shape_cast %59 : vector<128xf32> to vector<1x128xf32>
    %61 = arith.addf %22, %60 : vector<1x128xf32>
    %62 = arith.mulf %58, %58 : vector<64x128xf32>
    %cst_70 = arith.constant dense<0.000000e+00> : vector<128xf32>
    %63 = vector.multi_reduction <add>, %62, %cst_70 [0] : vector<64x128xf32> to vector<128xf32>
    %64 = vector.shape_cast %63 : vector<128xf32> to vector<1x128xf32>
    %65 = arith.addf %23, %64 : vector<1x128xf32>
    %c0_71 = arith.constant 0 : index
    %c0_72 = arith.constant 0 : index
    %c0_73 = arith.constant 0 : index
    %66 = vector.load %arg6[%c0_71, %c0_72, %c0_73] : memref<1x2x128xf32, #tpu.memory_space<vmem>>, vector<1x1x128xf32>
    %67 = vector.shape_cast %66 : vector<1x1x128xf32> to vector<1x128xf32>
    %68 = vector.shape_cast %61 : vector<1x128xf32> to vector<1x1x128xf32>
    tpu.vector_store %arg6[%c0_71, %c0_72, %c0_73], %68 {strides = array<i32>} : memref<1x2x128xf32, #tpu.memory_space<vmem>>, vector<1x1x128xf32>,
    %c0_74 = arith.constant 0 : index
    %c1_75 = arith.constant 1 : index
    %c0_76 = arith.constant 0 : index
    %69 = vector.load %arg6[%c0_74, %c1_75, %c0_76] : memref<1x2x128xf32, #tpu.memory_space<vmem>>, vector<1x1x128xf32>
    %70 = vector.shape_cast %69 : vector<1x1x128xf32> to vector<1x128xf32>
    %71 = vector.shape_cast %65 : vector<1x128xf32> to vector<1x1x128xf32>
    tpu.vector_store %arg6[%c0_74, %c1_75, %c0_76], %71 {strides = array<i32>} : memref<1x2x128xf32, #tpu.memory_space<vmem>>, vector<1x1x128xf32>,
    return
  }
  func.func @transform_0(%arg0: i32) -> (i32, i32, i32) {
    %c0_i32 = arith.constant 0 : i32
    %c0_i32_0 = arith.constant 0 : i32
    %c0_i32_1 = arith.constant 0 : i32
    return %arg0, %c0_i32, %c0_i32_0 : i32, i32, i32
  }
  func.func @transform_1(%arg0: i32) -> (i32, i32) {
    %c0_i32 = arith.constant 0 : i32
    %c0_i32_0 = arith.constant 0 : i32
    %c0_i32_1 = arith.constant 0 : i32
    return %c0_i32, %c0_i32_0 : i32, i32
  }
  func.func @transform_2(%arg0: i32) -> (i32, i32) {
    %c0_i32 = arith.constant 0 : i32
    %c0_i32_0 = arith.constant 0 : i32
    %c0_i32_1 = arith.constant 0 : i32
    return %c0_i32, %c0_i32_0 : i32, i32
  }
  func.func @transform_3(%arg0: i32) -> (i32, i32) {
    %c0_i32 = arith.constant 0 : i32
    %c0_i32_0 = arith.constant 0 : i32
    %c0_i32_1 = arith.constant 0 : i32
    return %c0_i32, %c0_i32_0 : i32, i32
  }
  func.func @transform_4(%arg0: i32) -> (i32, i32, i32) {
    %c0_i32 = arith.constant 0 : i32
    %c0_i32_0 = arith.constant 0 : i32
    %c0_i32_1 = arith.constant 0 : i32
    return %arg0, %c0_i32, %c0_i32_0 : i32, i32, i32
  }
  func.func @transform_5(%arg0: i32) -> (i32, i32, i32) {
    %c0_i32 = arith.constant 0 : i32
    %c0_i32_0 = arith.constant 0 : i32
    %c0_i32_1 = arith.constant 0 : i32
    return %arg0, %c0_i32, %c0_i32_0 : i32, i32, i32
  }
}

module attributes {stable_mosaic.version = 11 : i64} {
  func.func @_pass3_kernel(%arg0: i32, %arg1: memref<1x64x128xbf16, #tpu.memory_space<vmem>>, %arg2: memref<1x64x128xbf16, #tpu.memory_space<vmem>>, %arg3: memref<1x128xf32, #tpu.memory_space<vmem>>, %arg4: memref<1x128xf32, #tpu.memory_space<vmem>>, %arg5: memref<1x128xf32, #tpu.memory_space<vmem>>, %arg6: memref<1x128xf32, #tpu.memory_space<vmem>>, %arg7: memref<1x64x128xf32, #tpu.memory_space<vmem>>) attributes {dimension_semantics = [#tpu.dimension_semantics<parallel>], iteration_bounds = array<i64: 2>, scalar_prefetch = 0 : i64, scratch_operands = 0 : i64, tpu.core_type = #tpu.core_type<tc>, window_params = [{transform_indices = @transform_0, window_bounds = array<i64: 1, 64, 128>}, {transform_indices = @transform_1, window_bounds = array<i64: 1, 64, 128>}, {pipeline_mode = #tpu.pipeline_mode<synchronous>, transform_indices = @transform_2, window_bounds = array<i64: 1, 128>}, {pipeline_mode = #tpu.pipeline_mode<synchronous>, transform_indices = @transform_3, window_bounds = array<i64: 1, 128>}, {pipeline_mode = #tpu.pipeline_mode<synchronous>, transform_indices = @transform_4, window_bounds = array<i64: 1, 128>}, {pipeline_mode = #tpu.pipeline_mode<synchronous>, transform_indices = @transform_5, window_bounds = array<i64: 1, 128>}, {transform_indices = @transform_6, window_bounds = array<i64: 1, 64, 128>}]} {
    %c0 = arith.constant 0 : index
    %c0_0 = arith.constant 0 : index
    %c0_1 = arith.constant 0 : index
    %0 = vector.load %arg1[%c0, %c0_0, %c0_1] : memref<1x64x128xbf16, #tpu.memory_space<vmem>>, vector<1x64x128xbf16>
    %1 = vector.shape_cast %0 : vector<1x64x128xbf16> to vector<64x128xbf16>
    %2 = arith.extf %1 : vector<64x128xbf16> to vector<64x128xf32>
    %c0_2 = arith.constant 0 : index
    %c0_3 = arith.constant 0 : index
    %3 = vector.load %arg3[%c0_2, %c0_3] : memref<1x128xf32, #tpu.memory_space<vmem>>, vector<1x128xf32>
    %4 = vector.broadcast %3 : vector<1x128xf32> to vector<64x128xf32>
    %5 = arith.mulf %2, %4 : vector<64x128xf32>
    %c0_4 = arith.constant 0 : index
    %c0_5 = arith.constant 0 : index
    %6 = vector.load %arg4[%c0_4, %c0_5] : memref<1x128xf32, #tpu.memory_space<vmem>>, vector<1x128xf32>
    %7 = vector.broadcast %6 : vector<1x128xf32> to vector<64x128xf32>
    %8 = arith.addf %5, %7 : vector<64x128xf32>
    %c0_6 = arith.constant 0 : index
    %c0_7 = arith.constant 0 : index
    %c0_8 = arith.constant 0 : index
    %9 = vector.load %arg2[%c0_6, %c0_7, %c0_8] : memref<1x64x128xbf16, #tpu.memory_space<vmem>>, vector<1x64x128xbf16>
    %10 = vector.shape_cast %9 : vector<1x64x128xbf16> to vector<64x128xbf16>
    %11 = arith.extf %10 : vector<64x128xbf16> to vector<64x128xf32>
    %c0_9 = arith.constant 0 : index
    %c0_10 = arith.constant 0 : index
    %12 = vector.load %arg5[%c0_9, %c0_10] : memref<1x128xf32, #tpu.memory_space<vmem>>, vector<1x128xf32>
    %13 = vector.broadcast %12 : vector<1x128xf32> to vector<64x128xf32>
    %14 = arith.mulf %11, %13 : vector<64x128xf32>
    %c0_11 = arith.constant 0 : index
    %c0_12 = arith.constant 0 : index
    %15 = vector.load %arg6[%c0_11, %c0_12] : memref<1x128xf32, #tpu.memory_space<vmem>>, vector<1x128xf32>
    %16 = vector.broadcast %15 : vector<1x128xf32> to vector<64x128xf32>
    %17 = arith.addf %14, %16 : vector<64x128xf32>
    %18 = arith.addf %8, %17 : vector<64x128xf32>
    %cst = arith.constant 0.000000e+00 : f32
    %19 = vector.broadcast %cst : f32 to vector<64x128xf32>
    %20 = arith.maximumf %18, %19 : vector<64x128xf32>
    %c0_13 = arith.constant 0 : index
    %c0_14 = arith.constant 0 : index
    %c0_15 = arith.constant 0 : index
    %21 = vector.load %arg7[%c0_13, %c0_14, %c0_15] : memref<1x64x128xf32, #tpu.memory_space<vmem>>, vector<1x64x128xf32>
    %22 = vector.shape_cast %21 : vector<1x64x128xf32> to vector<64x128xf32>
    %23 = vector.shape_cast %20 : vector<64x128xf32> to vector<1x64x128xf32>
    tpu.vector_store %arg7[%c0_13, %c0_14, %c0_15], %23 {strides = array<i32>} : memref<1x64x128xf32, #tpu.memory_space<vmem>>, vector<1x64x128xf32>,
    return
  }
  func.func @transform_0(%arg0: i32) -> (i32, i32, i32) {
    %c0_i32 = arith.constant 0 : i32
    %c0_i32_0 = arith.constant 0 : i32
    %c0_i32_1 = arith.constant 0 : i32
    return %arg0, %c0_i32, %c0_i32_0 : i32, i32, i32
  }
  func.func @transform_1(%arg0: i32) -> (i32, i32, i32) {
    %c0_i32 = arith.constant 0 : i32
    %c0_i32_0 = arith.constant 0 : i32
    %c0_i32_1 = arith.constant 0 : i32
    return %arg0, %c0_i32, %c0_i32_0 : i32, i32, i32
  }
  func.func @transform_2(%arg0: i32) -> (i32, i32) {
    %c0_i32 = arith.constant 0 : i32
    %c0_i32_0 = arith.constant 0 : i32
    %c0_i32_1 = arith.constant 0 : i32
    return %c0_i32, %c0_i32_0 : i32, i32
  }
  func.func @transform_3(%arg0: i32) -> (i32, i32) {
    %c0_i32 = arith.constant 0 : i32
    %c0_i32_0 = arith.constant 0 : i32
    %c0_i32_1 = arith.constant 0 : i32
    return %c0_i32, %c0_i32_0 : i32, i32
  }
  func.func @transform_4(%arg0: i32) -> (i32, i32) {
    %c0_i32 = arith.constant 0 : i32
    %c0_i32_0 = arith.constant 0 : i32
    %c0_i32_1 = arith.constant 0 : i32
    return %c0_i32, %c0_i32_0 : i32, i32
  }
  func.func @transform_5(%arg0: i32) -> (i32, i32) {
    %c0_i32 = arith.constant 0 : i32
    %c0_i32_0 = arith.constant 0 : i32
    %c0_i32_1 = arith.constant 0 : i32
    return %c0_i32, %c0_i32_0 : i32, i32
  }
  func.func @transform_6(%arg0: i32) -> (i32, i32, i32) {
    %c0_i32 = arith.constant 0 : i32
    %c0_i32_0 = arith.constant 0 : i32
    %c0_i32_1 = arith.constant 0 : i32
    return %arg0, %c0_i32, %c0_i32_0 : i32, i32, i32
  }
}

</mosaic_0001>

<bundles_post_ra>
// kernel: simple_block_forward.5
= control target key start
LH: loop header
LB: loop body
LE: loop exit
PB: predicated region body
PF: predicated region fallthrough
CT: control target
= control target key end

     0   :  { %s564_s21 = smov 0   ;;  %s662_s0 = inlined_call_operand.vmem [shape: bf16[2,64,128], index: 0, kind: input, shape index: {}]   ;;  %s663_s1 = inlined_call_operand.vmem [shape: bf16[2,64,128], index: 1, kind: input, shape index: {}]   ;;  %s664_s2 = inlined_call_operand.vmem [shape: f32[1,128], index: 2, kind: input, shape index: {}]   ;;  %s665_s3 = inlined_call_operand.vmem [shape: f32[1,128], index: 3, kind: input, shape index: {}]   ;;  %s666_s4 = inlined_call_operand.vmem [shape: f32[1,128], index: 4, kind: input, shape index: {}]   ;;  %s667_s5 = inlined_call_operand.vmem [shape: f32[1,128], index: 5, kind: input, shape index: {}]   ;;  %s668_s6 = inlined_call_operand.vmem [shape: f32[2,64,128], index: 6, kind: output, shape index: {}]  }
   0x1 LB: > { %s455_s22 = sadd.s32 4294967295, %s527_s21   ;;  %p459_p0 = scmp.ge.s32.totalorder %s527_s21, 1  ;;  %s527_s21 = sphi %s564_s21, %s16_s21  }
   0x2   : > { %p222_p1 = scmp.lt.s32.totalorder %s527_s21, 3 }
   0x4   : > { %p223_p2 = pnand %p459_p0, %p222_p1 }
   0x5   : > { %p257_p3 = scmp.lt.s32.totalorder (!%p223_p2), %s455_s22, 1  ;;  %v588_v0 = vld [vmem:[%s664_s2] ss:$0 sm:$0xff] (!%p223_p2) }
   0x6   : > { %226 = sbr.rel (%p223_p2) target bundleno = 39 (0x27), region = 44  ;;  %v593_v1 = vld [vmem:[%s666_s4] ss:$0 sm:$0xff] (!%p223_p2) }
   0x7   : > { %v602_v10 = vld [vmem:[%s665_s3] ss:$0 sm:$0xff] (!%p223_p2) }
   0x8   : > { %v607_v11 = vld [vmem:[%s667_s5] ss:$0 sm:$0xff] (!%p223_p2) }
   0xd   : > { %s670_s22 = smov (!%p257_p3, %s455_s22), 1 }
   0xe   : > { %s472_s23 = sshll.u32 %s670_s22, 5  ;;  %s474_s14 = sshll.u32 %s670_s22, 6 }
   0xf   : > { %s578_s26 = scalar_lea.vmem %s662_s0, %s472_s23  ;;  %s583_s29 = scalar_lea.vmem %s663_s1, %s472_s23 }
  0x10   : > { %v476_v2 = vld [vmem:[%s578_s26] sm:$0xff]   ;;  %v507_v4 = vld [vmem:[%s578_s26 + $0x8] sm:$0xff]   ;;  %v508_v24 = vld [vmem:[%s578_s26 + $0x10] sm:$0xff]   ;;  %s631_s17 = scalar_lea.vmem %s668_s6, %s474_s14 }
  0x11   : > { %v492_v3 = vld [vmem:[%s583_s29] sm:$0xff]   ;;  %v477_v5 = vunpack.c.l.bf16 %v476_v2  ;;  %v478_v7 = vunpack.c.h.bf16 %v476_v2  ;;  %v510_v9 = vld [vmem:[%s583_s29 + $0x8] sm:$0xff]   ;;  %v481_v12 = vunpack.c.l.bf16 %v507_v4  ;;  %v482_v14 = vunpack.c.h.bf16 %v507_v4  ;;  %v511_v25 = vld [vmem:[%s583_s29 + $0x10] sm:$0xff]  }
  0x12   : > { %v493_v6 = vunpack.c.l.bf16 %v492_v3  ;;  %v494_v8 = vunpack.c.h.bf16 %v492_v3  ;;  %v497_v13 = vunpack.c.l.bf16 %v510_v9  ;;  %v498_v15 = vunpack.c.h.bf16 %v510_v9  ;;  %v509_v42 = vld [vmem:[%s578_s26 + $0x18] sm:$0xff]  }
  0x13   : > { %v295_v16 = vmul.f32 %v477_v5, %v588_v0  ;;  %v296_v18 = vmul.f32 %v478_v7, %v588_v0  ;;  %v297_v20 = vmul.f32 %v481_v12, %v588_v0  ;;  %v298_v22 = vmul.f32 %v482_v14, %v588_v0  ;;  %v512_v43 = vld [vmem:[%s583_s29 + $0x18] sm:$0xff]  }
  0x14   : > { %v341_v17 = vmul.f32 %v493_v6, %v593_v1  ;;  %v342_v19 = vmul.f32 %v494_v8, %v593_v1  ;;  %v343_v21 = vmul.f32 %v497_v13, %v593_v1  ;;  %v344_v23 = vmul.f32 %v498_v15, %v593_v1 }
  0x15   : > { %v310_v26 = vadd.f32 %v602_v10, %v295_v16  ;;  %v311_v28 = vadd.f32 %v602_v10, %v296_v18  ;;  %v312_v30 = vadd.f32 %v602_v10, %v297_v20  ;;  %v313_v32 = vadd.f32 %v602_v10, %v298_v22 }
  0x16   : > { %v356_v27 = vadd.f32 %v607_v11, %v341_v17  ;;  %v357_v29 = vadd.f32 %v607_v11, %v342_v19  ;;  %v358_v31 = vadd.f32 %v607_v11, %v343_v21  ;;  %v359_v33 = vadd.f32 %v607_v11, %v344_v23 }
  0x17   : > { %v485_v36 = vunpack.c.l.bf16 %v508_v24  ;;  %v501_v37 = vunpack.c.l.bf16 %v511_v25  ;;  %v486_v40 = vunpack.c.h.bf16 %v508_v24  ;;  %v502_v41 = vunpack.c.h.bf16 %v511_v25 }
  0x18   : > { %v364_v34 = vadd.f32 %v356_v27, %v310_v26  ;;  %v365_v35 = vadd.f32 %v357_v29, %v311_v28  ;;  %v366_v38 = vadd.f32 %v358_v31, %v312_v30  ;;  %v367_v39 = vadd.f32 %v359_v33, %v313_v32 }
  0x19   : > { %v299_v46 = vmul.f32 %v485_v36, %v588_v0  ;;  %v345_v47 = vmul.f32 %v501_v37, %v593_v1  ;;  %v300_v50 = vmul.f32 %v486_v40, %v588_v0  ;;  %v346_v51 = vmul.f32 %v502_v41, %v593_v1 }
  0x1a   : > { %v372_v44 = vmax.f32 %v364_v34, 0.0  ;;  %v373_v45 = vmax.f32 %v365_v35, 0.0  ;;  %v374_v48 = vmax.f32 %v366_v38, 0.0  ;;  %v375_v49 = vmax.f32 %v367_v39, 0.0 }
  0x1b   : > { %v314_v52 = vadd.f32 %v602_v10, %v299_v46  ;;  %v360_v53 = vadd.f32 %v607_v11, %v345_v47  ;;  %v489_v54 = vunpack.c.l.bf16 %v509_v42  ;;  %v505_v55 = vunpack.c.l.bf16 %v512_v43 }
  0x1c   : > { %380 = vst [vmem:[%s631_s17] sm:$0xff] %v372_v44  ;;  %381 = vst [vmem:[%s631_s17 + $0x8] sm:$0xff] %v373_v45  ;;  %v315_v56 = vadd.f32 %v602_v10, %v300_v50  ;;  %v361_v57 = vadd.f32 %v607_v11, %v346_v51  ;;  %v490_v58 = vunpack.c.h.bf16 %v509_v42  ;;  %v506_v59 = vunpack.c.h.bf16 %v512_v43 }
  0x1d   : > { %382 = vst [vmem:[%s631_s17 + $0x10] sm:$0xff] %v374_v48  ;;  %383 = vst [vmem:[%s631_s17 + $0x18] sm:$0xff] %v375_v49  ;;  %v368_v60 = vadd.f32 %v360_v53, %v314_v52  ;;  %v301_v61 = vmul.f32 %v489_v54, %v588_v0  ;;  %v347_v62 = vmul.f32 %v505_v55, %v593_v1 }
  0x1e   : > { %v369_v63 = vadd.f32 %v361_v57, %v315_v56  ;;  %v302_v2 = vmul.f32 %v490_v58, %v588_v0  ;;  %v348_v3 = vmul.f32 %v506_v59, %v593_v1 }
  0x1f   : > { %v376_v4 = vmax.f32 %v368_v60, 0.0  ;;  %v316_v5 = vadd.f32 %v602_v10, %v301_v61  ;;  %v362_v6 = vadd.f32 %v607_v11, %v347_v62 }
  0x20   : > { %v377_v7 = vmax.f32 %v369_v63, 0.0  ;;  %v317_v8 = vadd.f32 %v602_v10, %v302_v2  ;;  %v363_v9 = vadd.f32 %v607_v11, %v348_v3 }
  0x21   : > { %384 = vst [vmem:[%s631_s17 + $0x20] sm:$0xff] %v376_v4  ;;  %v370_v12 = vadd.f32 %v362_v6, %v316_v5 }
  0x22   : > { %385 = vst [vmem:[%s631_s17 + $0x28] sm:$0xff] %v377_v7  ;;  %v371_v13 = vadd.f32 %v363_v9, %v317_v8 }
  0x23   : > { %v378_v14 = vmax.f32 %v370_v12, 0.0 }
  0x24   : > { %v379_v15 = vmax.f32 %v371_v13, 0.0 }
  0x25   : > { %386 = vst [vmem:[%s631_s17 + $0x30] sm:$0xff] %v378_v14 }
  0x26   : > { %387 = vst [vmem:[%s631_s17 + $0x38] sm:$0xff] %v379_v15 }
  0x27 PF: > { %s16_s21 = sadd.s32 1, %s527_s21  }
  0x28   : > { %p13_p4 = scmp.ge.s32.totalorder %s16_s21, 4  }
  0x2a   :  { %15 = sbr.rel (!%p13_p4) target bundleno = 1 (0x1), region = 77 }

// kernel: simple_block_forward.3
= control target key start
LH: loop header
LB: loop body
LE: loop exit
PB: predicated region body
PF: predicated region fallthrough
CT: control target
= control target key end

     0   :  { %s3016_s21 = smov 0   ;;  %s3479_s0 = inlined_call_operand.vmem [shape: bf16[2,36,9,128], index: 0, kind: input, shape index: {}]   ;;  %s3480_s1 = inlined_call_operand.vmem [shape: bf16[1152,128], index: 1, kind: input, shape index: {}]   ;;  %s3481_s2 = inlined_call_operand.vmem [shape: bf16[128,128], index: 2, kind: input, shape index: {}]   ;;  %s3482_s3 = inlined_call_operand.vmem [shape: bf16[2,64,128], index: 3, kind: output, shape index: {0}]   ;;  %s3483_s4 = inlined_call_operand.vmem [shape: bf16[2,64,128], index: 4, kind: output, shape index: {1}]   ;;  %s3484_s5 = inlined_call_operand.vmem [shape: f32[2,2,128], index: 5, kind: output, shape index: {2}]   ;;  %s3485_s6 = inlined_call_operand.vmem [shape: f32[2,2,128], index: 6, kind: output, shape index: {3}]  }
   0x1 LB: > { %s2346_s22 = sadd.s32 4294967295, %s2979_s21   ;;  %p2350_p0 = scmp.ge.s32.totalorder %s2979_s21, 1  ;;  %s2979_s21 = sphi %s3016_s21, %s17_s21  }
   0x2   : > { %p219_p1 = scmp.lt.s32.totalorder %s2979_s21, 3 }
   0x4   : > { %p220_p2 = pnand %p2350_p0, %p219_p1 }
   0x5   : > { %v2869_v0 = vld [vmem:[%s3480_s1 + $0x40] sm:$0xff] (!%p220_p2)   ;;  %v2873_v4 = vld [vmem:[%s3480_s1 + $0x48] sm:$0xff] (!%p220_p2)   ;;  %v2877_v8 = vld [vmem:[%s3480_s1 + $0x50] sm:$0xff] (!%p220_p2)   ;;  %p262_p3 = scmp.lt.s32.totalorder (!%p220_p2), %s2346_s22, 1  ;;  %vm375_vm0 = vsmask.f32 (!%p220_p2), 3328 }
   0x6   : > { %223 = sbr.rel (%p220_p2) target bundleno = 364 (0x16c), region = 32  ;;  %v2870_v1 = vld [vmem:[%s3480_s1 + $0xc0] sm:$0xff] (!%p220_p2)   ;;  %2628 = vmatprep.subr.bf16.mxu0 (!%p220_p2), %v2869_v0  ;;  %v2874_v5 = vld [vmem:[%s3480_s1 + $0xc8] sm:$0xff] (!%p220_p2)   ;;  %v2878_v9 = vld [vmem:[%s3480_s1 + $0xd0] sm:$0xff] (!%p220_p2)   ;;  %vm376_vm1 = vsmask.f32 (!%p220_p2), 7440 }
   0x7   : > { %v2871_v2 = vld [vmem:[%s3480_s1] sm:$0xff] (!%p220_p2)   ;;  %2668 = vmatprep.subr.bf16.mxu1 (!%p220_p2), %v2870_v1  ;;  %v2875_v6 = vld [vmem:[%s3480_s1 + $0x8] sm:$0xff] (!%p220_p2)   ;;  %v2879_v10 = vld [vmem:[%s3480_s1 + $0x10] sm:$0xff] (!%p220_p2)  }
   0x8   : > { %v2872_v3 = vld [vmem:[%s3480_s1 + $0x80] sm:$0xff] (!%p220_p2)   ;;  %2629 = vmatpush3.bf16.msra.mxu0 (!%p220_p2), %v2871_v2  ;;  %v2876_v7 = vld [vmem:[%s3480_s1 + $0x88] sm:$0xff] (!%p220_p2)   ;;  %v2880_v11 = vld [vmem:[%s3480_s1 + $0x90] sm:$0xff] (!%p220_p2)  }
   0x9   : > { %2669 = vmatpush3.bf16.msra.mxu1 (!%p220_p2), %v2872_v3  ;;  %2630 = vmatprep.subr.bf16.mxu0 (!%p220_p2), %v2873_v4  ;;  %v2881_v12 = vld [vmem:[%s3480_s1 + $0x58] sm:$0xff] (!%p220_p2)   ;;  %v2885_v16 = vld [vmem:[%s3480_s1 + $0x60] sm:$0xff] (!%p220_p2)   ;;  %v2889_v20 = vld [vmem:[%s3480_s1 + $0x68] sm:$0xff] (!%p220_p2)  }
   0xa   : > { %2670 = vmatprep.subr.bf16.mxu1 (!%p220_p2), %v2874_v5  ;;  %v2882_v13 = vld [vmem:[%s3480_s1 + $0xd8] sm:$0xff] (!%p220_p2)   ;;  %v2886_v17 = vld [vmem:[%s3480_s1 + $0xe0] sm:$0xff] (!%p220_p2)   ;;  %v2890_v21 = vld [vmem:[%s3480_s1 + $0xe8] sm:$0xff] (!%p220_p2)  }
   0xb   : > { %v2883_v14 = vld [vmem:[%s3480_s1 + $0x18] sm:$0xff] (!%p220_p2)   ;;  %v2887_v18 = vld [vmem:[%s3480_s1 + $0x20] sm:$0xff] (!%p220_p2)   ;;  %v2891_v22 = vld [vmem:[%s3480_s1 + $0x28] sm:$0xff] (!%p220_p2)  }
   0xc   : > { %2631 = vmatpush3.bf16.msra.mxu0 (!%p220_p2), %v2875_v6  ;;  %v2884_v15 = vld [vmem:[%s3480_s1 + $0x98] sm:$0xff] (!%p220_p2)   ;;  %v2888_v19 = vld [vmem:[%s3480_s1 + $0xa0] sm:$0xff] (!%p220_p2)   ;;  %v2892_v23 = vld [vmem:[%s3480_s1 + $0xa8] sm:$0xff] (!%p220_p2)  }
   0xd   : > { %2671 = vmatpush3.bf16.msra.mxu1 %v2876_v7  ;;  %2632 = vmatprep.subr.bf16.mxu0 %v2877_v8  ;;  %s3489_s22 = smov (!%p262_p3, %s2346_s22), 1  ;;  %v2893_v24 = vld [vmem:[%s3480_s1 + $0x70] sm:$0xff]   ;;  %v2897_v28 = vld [vmem:[%s3480_s1 + $0x78] sm:$0xff]   ;;  %v2904_v45 = vld [vmem:[%s3480_s1 + $0x140] sm:$0xff]  }
   0xe   : > { %2672 = vmatprep.subr.bf16.mxu1 %v2878_v9  ;;  %v2894_v25 = vld [vmem:[%s3480_s1 + $0xf0] sm:$0xff]   ;;  %s2860_s11 = smul.u32 288, %s3489_s22  ;;  %v2898_v29 = vld [vmem:[%s3480_s1 + $0xf8] sm:$0xff]   ;;  %v2905_v46 = vld [vmem:[%s3480_s1 + $0x1c0] sm:$0xff]   ;;  %s2356_s19 = sshll.u32 %s3489_s22, 1 }
   0xf   : > { %v2895_v26 = vld [vmem:[%s3480_s1 + $0x30] sm:$0xff]   ;;  %v2899_v30 = vld [vmem:[%s3480_s1 + $0x38] sm:$0xff]   ;;  %v2906_v53 = vld [vmem:[%s3480_s1 + $0x100] sm:$0xff]   ;;  %s284_s25 = scalar_lea.vmem %s3485_s6, %s2356_s19  ;;  %s280_s28 = scalar_lea.vmem %s3484_s5, %s2356_s19 }
  0x10   : > { %2633 = vmatpush3.bf16.msra.mxu0 %v2879_v10  ;;  %v2896_v27 = vld [vmem:[%s3480_s1 + $0xb0] sm:$0xff]   ;;  %v2900_v31 = vld [vmem:[%s3480_s1 + $0xb8] sm:$0xff]   ;;  %s3130_s24 = scalar_lea.vmem %s3479_s0, %s2860_s11  ;;  %vm3150_vm2 = vmor %vm375_vm0, %vm376_vm1 }
  0x11   : > { %2673 = vmatpush3.bf16.msra.mxu1 %v2880_v11  ;;  %2634 = vmatprep.subr.bf16.mxu0 %v2881_v12  ;;  %v2901_v32 = vld [vmem:[%s3130_s24 + $0x48] ss:$8 sps:$4 sm:$0xff]   ;;  %v359_v35 = vld [vmem:[%s3130_s24] sm:$0xf]  ;;  %v360_v36 = vld [vmem:[%s3130_s24 + $0x4] sm:$0x1] }
  0x12   : > { %2674 = vmatprep.subr.bf16.mxu1 %v2882_v13  ;;  %v2902_v33 = vld [vmem:[%s3130_s24 + $0x90] ss:$8 sps:$4 sm:$0xff]   ;;  %1598 = vmatprep.mubr.bf16.mxu0 %v2901_v32  ;;  %v2903_v34 = vld [vmem:[%s3130_s24] ss:$8 sps:$4 sm:$0xff]   ;;  %v362_v38 = vld [vmem:[%s3130_s24 + $0xc] sm:$0x1] }
  0x13   : > { %1663 = vmatprep.mubr.bf16.mxu1 %v2902_v33  ;;  %v361_v37 = vld [vmem:[%s3130_s24 + $0x8] sm:$0xf]  ;;  %v379_v39 = vshrl.u32 %v359_v35, 16  ;;  %v382_v40 = vshll.u32 %v359_v35, 16  ;;  %v388_v41 = vshll.u32 %v360_v36, 16  ;;  %v402_v44 = vshll.u32 %v362_v38, 16 }
  0x14   : > { %2635 = vmatpush3.bf16.msra.mxu0 %v2883_v14  ;;  %v393_v42 = vshrl.u32 %v361_v37, 16  ;;  %v396_v43 = vshll.u32 %v361_v37, 16  ;;  %v2908_v58 = vld [vmem:[%s3480_s1 + $0x148] sm:$0xff]   ;;  %v2907_v60 = vld [vmem:[%s3480_s1 + $0x180] sm:$0xff]   ;;  %v2914_v5 = vld [vmem:[%s3130_s24 + $0x10] ss:$8 sps:$4 sm:$0xff]  }
  0x15   : > { %2675 = vmatpush3.bf16.msra.mxu1 %v2884_v15  ;;  %2636 = vmatprep.subr.bf16.mxu0 %v2885_v16  ;;  %v381_v47 = vrot.slane %v379_v39, 4  ;;  %v384_v48 = vrot.slane %v382_v40, 5  ;;  %v390_v52 = vrot.slane %v388_v41, 5  ;;  %v404_v56 = vrot.slane %v402_v44, 5  ;;  %v2910_v62 = vld [vmem:[%s3480_s1 + $0x108] sm:$0xff]   ;;  %v2915_v16 = vld [vmem:[%s3480_s1 + $0x150] sm:$0xff]  }
  0x16   : > { %2676 = vmatprep.subr.bf16.mxu1 %v2886_v17  ;;  %v395_v49 = vrot.slane %v393_v42, 4  ;;  %v398_v50 = vrot.slane %v396_v43, 5  ;;  %v2909_v0 = vld [vmem:[%s3480_s1 + $0x1c8] sm:$0xff]   ;;  %v2912_v2 = vld [vmem:[%s3130_s24 + $0x58] ss:$8 sps:$4 sm:$0xff]   ;;  %v2916_v17 = vld [vmem:[%s3480_s1 + $0x1d0] sm:$0xff]  }
  0x17   : > { %v385_v51 = vor.u32 %v384_v48, %v381_v47  ;;  %v2911_v3 = vld [vmem:[%s3480_s1 + $0x188] sm:$0xff]   ;;  %v363_v6 = vld [vmem:[%s3130_s24 + $0x10] sm:$0xf]  ;;  %v364_v7 = vld [vmem:[%s3130_s24 + $0x14] sm:$0x1] }
  0x18   : > { %2637 = vmatpush3.bf16.msra.mxu0 %v2887_v18  ;;  %v399_v55 = vor.u32 %v398_v50, %v395_v49  ;;  %v2913_v4 = vld [vmem:[%s3130_s24 + $0xa0] ss:$8 sps:$4 sm:$0xff]   ;;  %v365_v8 = vld [vmem:[%s3130_s24 + $0x18] sm:$0xf]  ;;  %v366_v9 = vld [vmem:[%s3130_s24 + $0x1c] sm:$0x1] }
  0x19   : > { %2677 = vmatpush3.bf16.msra.mxu1 %v2888_v19  ;;  %2638 = vmatprep.subr.bf16.mxu0 %v2889_v20  ;;  %v386_v57 = vrot.slane %v385_v51, 4  ;;  %v407_v10 = vshrl.u32 %v363_v6, 16  ;;  %v410_v11 = vshll.u32 %v363_v6, 16  ;;  %v416_v12 = vshll.u32 %v364_v7, 16  ;;  %v2921_v33 = vld [vmem:[%s3480_s1 + $0x118] sm:$0xff]   ;;  %v2926_v50 = vld [vmem:[%s3480_s1 + $0x160] sm:$0xff]  }
  0x1a   : > { %2678 = vmatprep.subr.bf16.mxu1 %v2890_v21  ;;  %v400_v59 = vrot.slane %v399_v55, 4  ;;  %v421_v13 = vshrl.u32 %v365_v8, 16  ;;  %v424_v14 = vshll.u32 %v365_v8, 16  ;;  %v430_v15 = vshll.u32 %v366_v9, 16  ;;  %v2922_v35 = vld [vmem:[%s3480_s1 + $0x198] sm:$0xff]   ;;  %v2927_v51 = vld [vmem:[%s3480_s1 + $0x1e0] sm:$0xff]  }
  0x1b   : > { %v391_v61 = vsel %vm3150_vm2, %v386_v57, %v390_v52  ;;  %v409_v18 = vrot.slane %v407_v10, 4  ;;  %v412_v19 = vrot.slane %v410_v11, 5  ;;  %v2923_v37 = vld [vmem:[%s3130_s24 + $0x68] ss:$8 sps:$4 sm:$0xff]   ;;  %v367_v40 = vld [vmem:[%s3130_s24 + $0x20] sm:$0xf] }
  0x1c   : > { %2639 = vmatpush3.bf16.msra.mxu0 %v2891_v22  ;;  %v405_v63 = vsel %vm3150_vm2, %v400_v59, %v404_v56  ;;  %v423_v20 = vrot.slane %v421_v13, 4  ;;  %v426_v21 = vrot.slane %v424_v14, 5  ;;  %v2924_v38 = vld [vmem:[%s3130_s24 + $0xb0] ss:$8 sps:$4 sm:$0xff]   ;;  %v2925_v39 = vld [vmem:[%s3130_s24 + $0x20] ss:$8 sps:$4 sm:$0xff]  }
  0x1d   : > { %2679 = vmatpush3.bf16.msra.mxu1 %v2892_v23  ;;  %2640 = vmatprep.subr.bf16.mxu0 %v2893_v24  ;;  %v2374_v1 = vcombine.low %v391_v61, %v405_v63  ;;  %v413_v22 = vor.u32 %v412_v19, %v409_v18  ;;  %v418_v23 = vrot.slane %v416_v12, 5  ;;  %v2917_v24 = vld [vmem:[%s3480_s1 + $0x110] sm:$0xff]   ;;  %v368_v41 = vld [vmem:[%s3130_s24 + $0x24] sm:$0x1]  ;;  %v369_v42 = vld [vmem:[%s3130_s24 + $0x28] sm:$0xf] }
  0x1e   : > { %2680 = vmatprep.subr.bf16.mxu1 %v2894_v25  ;;  %v427_v25 = vor.u32 %v426_v21, %v423_v20  ;;  %v370_v43 = vld [vmem:[%s3130_s24 + $0x2c] sm:$0x1]  ;;  %v435_v44 = vshrl.u32 %v367_v40, 16  ;;  %v449_v47 = vshrl.u32 %v369_v42, 16  ;;  %v452_v48 = vshll.u32 %v369_v42, 16  ;;  %v2928_v59 = vld [vmem:[%s3480_s1 + $0x120] sm:$0xff]  }
  0x1f   : > { %v458_v49 = vshll.u32 %v370_v43, 16  ;;  %v2933_v6 = vld [vmem:[%s3480_s1 + $0x1a8] sm:$0xff]   ;;  %v2934_v8 = vld [vmem:[%s3130_s24 + $0x78] ss:$8 sps:$4 sm:$0xff]   ;;  %v371_v11 = vld [vmem:[%s3130_s24 + $0x30] sm:$0xf] }
  0x20   : > { %2641 = vmatpush3.bf16.msra.mxu0 %v2895_v26  ;;  %v432_v26 = vrot.slane %v430_v15, 5  ;;  %v437_v52 = vrot.slane %v435_v44, 4  ;;  %v451_v55 = vrot.slane %v449_v47, 4  ;;  %v454_v56 = vrot.slane %v452_v48, 5  ;;  %v2935_v9 = vld [vmem:[%s3130_s24 + $0xc0] ss:$8 sps:$4 sm:$0xff]  }
  0x21   : > { %2681 = vmatpush3.bf16.msra.mxu1 %v2896_v27  ;;  %2642 = vmatprep.subr.bf16.mxu0 %v2897_v28  ;;  %v2918_v27 = vld [vmem:[%s3480_s1 + $0x190] sm:$0xff]   ;;  %v414_v28 = vrot.slane %v413_v22, 4  ;;  %v460_v61 = vrot.slane %v458_v49, 5  ;;  %v373_v13 = vld [vmem:[%s3130_s24 + $0x38] sm:$0xf]  ;;  %v463_v15 = vshrl.u32 %v371_v11, 16 }
  0x22   : > { %2682 = vmatprep.subr.bf16.mxu1 %v2898_v29  ;;  %v2919_v29 = vld [vmem:[%s3480_s1 + $0x158] sm:$0xff]   ;;  %v372_v12 = vld [vmem:[%s3130_s24 + $0x34] sm:$0x1]  ;;  %v477_v18 = vshrl.u32 %v373_v13, 16  ;;  %v480_v19 = vshll.u32 %v373_v13, 16 }
  0x23   : > { %v419_v32 = vsel %vm3150_vm2, %v414_v28, %v418_v23  ;;  %v2936_v10 = vld [vmem:[%s3130_s24 + $0x30] ss:$8 sps:$4 sm:$0xff]   ;;  %v374_v14 = vld [vmem:[%s3130_s24 + $0x3c] sm:$0x1]  ;;  %v465_v23 = vrot.slane %v463_v15, 4  ;;  %v2950_v15 = vld [vmem:[%s3480_s1 + $0x208] sm:$0xff]  }
  0x24   : > { %2643 = vmatpush3.bf16.msra.mxu0 %v2899_v30  ;;  %v428_v30 = vrot.slane %v427_v25, 4  ;;  %v486_v20 = vshll.u32 %v374_v14, 16  ;;  %v2937_v21 = vld [vmem:[%s3480_s1 + $0x170] sm:$0xff]   ;;  %v479_v25 = vrot.slane %v477_v18, 4  ;;  %v2404_v44 = vld [vmem:[%s3130_s24 + $0x98] sm:$0xf] }
  0x25   : > { %2683 = vmatpush3.bf16.msra.mxu1 %v2900_v31  ;;  %2708 = vmatprep.subr.bf16.mxu0 %v2904_v45  ;;  %v2920_v31 = vld [vmem:[%s3480_s1 + $0x1d8] sm:$0xff]   ;;  %v438_v45 = vshll.u32 %v367_v40, 16  ;;  %v2938_v22 = vld [vmem:[%s3480_s1 + $0x1f0] sm:$0xff]   ;;  %v615_v49 = vshrl.u32 %v2404_v44, 16 }
  0x26   : > { %2748 = vmatprep.subr.bf16.mxu1 %v2905_v46  ;;  %v444_v46 = vshll.u32 %v368_v41, 16  ;;  %v2944_v40 = vld [vmem:[%s3480_s1 + $0x1b8] sm:$0xff]   ;;  %v2402_v41 = vld [vmem:[%s3130_s24 + $0x90] sm:$0xf]  ;;  %v2403_v43 = vld [vmem:[%s3130_s24 + $0x94] sm:$0x1] }
  0x27   : > { %1599 = vmatmul.mubr.bf16.vlgmr.msra.gmra.mrb[0].mxu0 %v2903_v34  ;;  %v433_v34 = vsel %vm3150_vm2, %v428_v30, %v432_v26  ;;  %v482_v26 = vrot.slane %v480_v19, 5  ;;  %v604_v47 = vshll.u32 %v2402_v41, 16  ;;  %v610_v48 = vshll.u32 %v2403_v43, 16  ;;  %v2413_v43 = vld [vmem:[%s3130_s24 + $0xbc] sm:$0x1] }
  0x28   : > { %2709 = vmatpush3.bf16.msra.mxu0 %v2906_v53  ;;  %1664 = vmatmul.mubr.bf16.vlgmr.msra.gmra.mrb[0].mxu1 %v2374_v1  ;;  %v2375_v36 = vcombine.low %v419_v32, %v433_v34  ;;  %v440_v53 = vrot.slane %v438_v45, 5  ;;  %v2940_v32 = vld [vmem:[%s3480_s1 + $0x1b0] sm:$0xff]   ;;  %v2941_v34 = vld [vmem:[%s3480_s1 + $0x178] sm:$0xff]  }
  0x29   : > { %2710 = vmatprep.subr.bf16.mxu0 %v2908_v58  ;;  %1606 = vmatprep.mubr.bf16.mxu0 %v2912_v2  ;;  %v446_v58 = vrot.slane %v444_v46, 5  ;;  %v2931_v2 = vld [vmem:[%s3480_s1 + $0x1e8] sm:$0xff]   ;;  %v483_v30 = vor.u32 %v482_v26, %v479_v25  ;;  %v2405_v45 = vld [vmem:[%s3130_s24 + $0x9c] sm:$0x1]  ;;  %v601_v46 = vshrl.u32 %v2402_v41, 16  ;;  %v2955_v26 = vld [vmem:[%s3480_s1 + $0x210] sm:$0xff]  }
  0x2a   : > { %2749 = vmatpush3.bf16.msra.mxu1 %v2907_v60  ;;  %1671 = vmatprep.mubr.bf16.mxu1 %v2913_v4  ;;  %v441_v57 = vor.u32 %v440_v53, %v437_v52  ;;  %v455_v60 = vor.u32 %v454_v56, %v451_v55  ;;  %v2932_v4 = vld [vmem:[%s3480_s1 + $0x128] sm:$0xff]   ;;  %v2945_v52 = vld [vmem:[%s3130_s24 + $0x50] ss:$8 sps:$4 sm:$0xff]   ;;  %v606_v55 = vrot.slane %v604_v47, 5  ;;  %v617_v56 = vrot.slane %v615_v49, 4 }
  0x2b   : > { %2750 = vmatprep.subr.bf16.mxu1 %v2909_v0  ;;  %v2930_v0 = vld [vmem:[%s3480_s1 + $0x168] sm:$0xff]   ;;  %v603_v53 = vrot.slane %v601_v46, 4  ;;  %v680_v49 = vshll.u32 %v2413_v43, 16 }
  0x2c   : > { %2711 = vmatpush3.bf16.msra.mxu0 %v2910_v62  ;;  %v2929_v62 = vld [vmem:[%s3480_s1 + $0x1a0] sm:$0xff]   ;;  %v442_v63 = vrot.slane %v441_v57, 4  ;;  %v456_v1 = vrot.slane %v455_v60, 4  ;;  %v612_v57 = vrot.slane %v610_v48, 5  ;;  %v2947_v60 = vld [vmem:[%s3130_s24 + $0x8] ss:$8 sps:$4 sm:$0xff]  }
  0x2d   : > { %2712 = vmatprep.subr.bf16.mxu0 %v2915_v16  ;;  %v466_v16 = vshll.u32 %v371_v11, 16  ;;  %v2409_v11 = vld [vmem:[%s3130_s24 + $0xac] sm:$0x1]  ;;  %v2952_v25 = vld [vmem:[%s3130_s24 + $0x60] ss:$8 sps:$4 sm:$0xff]  }
  0x2e   : > { %2751 = vmatpush3.bf16.msra.mxu1 %v2911_v3  ;;  %v447_v3 = vsel %vm3150_vm2, %v442_v63, %v446_v58  ;;  %v2948_v63 = vld [vmem:[%s3480_s1 + $0x200] sm:$0xff]   ;;  %v652_v18 = vshll.u32 %v2409_v11, 16 }
  0x2f   : > { %1607 = vmatmul.mubr.bf16.gmra.mrb[4].mxu0 %v2914_v5  ;;  %2752 = vmatprep.subr.bf16.mxu1 %v2916_v17  ;;  %v461_v5 = vsel %vm3150_vm2, %v456_v1, %v460_v61  ;;  %v472_v17 = vshll.u32 %v372_v12, 16  ;;  %v2949_v1 = vld [vmem:[%s3481_s2] sm:$0xff]  }
  0x30   : > { %2713 = vmatpush3.bf16.msra.mxu0 %v2917_v24  ;;  %1672 = vmatmul.mubr.bf16.gmra.mrb[4].mxu1 %v2375_v36  ;;  %v2376_v7 = vcombine.low %v447_v3, %v461_v5  ;;  %v468_v24 = vrot.slane %v466_v16, 5  ;;  %v2942_v36 = vld [vmem:[%s3480_s1 + $0x1f8] sm:$0xff]   ;;  %v2951_v5 = vld [vmem:[%s3481_s2 + $0x8] sm:$0xff]  }
  0x31   : > { %2714 = vmatprep.subr.bf16.mxu0 %v2919_v29  ;;  %1614 = vmatprep.mubr.bf16.mxu0 %v2923_v37  ;;  %v474_v28 = vrot.slane %v472_v17, 5  ;;  %v2939_v29 = vld [vmem:[%s3480_s1 + $0x130] sm:$0xff]   ;;  %v3291_v3 = vld [vmem:[%s3130_s24 + $0xd8] ss:$8 sps:$4 sm:$0xff]  }
  0x32   : > { %2753 = vmatpush3.bf16.msra.mxu1 %v2918_v27  ;;  %1679 = vmatprep.mubr.bf16.mxu1 %v2924_v38  ;;  %v469_v27 = vor.u32 %v468_v24, %v465_v23  ;;  %v2943_v38 = vld [vmem:[%s3480_s1 + $0x138] sm:$0xff]  }
  0x33   : > { %2754 = vmatprep.subr.bf16.mxu1 %v2920_v31  ;;  %v488_v31 = vrot.slane %v486_v20, 5 }
  0x34   : > { %2715 = vmatpush3.bf16.msra.mxu0 %v2921_v33  ;;  %v470_v33 = vrot.slane %v469_v27, 4 }
  0x35   : > { %2716 = vmatprep.subr.bf16.mxu0 %v2926_v50  ;;  %v618_v50 = vshll.u32 %v2404_v44, 16 }
  0x36   : > { %2755 = vmatpush3.bf16.msra.mxu1 %v2922_v35  ;;  %v484_v35 = vrot.slane %v483_v30, 4  ;;  %v475_v37 = vsel %vm3150_vm2, %v470_v33, %v474_v28  ;;  %v654_v28 = vrot.slane %v652_v18, 5  ;;  %v2970_v18 = vld [vmem:[%s3481_s2 + $0x30] sm:$0xff]  }
  0x37   : > { %1615 = vmatmul.mubr.bf16.gmra.mrb[8].mxu0 %v2925_v39  ;;  %2756 = vmatprep.subr.bf16.mxu1 %v2927_v51  ;;  %v624_v51 = vshll.u32 %v2405_v45, 16  ;;  %v620_v58 = vrot.slane %v618_v50, 5 }
  0x38   : > { %2717 = vmatpush3.bf16.msra.mxu0 %v2928_v59  ;;  %1680 = vmatmul.mubr.bf16.gmra.mrb[8].mxu1 %v2376_v7  ;;  %v489_v39 = vsel %vm3150_vm2, %v484_v35, %v488_v31  ;;  %v607_v59 = vor.u32 %v606_v55, %v603_v53  ;;  %v2406_v7 = vld [vmem:[%s3130_s24 + $0xa0] sm:$0xf]  ;;  %v2957_v35 = vld [vmem:[%s3480_s1 + $0x218] sm:$0xff]  }
  0x39   : > { %2718 = vmatprep.subr.bf16.mxu0 %v2930_v0  ;;  %1622 = vmatprep.mubr.bf16.mxu0 %v2934_v8  ;;  %v2377_v42 = vcombine.low %v475_v37, %v489_v39  ;;  %v621_v61 = vor.u32 %v620_v58, %v617_v56  ;;  %v2407_v8 = vld [vmem:[%s3130_s24 + $0xa4] sm:$0x1]  ;;  %v629_v12 = vshrl.u32 %v2406_v7, 16  ;;  %v632_v13 = vshll.u32 %v2406_v7, 16  ;;  %v2954_v31 = vld [vmem:[%s3130_s24 + $0x18] ss:$8 sps:$4 sm:$0xff]  }
  0x3a   : > { %2757 = vmatpush3.bf16.msra.mxu1 %v2929_v62  ;;  %1687 = vmatprep.mubr.bf16.mxu1 %v2935_v9  ;;  %v626_v62 = vrot.slane %v624_v51, 5  ;;  %v608_v0 = vrot.slane %v607_v59, 4  ;;  %v2408_v9 = vld [vmem:[%s3130_s24 + $0xa8] sm:$0xf]  ;;  %v638_v14 = vshll.u32 %v2407_v8, 16  ;;  %v2962_v56 = vld [vmem:[%s3480_s1 + $0x220] sm:$0xff]  }
  0x3b   : > { %2758 = vmatprep.subr.bf16.mxu1 %v2931_v2  ;;  %v622_v2 = vrot.slane %v621_v61, 4  ;;  %v643_v16 = vshrl.u32 %v2408_v9, 16  ;;  %v646_v17 = vshll.u32 %v2408_v9, 16  ;;  %v631_v19 = vrot.slane %v629_v12, 4  ;;  %v2411_v39 = vld [vmem:[%s3130_s24 + $0xb4] sm:$0x1] }
  0x3c   : > { %2719 = vmatpush3.bf16.msra.mxu0 %v2932_v4  ;;  %v613_v4 = vsel %vm3150_vm2, %v608_v0, %v612_v57  ;;  %v634_v20 = vrot.slane %v632_v13, 5  ;;  %v666_v46 = vshll.u32 %v2411_v39, 16  ;;  %v682_v59 = vrot.slane %v680_v49, 5  ;;  %v2961_v61 = vld [vmem:[%s3130_s24 + $0x28] ss:$8 sps:$4 sm:$0xff]  }
  0x3d   : > { %2720 = vmatprep.subr.bf16.mxu0 %v2937_v21  ;;  %v2956_v21 = vld [vmem:[%s3481_s2 + $0x10] sm:$0xff]   ;;  %v645_v23 = vrot.slane %v643_v16, 4  ;;  %v648_v24 = vrot.slane %v646_v17, 5  ;;  %v2415_v7 = vld [vmem:[%s3130_s24 + $0xc4] sm:$0x1] }
  0x3e   : > { %2759 = vmatpush3.bf16.msra.mxu1 %v2933_v6  ;;  %v627_v6 = vsel %vm3150_vm2, %v622_v2, %v626_v62  ;;  %v635_v27 = vor.u32 %v634_v20, %v631_v19  ;;  %v668_v58 = vrot.slane %v666_v46, 5  ;;  %v2965_v2 = vld [vmem:[%s3481_s2 + $0x28] sm:$0xff]   ;;  %v694_v13 = vshll.u32 %v2415_v7, 16 }
  0x3f   : > { %1623 = vmatmul.mubr.bf16.gmra.mrb[12].mxu0 %v2936_v10  ;;  %2760 = vmatprep.subr.bf16.mxu1 %v2938_v22  ;;  %v2418_v10 = vcombine.low %v613_v4, %v627_v6  ;;  %v640_v22 = vrot.slane %v638_v14, 5  ;;  %v649_v30 = vor.u32 %v648_v24, %v645_v23  ;;  %v2414_v6 = vld [vmem:[%s3130_s24 + $0xc0] sm:$0xf]  ;;  %v2416_v8 = vld [vmem:[%s3130_s24 + $0xc8] sm:$0xf]  ;;  %v2969_v14 = vld [vmem:[%s3480_s1 + $0x230] sm:$0xff]  }
  0x40   : > { %2721 = vmatpush3.bf16.msra.mxu0 %v2939_v29  ;;  %1688 = vmatmul.mubr.bf16.gmra.mrb[12].mxu1 %v2377_v42  ;;  %v2958_v29 = vld [vmem:[%s3481_s2 + $0x18] sm:$0xff]   ;;  %v685_v11 = vshrl.u32 %v2414_v6, 16  ;;  %v688_v12 = vshll.u32 %v2414_v6, 16  ;;  %v702_v16 = vshll.u32 %v2416_v8, 16  ;;  %v2966_v24 = vld [vmem:[%s3130_s24 + $0x80] ss:$8 sps:$4 sm:$0xff]  }
  0x41   : > { %2722 = vmatprep.subr.bf16.mxu0 %v2941_v34  ;;  %1793 = vmatprep.mubr.bf16.mxu1 %v2945_v52  ;;  %v650_v33 = vrot.slane %v649_v30, 4  ;;  %v3320_v34 = vld [vmem:[%s3130_s24 + $0xe8] ss:$8 sps:$4 sm:$0xff]   ;;  %v2412_v42 = vld [vmem:[%s3130_s24 + $0xb8] sm:$0xf] }
  0x42   : > { %2761 = vmatpush3.bf16.msra.mxu1 %v2940_v32  ;;  %1728 = vmatprep.mubr.bf16.mxu0 %v2418_v10  ;;  %v636_v32 = vrot.slane %v635_v27, 4  ;;  %v671_v47 = vshrl.u32 %v2412_v42, 16  ;;  %v674_v48 = vshll.u32 %v2412_v42, 16  ;;  %v2959_v52 = vld [vmem:[%s3130_s24 + $0x70] ss:$8 sps:$4 sm:$0xff]   ;;  %v687_v19 = vrot.slane %v685_v11, 4 }
  0x43   : > { %2762 = vmatprep.subr.bf16.mxu1 %v2942_v36  ;;  %v655_v37 = vsel %vm3150_vm2, %v650_v33, %v654_v28  ;;  %v2417_v10 = vld [vmem:[%s3130_s24 + $0xcc] sm:$0x1]  ;;  %v690_v20 = vrot.slane %v688_v12, 5  ;;  %v704_v23 = vrot.slane %v702_v16, 5  ;;  %v2971_v28 = vld [vmem:[%s3480_s1 + $0x238] sm:$0xff]  }
  0x44   : > { %2723 = vmatpush3.bf16.msra.mxu0 %v2943_v38  ;;  %v641_v36 = vsel %vm3150_vm2, %v636_v32, %v640_v22  ;;  %v2410_v38 = vld [vmem:[%s3130_s24 + $0xb0] sm:$0xf]  ;;  %v673_v53 = vrot.slane %v671_v47, 4  ;;  %v676_v55 = vrot.slane %v674_v48, 5  ;;  %v708_v17 = vshll.u32 %v2417_v10, 16 }
  0x45   : > { %2812 = vmatprep.subr.bf16.mxu0 %v2948_v63  ;;  %v2419_v41 = vcombine.low %v641_v36, %v655_v37  ;;  %v657_v44 = vshrl.u32 %v2410_v38, 16  ;;  %v660_v45 = vshll.u32 %v2410_v38, 16  ;;  %v2968_v30 = vld [vmem:[%s3130_s24 + $0x38] ss:$8 sps:$4 sm:$0xff]   ;;  %v3375_v33 = vld [vmem:[%s3130_s24 + $0x108] ss:$8 sps:$4 sm:$0xff]  }
  0x46   : > { %2763 = vmatpush3.bf16.msra.mxu1 %v2944_v40  ;;  %v2963_v40 = vld [vmem:[%s3481_s2 + $0x20] sm:$0xff]   ;;  %v710_v27 = vrot.slane %v708_v17, 5  ;;  %v2446_v37 = vld [vmem:[%s3130_s24 + $0x8] sm:$0xf]  ;;  %v2447_v38 = vld [vmem:[%s3130_s24 + $0xc] sm:$0x1] }
  0x47   : > { %2836 = vmatprep.subr.bf16.mxu1 %v2949_v1  ;;  %1729 = vmatmul.mubr.bf16.vlgmr.msra.gmra.mrb[16].mxu0 %v3291_v3  ;;  %v659_v50 = vrot.slane %v657_v44, 4  ;;  %v662_v51 = vrot.slane %v660_v45, 5  ;;  %v823_v42 = vshrl.u32 %v2446_v37, 16  ;;  %v826_v43 = vshll.u32 %v2446_v37, 16  ;;  %v2456_v10 = vld [vmem:[%s3130_s24 + $0x30] sm:$0xf] }
  0x48   : > { %2813 = vmatpush3.bf16.msra.mxu0 %v2948_v63  ;;  %1736 = vmatprep.mubr.bf16.mxu0 %v2419_v41  ;;  %v2964_v63 = vld [vmem:[%s3480_s1 + $0x228] sm:$0xff]   ;;  %v2449_v41 = vld [vmem:[%s3130_s24 + $0x14] sm:$0x1]  ;;  %v832_v44 = vshll.u32 %v2447_v38, 16 }
  0x49   : > { %1794 = vmatmul.mubr.bf16.vlgmr.msra.gmra.mrb[16].mxu1 %v2947_v60  ;;  %2814 = vmatprep.subr.bf16.mxu0 %v2950_v15  ;;  %v663_v57 = vor.u32 %v662_v51, %v659_v50  ;;  %v677_v60 = vor.u32 %v676_v55, %v673_v53  ;;  %v846_v47 = vshll.u32 %v2449_v41, 16  ;;  %v825_v48 = vrot.slane %v823_v42, 4  ;;  %v2451_v50 = vld [vmem:[%s3130_s24 + $0x1c] sm:$0x1]  ;;  %v2452_v51 = vld [vmem:[%s3130_s24 + $0x20] sm:$0xf] }
  0x4a   : > { %2837 = vmatpush3.bf16.msra.mxu1 %v2949_v1  ;;  %1801 = vmatprep.mubr.bf16.mxu1 %v2952_v25  ;;  %v3346_v1 = vld [vmem:[%s3130_s24 + $0xf8] ss:$8 sps:$4 sm:$0xff]   ;;  %v828_v49 = vrot.slane %v826_v43, 5  ;;  %v2461_v41 = vld [vmem:[%s3130_s24 + $0x44] sm:$0x1] }
  0x4b   : > { %2838 = vmatprep.subr.bf16.mxu1 %v2951_v5  ;;  %v664_v62 = vrot.slane %v663_v57, 4  ;;  %v678_v0 = vrot.slane %v677_v60, 4  ;;  %v2972_v25 = vld [vmem:[%s3481_s2 + $0x38] sm:$0xff]   ;;  %v2453_v57 = vld [vmem:[%s3130_s24 + $0x24] sm:$0x1] }
  0x4c   : > { %2815 = vmatpush3.bf16.msra.mxu0 %v2950_v15  ;;  %v699_v15 = vshrl.u32 %v2416_v8, 16 }
  0x4d   : > { %2816 = vmatprep.subr.bf16.mxu0 %v2955_v26  ;;  %v669_v4 = vsel %vm3150_vm2, %v664_v62, %v668_v58  ;;  %v829_v58 = vor.u32 %v828_v49, %v825_v48  ;;  %v2454_v62 = vld [vmem:[%s3130_s24 + $0x28] sm:$0xf] }
  0x4e   : > { %2839 = vmatpush3.bf16.msra.mxu1 %v2951_v5  ;;  %v683_v5 = vsel %vm3150_vm2, %v678_v0, %v682_v59  ;;  %v701_v22 = vrot.slane %v699_v15, 4  ;;  %v865_v0 = vshrl.u32 %v2452_v51, 16  ;;  %v882_v17 = vshll.u32 %v2454_v62, 16 }
  0x4f   : > { %2840 = vmatprep.subr.bf16.mxu1 %v2956_v21  ;;  %1737 = vmatmul.mubr.bf16.gmra.mrb[20].mxu0 %v3320_v34  ;;  %v2420_v9 = vcombine.low %v669_v4, %v683_v5  ;;  %v874_v4 = vshll.u32 %v2453_v57, 16  ;;  %v2455_v5 = vld [vmem:[%s3130_s24 + $0x2c] sm:$0x1]  ;;  %v830_v6 = vrot.slane %v829_v58, 4 }
  0x50   : > { %2817 = vmatpush3.bf16.msra.mxu0 %v2955_v26  ;;  %v691_v26 = vor.u32 %v690_v20, %v687_v19  ;;  %v867_v12 = vrot.slane %v865_v0, 4  ;;  %v2457_v20 = vld [vmem:[%s3130_s24 + $0x34] sm:$0x1] }
  0x51   : > { %1802 = vmatmul.mubr.bf16.gmra.mrb[20].mxu1 %v2954_v31  ;;  %2818 = vmatprep.subr.bf16.mxu0 %v2957_v35 }
  0x52   : > { %2841 = vmatpush3.bf16.msra.mxu1 %v2956_v21  ;;  %1809 = vmatprep.mubr.bf16.mxu1 %v2959_v52  ;;  %v696_v21 = vrot.slane %v694_v13, 5  ;;  %v692_v31 = vrot.slane %v691_v26, 4  ;;  %v834_v52 = vrot.slane %v832_v44, 5  ;;  %v884_v26 = vrot.slane %v882_v17, 5 }
  0x53   : > { %2842 = vmatprep.subr.bf16.mxu1 %v2958_v29  ;;  %1744 = vmatprep.mubr.bf16.mxu0 %v2420_v9 }
  0x54   : > { %2819 = vmatpush3.bf16.msra.mxu0 %v2957_v35  ;;  %v697_v35 = vsel %vm3150_vm2, %v692_v31, %v696_v21  ;;  %v835_v15 = vsel %vm3150_vm2, %v830_v6, %v834_v52  ;;  %v888_v21 = vshll.u32 %v2455_v5, 16 }
  0x55   : > { %2820 = vmatprep.subr.bf16.mxu0 %v2962_v56 }
  0x56   : > { %2843 = vmatpush3.bf16.msra.mxu1 %v2958_v29  ;;  %v705_v29 = vor.u32 %v704_v23, %v701_v22  ;;  %v893_v22 = vshrl.u32 %v2456_v10, 16 }
  0x57   : > { %2844 = vmatprep.subr.bf16.mxu1 %v2963_v40  ;;  %1745 = vmatmul.mubr.bf16.gmra.mrb[24].mxu0 %v3346_v1 }
  0x58   : > { %2821 = vmatpush3.bf16.msra.mxu0 %v2962_v56  ;;  %v706_v32 = vrot.slane %v705_v29, 4  ;;  %v848_v56 = vrot.slane %v846_v47, 5  ;;  %v896_v29 = vshll.u32 %v2456_v10, 16 }
  0x59   : > { %1810 = vmatmul.mubr.bf16.gmra.mrb[24].mxu1 %v2961_v61  ;;  %2822 = vmatprep.subr.bf16.mxu0 %v2964_v63  ;;  %v860_v61 = vshll.u32 %v2451_v50, 16 }
  0x5a   : > { %2845 = vmatpush3.bf16.msra.mxu1 %v2963_v40  ;;  %1817 = vmatprep.mubr.bf16.mxu1 %v2966_v24  ;;  %v711_v36 = vsel %vm3150_vm2, %v706_v32, %v710_v27  ;;  %v2448_v40 = vld [vmem:[%s3130_s24 + $0x10] sm:$0xf] }
  0x5b   : > { %2846 = vmatprep.subr.bf16.mxu1 %v2965_v2  ;;  %v2421_v39 = vcombine.low %v697_v35, %v711_v36  ;;  %v837_v45 = vshrl.u32 %v2448_v40, 16  ;;  %v840_v46 = vshll.u32 %v2448_v40, 16  ;;  %v862_v9 = vrot.slane %v860_v61, 5  ;;  %v2460_v36 = vld [vmem:[%s3130_s24 + $0x40] sm:$0xf] }
  0x5c   : > { %2823 = vmatpush3.bf16.msra.mxu0 %v2964_v63  ;;  %v902_v35 = vshll.u32 %v2457_v20, 16  ;;  %v898_v40 = vrot.slane %v896_v29, 5  ;;  %v921_v49 = vshrl.u32 %v2460_v36, 16  ;;  %v924_v50 = vshll.u32 %v2460_v36, 16 }
  0x5d   : > { %2824 = vmatprep.subr.bf16.mxu0 %v2969_v14  ;;  %1752 = vmatprep.mubr.bf16.mxu0 %v2421_v39  ;;  %v839_v53 = vrot.slane %v837_v45, 4  ;;  %v842_v55 = vrot.slane %v840_v46, 5  ;;  %v890_v39 = vrot.slane %v888_v21, 5 }
  0x5e   : > { %2847 = vmatpush3.bf16.msra.mxu1 %v2965_v2  ;;  %v868_v2 = vshll.u32 %v2452_v51, 16  ;;  %v930_v51 = vshll.u32 %v2461_v41, 16  ;;  %v926_v58 = vrot.slane %v924_v50, 5 }
  0x5f   : > { %2848 = vmatprep.subr.bf16.mxu1 %v2970_v18  ;;  %1753 = vmatmul.mubr.bf16.gmra.mrb[28].mxu0 %v3375_v33  ;;  %v843_v63 = vor.u32 %v842_v55, %v839_v53 }
  0x60   : > { %2825 = vmatpush3.bf16.msra.mxu0 %v2969_v14  ;;  %v870_v13 = vrot.slane %v868_v2, 5  ;;  %v876_v14 = vrot.slane %v874_v4, 5 }
  0x61   : > { %1818 = vmatmul.mubr.bf16.gmra.mrb[28].mxu1 %v2968_v30  ;;  %2826 = vmatprep.subr.bf16.mxu0 %v2971_v28  ;;  %v844_v11 = vrot.slane %v843_v63, 4  ;;  %v2459_v30 = vld [vmem:[%s3130_s24 + $0x3c] sm:$0x1] }
  0x62   : > { %2849 = vmatpush3.bf16.msra.mxu1 %v2970_v18  ;;  %2852 = vmatprep.mubr.bf16.mxu1 %v3291_v3  ;;  %v2450_v3 = vld [vmem:[%s3130_s24 + $0x18] sm:$0xf]  ;;  %v871_v19 = vor.u32 %v870_v13, %v867_v12  ;;  %v916_v46 = vshll.u32 %v2459_v30, 16 }
  0x63   : > { %2850 = vmatprep.subr.bf16.mxu1 %v2972_v25  ;;  %v851_v59 = vshrl.u32 %v2450_v3, 16  ;;  %v854_v60 = vshll.u32 %v2450_v3, 16  ;;  %v849_v18 = vsel %vm3150_vm2, %v844_v11, %v848_v56  ;;  %v904_v3 = vrot.slane %v902_v35, 5 }
  0x64   : > { %2827 = vmatpush3.bf16.msra.mxu0 %v2971_v28  ;;  %v2462_v23 = vcombine.low %v835_v15, %v849_v18  ;;  %v872_v27 = vrot.slane %v871_v19, 4  ;;  %v895_v28 = vrot.slane %v893_v22, 4  ;;  %v923_v56 = vrot.slane %v921_v49, 4 }
  0x65   : > { %v853_v7 = vrot.slane %v851_v59, 4  ;;  %v856_v8 = vrot.slane %v854_v60, 5  ;;  %v918_v57 = vrot.slane %v916_v46, 5 }
  0x66   : > { %2851 = vmatpush3.bf16.msra.mxu1 %v2972_v25  ;;  %2828 = vmatprep.mubr.bf16.mxu0 %v2462_v23  ;;  %v877_v38 = vsel %vm3150_vm2, %v872_v27, %v876_v14  ;;  %v899_v47 = vor.u32 %v898_v40, %v895_v28  ;;  %v927_v61 = vor.u32 %v926_v58, %v923_v56 }
  0x67   : > { %v857_v16 = vor.u32 %v856_v8, %v853_v7 }
  0x68   : > { %v900_v53 = vrot.slane %v899_v47, 4  ;;  %v928_v0 = vrot.slane %v927_v61, 4 }
  0x69   : > { %2853 = vmatmul.mubr.bf16.vlgmr.msra.gmra.mrb[32].mxu1 %v3320_v34  ;;  %v879_v34 = vshrl.u32 %v2454_v62, 16  ;;  %v858_v24 = vrot.slane %v857_v16, 4  ;;  %v932_v62 = vrot.slane %v930_v51, 5 }
  0x6a   : > { %2856 = vmatprep.mubr.bf16.mxu1 %v3346_v1  ;;  %v2458_v1 = vld [vmem:[%s3130_s24 + $0x38] sm:$0xf]  ;;  %s2564_s24 = sshll.u32 %s3489_s22, 5 }
  0x6b   : > { %v881_v25 = vrot.slane %v879_v34, 4  ;;  %v863_v31 = vsel %vm3150_vm2, %v858_v24, %v862_v9  ;;  %v907_v37 = vshrl.u32 %v2458_v1, 16  ;;  %v910_v42 = vshll.u32 %v2458_v1, 16  ;;  %s3437_s15 = scalar_lea.vmem %s3483_s4, %s2564_s24  ;;  %s3454_s18 = scalar_lea.vmem %s3482_s3, %s2564_s24 }
  0x6c   : > { %v2463_v43 = vcombine.low %v863_v31, %v877_v38  ;;  %v933_v2 = vsel %vm3150_vm2, %v928_v0, %v932_v62 }
  0x6d   : > { %v885_v32 = vor.u32 %v884_v26, %v881_v25  ;;  %v909_v45 = vrot.slane %v907_v37, 4  ;;  %v912_v48 = vrot.slane %v910_v42, 5 }
  0x6e   : > { %2829 = vmatmul.mubr.bf16.vlgmr.msra.gmra.mrb[32].mxu0 %v2463_v43 }
  0x6f   : > { %v886_v44 = vrot.slane %v885_v32, 4  ;;  %v913_v55 = vor.u32 %v912_v48, %v909_v45 }
  0x71   : > { %2857 = vmatmul.mubr.bf16.gmra.mrb[36].mxu1 %v3375_v33  ;;  %v891_v52 = vsel %vm3150_vm2, %v886_v44, %v890_v39  ;;  %v905_v33 = vsel %vm3150_vm2, %v900_v53, %v904_v3  ;;  %v914_v59 = vrot.slane %v913_v55, 4 }
  0x72   : > { %v2464_v60 = vcombine.low %v891_v52, %v905_v33 }
  0x73   : > { %v919_v63 = vsel %vm3150_vm2, %v914_v59, %v918_v57 }
  0x74   : > { %2832 = vmatprep.mubr.bf16.mxu0 %v2464_v60  ;;  %v2465_v4 = vcombine.low %v919_v63, %v933_v2 }
  0x76   : > { %2833 = vmatmul.mubr.bf16.gmra.mrb[36].mxu0 %v2465_v4 }
  0xfa   : > { %v2644_v5 = vpop.f32.mrb[0].mxu0 }
  0xfb   : > { %v2645_v6 = vpop.f32.mrb[1].mxu0  ;;  %v2684_v11 = vpop.f32.mrb[0].mxu1 }
  0xfc   : > { %v2646_v7 = vadd.f32 %v2645_v6, %v2644_v5  ;;  %v2647_v8 = vpop.f32.mrb[2].mxu0  ;;  %v2685_v12 = vpop.f32.mrb[1].mxu1 }
  0xfd   : > { %v2648_v9 = vpop.f32.mrb[3].mxu0  ;;  %v2686_v13 = vadd.f32 %v2685_v12, %v2684_v11  ;;  %v2687_v14 = vpop.f32.mrb[2].mxu1 }
  0xfe   : > { %v2649_v10 = vadd.f32 %v2648_v9, %v2647_v8  ;;  %v2688_v16 = vpop.f32.mrb[3].mxu1 }
  0xff   : > { %v1666_v17 = vadd.f32 %v2686_v13, %v2646_v7  ;;  %v2689_v18 = vadd.f32 %v2688_v16, %v2687_v14 }
 0x101   : > { %v1669_v21 = vadd.f32 %v2689_v18, %v2649_v10 }
 0x102   : > { %v2650_v15 = vpop.f32.mrb[4].mxu0 }
 0x103   : > { %v2651_v34 = vpop.f32.mrb[5].mxu0  ;;  %v2690_v1 = vpop.f32.mrb[4].mxu1 }
 0x104   : > { %v2652_v19 = vadd.f32 %v2651_v34, %v2650_v15  ;;  %v2653_v54 = vpop.f32.mrb[6].mxu0  ;;  %v2691_v23 = vpop.f32.mrb[5].mxu1 }
 0x105   : > { %v2654_v20 = vpop.f32.mrb[7].mxu0  ;;  %v2692_v24 = vadd.f32 %v2691_v23, %v2690_v1  ;;  %v2693_v25 = vpop.f32.mrb[6].mxu1 }
 0x106   : > { %v2655_v22 = vadd.f32 %v2654_v20, %v2653_v54  ;;  %v2694_v27 = vpop.f32.mrb[7].mxu1 }
 0x107   : > { %v1674_v29 = vadd.f32 %v2692_v24, %v2652_v19  ;;  %v2695_v30 = vadd.f32 %v2694_v27, %v2693_v25 }
 0x109   : > { %v1677_v36 = vadd.f32 %v2695_v30, %v2655_v22 }
 0x10a   : > { %v2656_v26 = vpop.f32.mrb[8].mxu0 }
 0x10b   : > { %v2657_v28 = vpop.f32.mrb[9].mxu0  ;;  %v2696_v38 = vpop.f32.mrb[8].mxu1 }
 0x10c   : > { %v2658_v31 = vadd.f32 %v2657_v28, %v2656_v26  ;;  %v2659_v32 = vpop.f32.mrb[10].mxu0  ;;  %v2697_v39 = vpop.f32.mrb[9].mxu1 }
 0x10d   : > { %v2660_v35 = vpop.f32.mrb[11].mxu0  ;;  %v2698_v40 = vadd.f32 %v2697_v39, %v2696_v38  ;;  %v2699_v41 = vpop.f32.mrb[10].mxu1 }
 0x10e   : > { %v2661_v37 = vadd.f32 %v2660_v35, %v2659_v32  ;;  %v2700_v43 = vpop.f32.mrb[11].mxu1 }
 0x10f   : > { %v1682_v45 = vadd.f32 %v2698_v40, %v2658_v31  ;;  %v2701_v46 = vadd.f32 %v2700_v43, %v2699_v41 }
 0x111   : > { %v1685_v49 = vadd.f32 %v2701_v46, %v2661_v37 }
 0x112   : > { %v2662_v42 = vpop.f32.mrb[12].mxu0 }
 0x113   : > { %v2663_v44 = vpop.f32.mrb[13].mxu0  ;;  %v2702_v51 = vpop.f32.mrb[12].mxu1 }
 0x114   : > { %v2664_v47 = vadd.f32 %v2663_v44, %v2662_v42  ;;  %v2665_v3 = vpop.f32.mrb[14].mxu0  ;;  %v2703_v52 = vpop.f32.mrb[13].mxu1 }
 0x115   : > { %v2666_v48 = vpop.f32.mrb[15].mxu0  ;;  %v2704_v53 = vadd.f32 %v2703_v52, %v2702_v51  ;;  %v2705_v55 = vpop.f32.mrb[14].mxu1 }
 0x116   : > { %v2667_v50 = vadd.f32 %v2666_v48, %v2665_v3  ;;  %v2706_v56 = vpop.f32.mrb[15].mxu1 }
 0x117   : > { %v3418_v57 = vadd.f32 %v2704_v53, %v2664_v47  ;;  %v2707_v58 = vadd.f32 %v2706_v56, %v2705_v55 }
 0x119   : > { %v3420_v33 = vadd.f32 %v2707_v58, %v2667_v50 }
 0x11a   : > { %v2724_v0 = vpop.f32.mrb[16].mxu0 }
 0x11b   : > { %v2725_v4 = vpop.f32.mrb[17].mxu0 }
 0x11c   : > { %v2764_v59 = vpop.f32.mrb[16].mxu1  ;;  %v2726_v5 = vadd.f32 %v2725_v4, %v2724_v0  ;;  %v2727_v6 = vpop.f32.mrb[18].mxu0 }
 0x11d   : > { %v2765_v60 = vpop.f32.mrb[17].mxu1  ;;  %v2728_v7 = vpop.f32.mrb[19].mxu0 }
 0x11e   : > { %v2766_v61 = vadd.f32 %v2765_v60, %v2764_v59  ;;  %v2767_v62 = vpop.f32.mrb[18].mxu1  ;;  %v1731_v8 = vadd.f32 %v2726_v5, %v1666_v17  ;;  %v2729_v9 = vadd.f32 %v2728_v7, %v2727_v6 }
 0x11f   : > { %v2768_v63 = vpop.f32.mrb[19].mxu1 }
 0x120   : > { %v2769_v2 = vadd.f32 %v2768_v63, %v2767_v62  ;;  %v1734_v12 = vadd.f32 %v2729_v9, %v1669_v21  ;;  %v3422_v15 = vadd.f32 %v2766_v61, %v1731_v8 }
 0x122   : > { %v3424_v18 = vadd.f32 %v2769_v2, %v1734_v12  ;;  %v2730_v19 = vpop.f32.mrb[20].mxu0 }
 0x123   : > { %v2731_v54 = vpop.f32.mrb[21].mxu0 }
 0x124   : > { %v2770_v10 = vpop.f32.mrb[20].mxu1  ;;  %v2732_v20 = vadd.f32 %v2731_v54, %v2730_v19  ;;  %v2733_v22 = vpop.f32.mrb[22].mxu0 }
 0x125   : > { %v2771_v11 = vpop.f32.mrb[21].mxu1  ;;  %v2734_v1 = vpop.f32.mrb[23].mxu0 }
 0x126   : > { %v2772_v13 = vadd.f32 %v2771_v11, %v2770_v10  ;;  %v2773_v14 = vpop.f32.mrb[22].mxu1  ;;  %v1739_v23 = vadd.f32 %v2732_v20, %v1674_v29  ;;  %v2735_v24 = vadd.f32 %v2734_v1, %v2733_v22 }
 0x127   : > { %v2774_v16 = vpop.f32.mrb[23].mxu1 }
 0x128   : > { %v2775_v34 = vadd.f32 %v2774_v16, %v2773_v14  ;;  %v1742_v26 = vadd.f32 %v2735_v24, %v1677_v36  ;;  %v1804_v28 = vadd.f32 %v2772_v13, %v1739_v23 }
 0x12a   : > { %v1807_v32 = vadd.f32 %v2775_v34, %v1742_v26  ;;  %v2736_v35 = vpop.f32.mrb[24].mxu0 }
 0x12b   : > { %v2737_v37 = vpop.f32.mrb[25].mxu0 }
 0x12c   : > { %v2776_v17 = vpop.f32.mrb[24].mxu1  ;;  %v2738_v38 = vadd.f32 %v2737_v37, %v2736_v35  ;;  %v2739_v39 = vpop.f32.mrb[26].mxu0 }
 0x12d   : > { %v2777_v25 = vpop.f32.mrb[25].mxu1  ;;  %v2740_v40 = vpop.f32.mrb[27].mxu0 }
 0x12e   : > { %v2778_v27 = vadd.f32 %v2777_v25, %v2776_v17  ;;  %v2779_v21 = vpop.f32.mrb[26].mxu1  ;;  %v1747_v41 = vadd.f32 %v2738_v38, %v1682_v45  ;;  %v2741_v42 = vadd.f32 %v2740_v40, %v2739_v39 }
 0x12f   : > { %v2780_v30 = vpop.f32.mrb[27].mxu1 }
 0x130   : > { %v2781_v31 = vadd.f32 %v2780_v30, %v2779_v21  ;;  %v1750_v44 = vadd.f32 %v2741_v42, %v1685_v49  ;;  %v3426_v47 = vadd.f32 %v2778_v27, %v1747_v41 }
 0x132   : > { %v3428_v50 = vadd.f32 %v2781_v31, %v1750_v44  ;;  %v2742_v51 = vpop.f32.mrb[28].mxu0 }
 0x133   : > { %v2743_v52 = vpop.f32.mrb[29].mxu0 }
 0x134   : > { %v2782_v43 = vpop.f32.mrb[28].mxu1  ;;  %v2744_v53 = vadd.f32 %v2743_v52, %v2742_v51  ;;  %v2745_v55 = vpop.f32.mrb[30].mxu0 }
 0x135   : > { %v2783_v29 = vpop.f32.mrb[29].mxu1  ;;  %v2746_v45 = vpop.f32.mrb[31].mxu0 }
 0x136   : > { %v2784_v46 = vadd.f32 %v2783_v29, %v2782_v43  ;;  %v2785_v36 = vpop.f32.mrb[30].mxu1  ;;  %v1755_v59 = vadd.f32 %v2744_v53, %v3418_v57  ;;  %v2747_v49 = vadd.f32 %v2746_v45, %v2745_v55 }
 0x137   : > { %v2786_v3 = vpop.f32.mrb[31].mxu1 }
 0x138   : > { %v2787_v48 = vadd.f32 %v2786_v3, %v2785_v36  ;;  %v1758_v63 = vadd.f32 %v2747_v49, %v3420_v33  ;;  %v3440_v2 = vadd.f32 %v2784_v46, %v1755_v59 }
 0x13a   : > { %v3444_v6 = vadd.f32 %v2787_v48, %v1758_v63 }
 0x13c   : > { %v2854_v56 = vpop.f32.mrb[32].mxu1 }
 0x13d   : > { %v2077_v58 = vpop.f32.mrb[33].mxu1 }
 0x13e   : > { %v2855_v60 = vpop.f32.mrb[34].mxu1 }
 0x13f   : > { %v2109_v61 = vpack.c.bf16 %v2855_v60, %v2854_v56  ;;  %v2080_v62 = vpop.f32.mrb[35].mxu1 }
 0x140   : > { %v2108_v0 = vpack.c.bf16 %v2080_v62, %v2077_v58 }
 0x141   : > { %2625 = vst [vmem:[%s3437_s15 + $0x8] sm:$0xff] %v2109_v61   ;;  %v2150_v4 = vunpack.c.l.bf16 %v2109_v61  ;;  %v2151_v7 = vunpack.c.h.bf16 %v2109_v61  ;;  %v2830_v34 = vpop.f32.mrb[32].mxu0 }
 0x142   : > { %2606 = vst [vmem:[%s3437_s15] sm:$0xff] %v2108_v0   ;;  %v2148_v57 = vunpack.c.l.bf16 %v2108_v0  ;;  %v2149_v5 = vunpack.c.h.bf16 %v2108_v0  ;;  %v1869_v22 = vadd.f32 %v2830_v34, %v1804_v28  ;;  %v1860_v1 = vpop.f32.mrb[33].mxu0 }
 0x143   : > { %v2172_v13 = vmul.f32 %v2150_v4, %v2150_v4  ;;  %v2173_v19 = vmul.f32 %v2151_v7, %v2151_v7  ;;  %v1861_v25 = vadd.f32 %v1860_v1, %v3422_v15  ;;  %v2831_v26 = vpop.f32.mrb[34].mxu0 }
 0x144   : > { %v2156_v8 = vadd.f32 %v2149_v5, %v2148_v57  ;;  %v2170_v9 = vmul.f32 %v2148_v57, %v2148_v57  ;;  %v2171_v10 = vmul.f32 %v2149_v5, %v2149_v5  ;;  %v2858_v11 = vpop.f32.mrb[36].mxu1  ;;  %v1872_v27 = vadd.f32 %v2831_v26, %v1807_v32  ;;  %v1863_v21 = vpop.f32.mrb[35].mxu0 }
 0x145   : > { %v2093_v12 = vpop.f32.mrb[37].mxu1  ;;  %v1864_v28 = vadd.f32 %v1863_v21, %v3424_v18 }
 0x146   : > { %v2157_v14 = vadd.f32 %v2156_v8, %v2150_v4  ;;  %v2178_v33 = vadd.f32 %v2171_v10, %v2170_v9  ;;  %v2859_v16 = vpop.f32.mrb[38].mxu1  ;;  %v1892_v37 = vpack.c.bf16 %v1872_v27, %v1869_v22 }
 0x147   : > { %v2111_v54 = vpack.c.bf16 %v2859_v16, %v2858_v11  ;;  %v2096_v20 = vpop.f32.mrb[39].mxu1  ;;  %v1891_v32 = vpack.c.bf16 %v1864_v28, %v1861_v25 }
 0x148   : > { %v2179_v23 = vadd.f32 %v2178_v33, %v2172_v13  ;;  %v2110_v24 = vpack.c.bf16 %v2096_v20, %v2093_v12  ;;  %v2158_v17 = vadd.f32 %v2157_v14, %v2151_v7  ;;  %2622 = vst [vmem:[%s3454_s18 + $0x8] sm:$0xff] %v1892_v37   ;;  %v1933_v29 = vunpack.c.l.bf16 %v1892_v37 }
 0x149   : > { %2627 = vst [vmem:[%s3437_s15 + $0x18] sm:$0xff] %v2111_v54   ;;  %v2154_v15 = vunpack.c.l.bf16 %v2111_v54  ;;  %v2155_v40 = vunpack.c.h.bf16 %v2111_v54  ;;  %2586 = vst [vmem:[%s3454_s18] sm:$0xff] %v1891_v32   ;;  %v1931_v44 = vunpack.c.l.bf16 %v1891_v32  ;;  %v1932_v46 = vunpack.c.h.bf16 %v1891_v32  ;;  %v2834_v55 = vpop.f32.mrb[36].mxu0 }
 0x14a   : > { %2626 = vst [vmem:[%s3437_s15 + $0x10] sm:$0xff] %v2110_v24   ;;  %v2152_v30 = vunpack.c.l.bf16 %v2110_v24  ;;  %v2153_v31 = vunpack.c.h.bf16 %v2110_v24  ;;  %v2180_v35 = vadd.f32 %v2179_v23, %v2173_v19  ;;  %v1934_v51 = vunpack.c.h.bf16 %v1892_v37  ;;  %v1876_v62 = vpop.f32.mrb[37].mxu0 }
 0x14b   : > { %v2176_v36 = vmul.f32 %v2154_v15, %v2154_v15  ;;  %v1939_v52 = vadd.f32 %v1932_v46, %v1931_v44  ;;  %v1953_v18 = vmul.f32 %v1931_v44, %v1931_v44  ;;  %v1954_v53 = vmul.f32 %v1932_v46, %v1932_v46  ;;  %v2835_v0 = vpop.f32.mrb[38].mxu0 }
 0x14c   : > { %v2159_v38 = vadd.f32 %v2158_v17, %v2152_v30  ;;  %v2174_v39 = vmul.f32 %v2152_v30, %v2152_v30  ;;  %v2175_v42 = vmul.f32 %v2153_v31, %v2153_v31  ;;  %v2177_v56 = vmul.f32 %v2155_v40, %v2155_v40  ;;  %v1879_v9 = vpop.f32.mrb[39].mxu0 }
 0x14d   : > { %v1955_v59 = vmul.f32 %v1933_v29, %v1933_v29  ;;  %v1940_v49 = vadd.f32 %v1939_v52, %v1933_v29  ;;  %v1961_v60 = vadd.f32 %v1954_v53, %v1953_v18  ;;  %v1885_v61 = vadd.f32 %v2834_v55, %v3440_v2 }
 0x14e   : > { %v2160_v41 = vadd.f32 %v2159_v38, %v2153_v31  ;;  %v2181_v43 = vadd.f32 %v2180_v35, %v2174_v39  ;;  %v1877_v63 = vadd.f32 %v1876_v62, %v3426_v47  ;;  %v1956_v5 = vmul.f32 %v1934_v51, %v1934_v51 }
 0x14f   : > { %v1962_v7 = vadd.f32 %v1961_v60, %v1955_v59  ;;  %v1888_v8 = vadd.f32 %v2835_v0, %v3444_v6  ;;  %v1941_v10 = vadd.f32 %v1940_v49, %v1934_v51  ;;  %v1880_v11 = vadd.f32 %v1879_v9, %v3428_v50 }
 0x150   : > { %v2161_v3 = vadd.f32 %v2160_v41, %v2154_v15  ;;  %v2182_v48 = vadd.f32 %v2181_v43, %v2175_v42 }
 0x151   : > { %v1894_v2 = vpack.c.bf16 %v1888_v8, %v1885_v61  ;;  %v1963_v14 = vadd.f32 %v1962_v7, %v1956_v5  ;;  %v1893_v47 = vpack.c.bf16 %v1880_v11, %v1877_v63 }
 0x152   : > { %v2162_v45 = vadd.f32 %v2161_v3, %v2155_v40  ;;  %v2183_v58 = vadd.f32 %v2182_v48, %v2176_v36 }
 0x153   : > { %2624 = vst [vmem:[%s3454_s18 + $0x18] sm:$0xff] %v1894_v2   ;;  %2623 = vst [vmem:[%s3454_s18 + $0x10] sm:$0xff] %v1893_v47   ;;  %v1935_v34 = vunpack.c.l.bf16 %v1893_v47  ;;  %v1936_v19 = vunpack.c.h.bf16 %v1893_v47  ;;  %v1937_v6 = vunpack.c.l.bf16 %v1894_v2  ;;  %v1938_v50 = vunpack.c.h.bf16 %v1894_v2 }
 0x154   : > { %v2163_v4 = vrot.slane %v2162_v45, 4  ;;  %v2184_v57 = vadd.f32 %v2183_v58, %v2177_v56 }
 0x155   : > { %v1942_v22 = vadd.f32 %v1941_v10, %v1935_v34  ;;  %v1957_v1 = vmul.f32 %v1935_v34, %v1935_v34  ;;  %v1958_v25 = vmul.f32 %v1936_v19, %v1936_v19  ;;  %v1959_v30 = vmul.f32 %v1937_v6, %v1937_v6 }
 0x156   : > { %v2164_v12 = vadd.f32 %v2163_v4, %v2162_v45  ;;  %v2185_v13 = vrot.slane %v2184_v57, 4  ;;  %v1960_v37 = vmul.f32 %v1938_v50, %v1938_v50 }
 0x157   : > { %v1943_v17 = vadd.f32 %v1942_v22, %v1936_v19  ;;  %v1964_v26 = vadd.f32 %v1963_v14, %v1957_v1 }
 0x158   : > { %v2165_v33 = vrot.slane %v2164_v12, 2  ;;  %v2186_v16 = vadd.f32 %v2185_v13, %v2184_v57 }
 0x159   : > { %v1944_v31 = vadd.f32 %v1943_v17, %v1937_v6  ;;  %v1965_v35 = vadd.f32 %v1964_v26, %v1958_v25 }
 0x15a   : > { %v2166_v54 = vadd.f32 %v2165_v33, %v2164_v12  ;;  %v2187_v20 = vrot.slane %v2186_v16, 2 }
 0x15b   : > { %v1945_v15 = vadd.f32 %v1944_v31, %v1938_v50  ;;  %v1966_v38 = vadd.f32 %v1965_v35, %v1959_v30 }
 0x15c   : > { %v2167_v23 = vrot.slane %v2166_v54, 1  ;;  %v2188_v24 = vadd.f32 %v2187_v20, %v2186_v16 }
 0x15d   : > { %v1946_v39 = vrot.slane %v1945_v15, 4  ;;  %v1967_v32 = vadd.f32 %v1966_v38, %v1960_v37 }
 0x15e   : > { %v2168_v27 = vadd.f32 %v2167_v23, %v2166_v54  ;;  %v2189_v21 = vrot.slane %v2188_v24, 1 }
 0x15f   : > { %v1947_v40 = vadd.f32 %v1946_v39, %v1945_v15  ;;  %v1968_v41 = vrot.slane %v1967_v32, 4 }
 0x160   : > { %2194 = vst [vmem:[%s284_s25] sm:$0x1] %v2168_v27  ;;  %v2190_v28 = vadd.f32 %v2189_v21, %v2188_v24 }
 0x161   : > { %v1948_v42 = vrot.slane %v1947_v40, 2  ;;  %v1969_v43 = vadd.f32 %v1968_v41, %v1967_v32 }
 0x162   : > { %2195 = vst [vmem:[%s284_s25 + $0x1] sm:$0x1] %v2190_v28 }
 0x163   : > { %v1949_v29 = vadd.f32 %v1948_v42, %v1947_v40  ;;  %v1970_v44 = vrot.slane %v1969_v43, 2 }
 0x165   : > { %v1950_v46 = vrot.slane %v1949_v29, 1  ;;  %v1971_v36 = vadd.f32 %v1970_v44, %v1969_v43 }
 0x167   : > { %v1951_v3 = vadd.f32 %v1950_v46, %v1949_v29  ;;  %v1972_v48 = vrot.slane %v1971_v36, 1 }
 0x169   : > { %v1973_v51 = vadd.f32 %v1972_v48, %v1971_v36  ;;  %2192 = vst [vmem:[%s280_s28] sm:$0x1] %v1951_v3 }
 0x16b   : > { %2193 = vst [vmem:[%s280_s28 + $0x1] sm:$0x1] %v1973_v51 }
 0x16c PF: > { %s17_s21 = sadd.s32 1, %s2979_s21  }
 0x16d   : > { %p14_p4 = scmp.ge.s32.totalorder %s17_s21, 4  }
 0x16f   :  { %16 = sbr.rel (!%p14_p4) target bundleno = 1 (0x1), region = 103 }

// kernel: simple_block_forward.4
= control target key start
LH: loop header
LB: loop body
LE: loop exit
PB: predicated region body
PF: predicated region fallthrough
CT: control target
= control target key end

     0   :  { %s3002_s18 = smov 0   ;;  %s3577_s0 = inlined_call_operand.vmem [shape: bf16[2,64,128], index: 0, kind: input, shape index: {}]   ;;  %s3578_s1 = inlined_call_operand.vmem [shape: f32[1,128], index: 1, kind: input, shape index: {}]   ;;  %s3579_s2 = inlined_call_operand.vmem [shape: f32[1,128], index: 2, kind: input, shape index: {}]   ;;  %s3580_s3 = inlined_call_operand.vmem [shape: bf16[1152,128], index: 3, kind: input, shape index: {}]   ;;  %s3581_s4 = inlined_call_operand.vmem [shape: bf16[2,64,128], index: 4, kind: output, shape index: {0}]   ;;  %s3582_s5 = inlined_call_operand.vmem [shape: f32[2,2,128], index: 5, kind: output, shape index: {1}]  }
   0x1 LB: > { %s2436_s19 = sadd.s32 4294967295, %s2969_s18   ;;  %p2440_p0 = scmp.ge.s32.totalorder %s2969_s18, 1  ;;  %s2969_s18 = sphi %s3002_s18, %s16_s18  }
   0x2   : > { %p190_p1 = scmp.lt.s32.totalorder %s2969_s18, 3 }
   0x4   : > { %p191_p2 = pnand %p2440_p0, %p190_p1 }
   0x5   : > { %v2879_v0 = vld [vmem:[%s3580_s3 + $0xc0] sm:$0xff] (!%p191_p2)   ;;  %v2881_v2 = vld [vmem:[%s3580_s3 + $0xc8] sm:$0xff] (!%p191_p2)   ;;  %v2885_v6 = vld [vmem:[%s3580_s3 + $0xd0] sm:$0xff] (!%p191_p2)   ;;  %v2971_v7 = vmov (!%p191_p2), 0   ;;  %p222_p3 = scmp.lt.s32.totalorder (!%p191_p2), %s2436_s19, 1  ;;  %vm242_vm0 = vcmask (!%p191_p2), 1040384  }
   0x6   : > { %194 = sbr.rel (%p191_p2) target bundleno = 406 (0x196), region = 36  ;;  %v2880_v1 = vld [vmem:[%s3580_s3 + $0x80] sm:$0xff] (!%p191_p2)   ;;  %2698 = vmatprep.subr.bf16.mxu1 (!%p191_p2), %v2879_v0  ;;  %v2882_v3 = vld [vmem:[%s3580_s3 + $0x88] sm:$0xff] (!%p191_p2)   ;;  %237 = vst [vmem:[#allocation2] sm:$0xf] (!%p191_p2), %v2971_v7  ;;  %v2886_v8 = vld [vmem:[%s3580_s3 + $0x90] sm:$0xff] (!%p191_p2)  }
   0x7   : > { %2699 = vmatpush3.bf16.msra.mxu1 (!%p191_p2), %v2880_v1  ;;  %v2883_v4 = vld [vmem:[%s3580_s3 + $0x40] sm:$0xff] (!%p191_p2)   ;;  %238 = vst [vmem:[#allocation2 + $0x4] sm:$0x1] (!%p191_p2), %v2971_v7  ;;  %240 = vst [vmem:[#allocation2 + $0x48] sm:$0xf] (!%p191_p2), %v2971_v7  ;;  %v2887_v9 = vld [vmem:[%s3580_s3 + $0x48] sm:$0xff] (!%p191_p2)  }
   0x8   : > { %2700 = vmatprep.subr.bf16.mxu1 (!%p191_p2), %v2881_v2  ;;  %v2884_v5 = vld [vmem:[%s3580_s3] sm:$0xff] (!%p191_p2)   ;;  %2658 = vmatprep.subr.bf16.mxu0 (!%p191_p2), %v2883_v4  ;;  %241 = vst [vmem:[#allocation2 + $0x4c] sm:$0x1] (!%p191_p2), %v2971_v7  ;;  %v2888_v10 = vld [vmem:[%s3580_s3 + $0x8] sm:$0xff] (!%p191_p2)   ;;  %v2889_v11 = vld [vmem:[%s3580_s3 + $0xd8] sm:$0xff] (!%p191_p2)   ;;  %vm466_vm5 = vcmask (!%p191_p2), 1043456  }
   0x9   : > { %2659 = vmatpush3.bf16.msra.mxu0 (!%p191_p2), %v2884_v5  ;;  %v2890_v12 = vld [vmem:[%s3580_s3 + $0x98] sm:$0xff] (!%p191_p2)   ;;  %v2891_v13 = vld [vmem:[%s3580_s3 + $0x50] sm:$0xff] (!%p191_p2)   ;;  %v2893_v15 = vld [vmem:[%s3580_s3 + $0xe0] sm:$0xff] (!%p191_p2)   ;;  %vm243_vm1 = vsmask.f32 (!%p191_p2), 256  ;;  %vm735_vm7 = vcmask (!%p191_p2), 1042432  }
   0xa   : > { %2660 = vmatprep.subr.bf16.mxu0 (!%p191_p2), %v2887_v9  ;;  %v2892_v14 = vld [vmem:[%s3580_s3 + $0x10] sm:$0xff] (!%p191_p2)   ;;  %v2894_v16 = vld [vmem:[%s3580_s3 + $0xa0] sm:$0xff] (!%p191_p2)   ;;  %v2895_v17 = vld [vmem:[%s3580_s3 + $0x58] sm:$0xff] (!%p191_p2)   ;;  %vm275_vm3 = vsmask.f32 (!%p191_p2), 7938  ;;  %vm736_vm8 = vcmask (!%p191_p2), 1046532  }
   0xb   : > { %2701 = vmatpush3.bf16.msra.mxu1 (!%p191_p2), %v2882_v3  ;;  %v2896_v18 = vld [vmem:[%s3580_s3 + $0x18] sm:$0xff] (!%p191_p2)   ;;  %v2897_v19 = vld [vmem:[%s3580_s3 + $0xe8] sm:$0xff] (!%p191_p2)   ;;  %v2899_v21 = vld [vmem:[%s3580_s3 + $0x60] sm:$0xff] (!%p191_p2)   ;;  %vm568_vm10 = vsmask.f32 (!%p191_p2), 3328 }
   0xc   : > { %2702 = vmatprep.subr.bf16.mxu1 (!%p191_p2), %v2885_v6  ;;  %v2898_v20 = vld [vmem:[%s3580_s3 + $0xa8] sm:$0xff] (!%p191_p2)   ;;  %v2900_v22 = vld [vmem:[%s3580_s3 + $0x20] sm:$0xff] (!%p191_p2)   ;;  %v2901_v23 = vld [vmem:[%s3580_s3 + $0xf0] sm:$0xff] (!%p191_p2)   ;;  %vm569_vm11 = vsmask.f32 (!%p191_p2), 7440 }
   0xd   : > { %2661 = vmatpush3.bf16.msra.mxu0 %v2888_v10  ;;  %s3594_s19 = smov (!%p222_p3, %s2436_s19), 1  ;;  %v2902_v24 = vld [vmem:[%s3580_s3 + $0xb0] sm:$0xff]   ;;  %v2903_v25 = vld [vmem:[%s3580_s3 + $0x68] sm:$0xff]   ;;  %v2905_v27 = vld [vmem:[%s3580_s3 + $0xf8] sm:$0xff]  }
   0xe   : > { %2662 = vmatprep.subr.bf16.mxu0 %v2891_v13  ;;  %v2904_v26 = vld [vmem:[%s3580_s3 + $0x28] sm:$0xff]   ;;  %s2598_s28 = sshll.u32 %s3594_s19, 5  ;;  %v2906_v28 = vld [vmem:[%s3580_s3 + $0xb8] sm:$0xff]   ;;  %v2907_v29 = vld [vmem:[%s3580_s3 + $0x70] sm:$0xff]  }
   0xf   : > { %2703 = vmatpush3.bf16.msra.mxu1 %v2886_v8  ;;  %v2908_v30 = vld [vmem:[%s3580_s3 + $0x30] sm:$0xff]   ;;  %s3112_s12 = scalar_lea.vmem %s3577_s0, %s2598_s28  ;;  %v248_v31 = vld [vmem:[#allocation2 + $0x8] sm:$0x1]  ;;  %vm3114_vm2 = vmand %vm242_vm0, %vm243_vm1  ;;  %s231_s17 = scalar_lea.vmem %s3581_s4, %s2598_s28 }
  0x10   : > { %2704 = vmatprep.subr.bf16.mxu1 %v2889_v11  ;;  %v251_v32 = vld [vmem:[#allocation2 + $0x10] sm:$0x1]  ;;  %v3121_v34 = vld [vmem:[%s3578_s1] ss:$0 sm:$0xff]  ;;  %v249_v35 = vsel %vm3114_vm2, 0, %v248_v31  ;;  %vm3128_vm4 = vmand %vm242_vm0, %vm275_vm3  ;;  %s2445_s28 = sshll.u32 %s3594_s19, 1 }
  0x11   : > { %2663 = vmatpush3.bf16.msra.mxu0 %v2892_v14  ;;  %v252_v36 = vsel %vm3114_vm2, 0, %v251_v32  ;;  %v2617_v38 = vld [vmem:[%s3112_s12] sm:$0xff]   ;;  %250 = vst [vmem:[#allocation2 + $0x8] sm:$0x1] %v249_v35  ;;  %v280_v44 = vld [vmem:[#allocation2 + $0xc] sm:$0x1]  ;;  %vm3164_vm6 = vmand %vm466_vm5, %vm275_vm3  ;;  %s235_s22 = scalar_lea.vmem %s3582_s5, %s2445_s28 }
  0x12   : > { %2664 = vmatprep.subr.bf16.mxu0 %v2895_v17  ;;  %v277_v39 = vld [vmem:[#allocation2 + $0x4] sm:$0x1]  ;;  %253 = vst [vmem:[#allocation2 + $0x10] sm:$0x1] %v252_v36  ;;  %v3136_v40 = vld [vmem:[%s3579_s2] ss:$0 sm:$0xff]  ;;  %v2618_v41 = vunpack.c.l.bf16 %v2617_v38  ;;  %v2619_v42 = vunpack.c.h.bf16 %v2617_v38  ;;  %vm3190_vm9 = vmor %vm735_vm7, %vm736_vm8 }
  0x13   : > { %2705 = vmatpush3.bf16.msra.mxu1 %v2890_v12  ;;  %v278_v43 = vsel %vm3128_vm4, 0, %v277_v39  ;;  %v281_v45 = vsel %vm3128_vm4, 0, %v280_v44  ;;  %v2910_v48 = vld [vmem:[%s3580_s3 + $0x1c0] sm:$0xff]   ;;  %v2912_v51 = vld [vmem:[%s3580_s3 + $0x78] sm:$0xff]   ;;  %v2652_v10 = vld [vmem:[%s3112_s12 + $0x8] sm:$0xff]  }
  0x14   : > { %2706 = vmatprep.subr.bf16.mxu1 %v2893_v15  ;;  %279 = vst [vmem:[#allocation2 + $0x4] sm:$0x1] %v278_v43  ;;  %v331_v46 = vmul.f32 %v2618_v41, %v3121_v34  ;;  %v332_v47 = vmul.f32 %v2619_v42, %v3121_v34  ;;  %282 = vst [vmem:[#allocation2 + $0xc] sm:$0x1] %v281_v45  ;;  %v2913_v52 = vld [vmem:[%s3580_s3 + $0x38] sm:$0xff]   ;;  %v2916_v2 = vld [vmem:[%s3580_s3 + $0x140] sm:$0xff]   ;;  %v2622_v17 = vunpack.c.l.bf16 %v2652_v10 }
  0x15   : > { %2665 = vmatpush3.bf16.msra.mxu0 %v2896_v18  ;;  %v245_v57 = vld [vmem:[#allocation2] sm:$0x1]  ;;  %v254_v5 = vld [vmem:[#allocation2 + $0x18] sm:$0x1]  ;;  %v703_v15 = vld [vmem:[#allocation2] sm:$0xe]  ;;  %v2623_v18 = vunpack.c.h.bf16 %v2652_v10 }
  0x16   : > { %2666 = vmatprep.subr.bf16.mxu0 %v2899_v21  ;;  %v345_v49 = vadd.f32 %v3136_v40, %v331_v46  ;;  %v346_v50 = vadd.f32 %v3136_v40, %v332_v47  ;;  %v246_v58 = vsel %vm3114_vm2, 0, %v245_v57  ;;  %v257_v6 = vld [vmem:[#allocation2 + $0x20] sm:$0x1]  ;;  %v255_v8 = vsel %vm3114_vm2, 0, %v254_v5  ;;  %vm3201_vm12 = vmor %vm568_vm10, %vm569_vm11 }
  0x17   : > { %2707 = vmatpush3.bf16.msra.mxu1 %v2894_v16  ;;  %247 = vst [vmem:[#allocation2] sm:$0x1] %v246_v58  ;;  %v258_v9 = vsel %vm3114_vm2, 0, %v257_v6  ;;  %256 = vst [vmem:[#allocation2 + $0x18] sm:$0x1] %v255_v8  ;;  %v2464_v36 = vrot.slane %v703_v15, 9 }
  0x18   : > { %2708 = vmatprep.subr.bf16.mxu1 %v2897_v19  ;;  %v353_v53 = vmax.f32 %v345_v49, 0.0  ;;  %v354_v54 = vmax.f32 %v346_v50, 0.0  ;;  %v468_v63 = vld [vmem:[#allocation2 + $0x8] sm:$0xf]  ;;  %259 = vst [vmem:[#allocation2 + $0x20] sm:$0x1] %v258_v9 }
  0x19   : > { %2667 = vmatpush3.bf16.msra.mxu0 %v2900_v22  ;;  %v474_v0 = vld [vmem:[#allocation2 + $0x10] sm:$0xf]  ;;  %v283_v19 = vld [vmem:[#allocation2 + $0x14] sm:$0x1]  ;;  %v3382_v7 = vld [vmem:[%s3580_s3 + $0x200] sm:$0xff]  }
  0x1a   : > { %2668 = vmatprep.subr.bf16.mxu0 %v2903_v25  ;;  %v2600_v55 = vpack.c.bf16 %v353_v53, %v353_v53  ;;  %v2601_v56 = vpack.c.bf16 %v354_v54, %v354_v54 }
  0x1b   : > { %2709 = vmatpush3.bf16.msra.mxu1 %v2898_v20  ;;  %v471_v1 = vld [vmem:[#allocation2 + $0xc] sm:$0x1]  ;;  %v553_v14 = vld [vmem:[#allocation2 + $0x4] sm:$0x1]  ;;  %v286_v20 = vld [vmem:[#allocation2 + $0x1c] sm:$0x1] }
  0x1c   : > { %2710 = vmatprep.subr.bf16.mxu1 %v2901_v23  ;;  %v386_v59 = vshrl.u32 %v2600_v55, 16  ;;  %v389_v60 = vshll.u32 %v2600_v55, 16  ;;  %v394_v61 = vshrl.u32 %v2601_v56, 16  ;;  %v397_v62 = vshll.u32 %v2601_v56, 16  ;;  %v704_v16 = vld [vmem:[#allocation2 + $0x4] sm:$0x1] }
  0x1d   : > { %2669 = vmatpush3.bf16.msra.mxu0 %v2904_v26  ;;  %v581_v26 = vshll.u32 %v553_v14, 16  ;;  %v740_v38 = vrot.slane %v704_v16, 5 }
  0x1e   : > { %2670 = vmatprep.subr.bf16.mxu0 %v2907_v29  ;;  %v388_v3 = vrot.slane %v386_v59, 7  ;;  %v3160_v4 = vrot.slane %v394_v61, 7  ;;  %v552_v25 = vld [vmem:[#allocation2] sm:$0xf]  ;;  %v287_v29 = vsel %vm3128_vm4, 0, %v286_v20 }
  0x1f   : > { %2711 = vmatpush3.bf16.msra.mxu1 %v2902_v24  ;;  %v284_v24 = vsel %vm3128_vm4, 0, %v283_v19  ;;  %v575_v31 = vshll.u32 %v552_v25, 16  ;;  %288 = vst [vmem:[#allocation2 + $0x1c] sm:$0x1] %v287_v29  ;;  %v3195_v47 = vrot.slane %v581_v26, 5 }
  0x20   : > { %2712 = vmatprep.subr.bf16.mxu1 %v2905_v27  ;;  %v391_v11 = vor.u32 %v389_v60, %v388_v3  ;;  %v392_v12 = vrot.slane %v388_v3, 4  ;;  %v399_v13 = vor.u32 %v397_v62, %v3160_v4  ;;  %v333_v27 = vmul.f32 %v2622_v17, %v3121_v34  ;;  %285 = vst [vmem:[#allocation2 + $0x14] sm:$0x1] %v284_v24  ;;  %v480_v10 = vld [vmem:[#allocation2 + $0x18] sm:$0xf] }
  0x21   : > { %2671 = vmatpush3.bf16.msra.mxu0 %v2908_v30  ;;  %v572_v30 = vshrl.u32 %v552_v25, 16  ;;  %v577_v41 = vrot.slane %v575_v31, 5  ;;  %v400_v46 = vrot.slane %v3160_v4, 4  ;;  %v263_v29 = vld [vmem:[#allocation2 + $0x30] sm:$0x1] }
  0x22   : > { %2672 = vmatprep.subr.bf16.mxu0 %v2912_v51  ;;  %v469_v21 = vsel %vm3164_vm6, %v391_v11, %v468_v63  ;;  %v475_v22 = vsel %vm3164_vm6, %v399_v13, %v474_v0  ;;  %v472_v23 = vsel %vm3114_vm2, %v392_v12, %v471_v1  ;;  %v347_v32 = vadd.f32 %v3136_v40, %v333_v27  ;;  %v2911_v0 = vld [vmem:[%s3580_s3 + $0x180] sm:$0xff]   ;;  %v2914_v1 = vld [vmem:[%s3580_s3 + $0x1c8] sm:$0xff]  }
  0x23   : > { %2713 = vmatpush3.bf16.msra.mxu1 %v2906_v28  ;;  %470 = vst [vmem:[#allocation2 + $0x8] sm:$0xf] %v469_v21  ;;  %476 = vst [vmem:[#allocation2 + $0x10] sm:$0xf] %v475_v22  ;;  %v334_v28 = vmul.f32 %v2623_v18, %v3121_v34  ;;  %v574_v39 = vrot.slane %v572_v30, 4  ;;  %v2915_v12 = vld [vmem:[%s3580_s3 + $0x188] sm:$0xff]  }
  0x24   : > { %2778 = vmatprep.subr.bf16.mxu1 %v2910_v48  ;;  %473 = vst [vmem:[#allocation2 + $0xc] sm:$0x1] %v472_v23  ;;  %v355_v43 = vmax.f32 %v347_v32, 0.0  ;;  %v2653_v18 = vld [vmem:[%s3112_s12 + $0x10] sm:$0xff]   ;;  %v486_v21 = vld [vmem:[#allocation2 + $0x20] sm:$0xf] }
  0x25   : > { %2673 = vmatpush3.bf16.msra.mxu0 %v2913_v52  ;;  %v348_v35 = vadd.f32 %v3136_v40, %v334_v28  ;;  %v578_v45 = vor.u32 %v577_v41, %v574_v39  ;;  %v741_v52 = vsel %vm3190_vm9, %v2464_v36, %v740_v38  ;;  %v2920_v22 = vld [vmem:[%s3580_s3 + $0x1d0] sm:$0xff]   ;;  %v260_v28 = vld [vmem:[#allocation2 + $0x28] sm:$0x1]  ;;  %v2626_v30 = vunpack.c.l.bf16 %v2653_v18 }
  0x26   : > { %2738 = vmatprep.subr.bf16.mxu0 %v2916_v2  ;;  %v2602_v49 = vpack.c.bf16 %v355_v43, %v355_v43  ;;  %v483_v11 = vld [vmem:[#allocation2 + $0x1c] sm:$0x1]  ;;  %v261_v38 = vsel %vm3114_vm2, 0, %v260_v28  ;;  %v2919_v43 = vld [vmem:[%s3580_s3 + $0x100] sm:$0xff]  }
  0x27   : > { %v356_v44 = vmax.f32 %v348_v35, 0.0  ;;  %v579_v59 = vrot.slane %v578_v45, 4  ;;  %v477_v4 = vld [vmem:[#allocation2 + $0x14] sm:$0x1]  ;;  %262 = vst [vmem:[#allocation2 + $0x28] sm:$0x1] %v261_v38 }
  0x28   : > { %v402_v3 = vshrl.u32 %v2602_v49, 16  ;;  %v405_v9 = vshll.u32 %v2602_v49, 16  ;;  %v478_v16 = vsel %vm3114_vm2, %v400_v46, %v477_v4  ;;  %v289_v46 = vld [vmem:[#allocation2 + $0x24] sm:$0x1]  ;;  %v264_v49 = vsel %vm3114_vm2, 0, %v263_v29 }
  0x29   : > { %v2603_v54 = vpack.c.bf16 %v356_v44, %v356_v44  ;;  %v584_v6 = vsel %vm3201_vm12, %v579_v59, %v3195_v47  ;;  %479 = vst [vmem:[#allocation2 + $0x14] sm:$0x1] %v478_v16  ;;  %265 = vst [vmem:[#allocation2 + $0x30] sm:$0x1] %v264_v49 }
  0x2a   : > { %v2909_v48 = vld [vmem:[#allocation2 + $0x8] ss:$8 sps:$4 sm:$0xff]   ;;  %v404_v13 = vrot.slane %v402_v3, 7 }
  0x2b   : > { %v705_v50 = vld [vmem:[#allocation2 + $0x8] sm:$0xe]  ;;  %v706_v51 = vld [vmem:[#allocation2 + $0xc] sm:$0x1]  ;;  %2036 = vmatprep.mubr.bf16.mxu1 %v2909_v48  ;;  %v410_v14 = vshrl.u32 %v2603_v54, 16  ;;  %v413_v15 = vshll.u32 %v2603_v54, 16 }
  0x2c   : > { %v554_v53 = vld [vmem:[#allocation2 + $0x8] sm:$0xf]  ;;  %v2465_v55 = vrot.slane %v705_v50, 9  ;;  %v744_v56 = vrot.slane %v706_v51, 5  ;;  %v555_v57 = vld [vmem:[#allocation2 + $0xc] sm:$0x1]  ;;  %v407_v25 = vor.u32 %v405_v9, %v404_v13  ;;  %v2627_v50 = vunpack.c.h.bf16 %v2653_v18 }
  0x2d   : > { %v586_v60 = vshrl.u32 %v554_v53, 16  ;;  %v589_v61 = vshll.u32 %v554_v53, 16  ;;  %v595_v62 = vshll.u32 %v555_v57, 16  ;;  %v556_v17 = vld [vmem:[#allocation2 + $0x10] sm:$0xf]  ;;  %v408_v26 = vrot.slane %v404_v13, 4 }
  0x2e   : > { %v745_v63 = vsel %vm3190_vm9, %v2465_v55, %v744_v56  ;;  %v600_v23 = vshrl.u32 %v556_v17, 16  ;;  %v603_v24 = vshll.u32 %v556_v17, 16  ;;  %v3225_v27 = vrot.slane %v410_v14, 7  ;;  %v2917_v32 = vld [vmem:[#allocation2] ss:$8 sps:$4 sm:$0xff]   ;;  %v2921_v48 = vld [vmem:[%s3580_s3 + $0x190] sm:$0xff]  }
  0x2f   : > { %v588_v2 = vrot.slane %v586_v60, 4  ;;  %v2472_v5 = vcombine.low %v741_v52, %v745_v63  ;;  %v591_v8 = vrot.slane %v589_v61, 5  ;;  %v597_v20 = vrot.slane %v595_v62, 5  ;;  %v707_v45 = vld [vmem:[#allocation2 + $0x10] sm:$0xe]  ;;  %v2922_v54 = vld [vmem:[%s3580_s3 + $0x148] sm:$0xff]  }
  0x30   : > { %v602_v35 = vrot.slane %v600_v23, 4  ;;  %v605_v36 = vrot.slane %v603_v24, 5  ;;  %v415_v39 = vor.u32 %v413_v15, %v3225_v27  ;;  %v481_v41 = vsel %vm3164_vm6, %v407_v25, %v480_v10  ;;  %v292_v51 = vld [vmem:[#allocation2 + $0x2c] sm:$0x1]  ;;  %v2924_v57 = vld [vmem:[%s3580_s3 + $0x1d8] sm:$0xff]   ;;  %v2930_v13 = vld [vmem:[%s3580_s3 + $0x1e0] sm:$0xff]  }
  0x31   : > { %2037 = vmatmul.mubr.bf16.vlgmr.msra.gmra.mrb[0].mxu1 %v2472_v5  ;;  %v592_v19 = vor.u32 %v591_v8, %v588_v2  ;;  %v484_v44 = vsel %vm3114_vm2, %v408_v26, %v483_v11  ;;  %482 = vst [vmem:[#allocation2 + $0x18] sm:$0xf] %v481_v41  ;;  %v335_v55 = vmul.f32 %v2626_v30, %v3121_v34  ;;  %v290_v56 = vsel %vm3128_vm4, 0, %v289_v46  ;;  %v708_v62 = vld [vmem:[#allocation2 + $0x14] sm:$0x1]  ;;  %v2923_v63 = vld [vmem:[%s3580_s3 + $0x108] sm:$0xff]  }
  0x32   : > { %2779 = vmatpush3.bf16.msra.mxu1 %v2911_v0  ;;  %485 = vst [vmem:[#allocation2 + $0x1c] sm:$0x1] %v484_v44  ;;  %v487_v53 = vsel %vm3164_vm6, %v415_v39, %v486_v21  ;;  %v606_v59 = vor.u32 %v605_v36, %v602_v35  ;;  %v336_v60 = vmul.f32 %v2627_v50, %v3121_v34  ;;  %291 = vst [vmem:[#allocation2 + $0x24] sm:$0x1] %v290_v56  ;;  %v557_v0 = vld [vmem:[#allocation2 + $0x14] sm:$0x1] }
  0x33   : > { %2780 = vmatprep.subr.bf16.mxu1 %v2914_v1  ;;  %v593_v31 = vrot.slane %v592_v19, 4  ;;  %488 = vst [vmem:[#allocation2 + $0x20] sm:$0xf] %v487_v53  ;;  %v293_v61 = vsel %vm3128_vm4, 0, %v292_v51  ;;  %v349_v1 = vadd.f32 %v3136_v40, %v335_v55  ;;  %v2466_v2 = vrot.slane %v707_v45, 9  ;;  %v2925_v5 = vld [vmem:[%s3580_s3 + $0x198] sm:$0xff]  }
  0x34   : > { %294 = vst [vmem:[#allocation2 + $0x2c] sm:$0x1] %v293_v61  ;;  %v748_v3 = vrot.slane %v708_v62, 5  ;;  %v350_v4 = vadd.f32 %v3136_v40, %v336_v60  ;;  %v416_v8 = vrot.slane %v3225_v27, 4  ;;  %v3267_v9 = vrot.slane %v606_v59, 4  ;;  %v2926_v11 = vld [vmem:[%s3580_s3 + $0x150] sm:$0xff]  }
  0x35   : > { %v598_v47 = vsel %vm3201_vm12, %v593_v31, %v597_v20  ;;  %v609_v10 = vshll.u32 %v557_v0, 16  ;;  %v2929_v17 = vld [vmem:[%s3580_s3 + $0x110] sm:$0xff]   ;;  %v2931_v24 = vld [vmem:[%s3580_s3 + $0x1a0] sm:$0xff]   ;;  %v492_v41 = vld [vmem:[#allocation2 + $0x28] sm:$0xf] }
  0x36   : > { %2781 = vmatpush3.bf16.msra.mxu1 %v2915_v12  ;;  %v2460_v52 = vcombine.low %v584_v6, %v598_v47  ;;  %v357_v6 = vmax.f32 %v349_v1, 0.0  ;;  %v358_v12 = vmax.f32 %v350_v4, 0.0  ;;  %v749_v18 = vsel %vm3190_vm9, %v2466_v2, %v748_v3  ;;  %v2934_v44 = vld [vmem:[%s3580_s3 + $0x1e8] sm:$0xff]   ;;  %v2936_v60 = vld [vmem:[%s3580_s3 + $0x160] sm:$0xff]   ;;  %v2654_v61 = vld [vmem:[%s3112_s12 + $0x18] sm:$0xff]  }
  0x37   : > { %2782 = vmatprep.subr.bf16.mxu1 %v2920_v22  ;;  %v611_v29 = vrot.slane %v609_v10, 5  ;;  %v2935_v50 = vld [vmem:[%s3580_s3 + $0x1a8] sm:$0xff]   ;;  %v2630_v2 = vunpack.c.l.bf16 %v2654_v61  ;;  %v2631_v3 = vunpack.c.h.bf16 %v2654_v61  ;;  %v2940_v10 = vld [vmem:[%s3580_s3 + $0x1f0] sm:$0xff]  }
  0x38   : > { %1971 = vmatprep.mubr.bf16.mxu0 %v2460_v52  ;;  %v709_v14 = vld [vmem:[#allocation2 + $0x18] sm:$0xe]  ;;  %v2604_v16 = vpack.c.bf16 %v357_v6, %v357_v6  ;;  %v2605_v23 = vpack.c.bf16 %v358_v12, %v358_v12  ;;  %v498_v52 = vld [vmem:[#allocation2 + $0x30] sm:$0xf] }
  0x39   : > { %1972 = vmatmul.mubr.bf16.vlgmr.msra.gmra.mrb[0].mxu0 %v2917_v32  ;;  %v710_v15 = vld [vmem:[#allocation2 + $0x1c] sm:$0x1]  ;;  %v2467_v19 = vrot.slane %v709_v14, 9  ;;  %v558_v21 = vld [vmem:[#allocation2 + $0x18] sm:$0xf]  ;;  %v612_v62 = vsel %vm3201_vm12, %v3267_v9, %v611_v29  ;;  %v2939_v9 = vld [vmem:[%s3580_s3 + $0x120] sm:$0xff]  }
  0x3a   : > { %2739 = vmatpush3.bf16.msra.mxu0 %v2919_v43  ;;  %2783 = vmatpush3.bf16.msra.mxu1 %v2921_v48  ;;  %v752_v20 = vrot.slane %v710_v15, 5  ;;  %v559_v22 = vld [vmem:[#allocation2 + $0x1c] sm:$0x1]  ;;  %v2918_v25 = vld [vmem:[#allocation2 + $0x18] ss:$8 sps:$4 sm:$0xff]   ;;  %v614_v26 = vshrl.u32 %v558_v21, 16 }
  0x3b   : > { %2740 = vmatprep.subr.bf16.mxu0 %v2922_v54  ;;  %2784 = vmatprep.subr.bf16.mxu1 %v2924_v57  ;;  %v617_v27 = vshll.u32 %v558_v21, 16  ;;  %v623_v30 = vshll.u32 %v559_v22, 16  ;;  %v418_v31 = vshrl.u32 %v2604_v16, 16  ;;  %v2932_v32 = vld [vmem:[%s3580_s3 + $0x158] sm:$0xff]   ;;  %v421_v39 = vshll.u32 %v2604_v16, 16 }
  0x3c   : > { %v753_v28 = vsel %vm3190_vm9, %v2467_v19, %v752_v20  ;;  %2044 = vmatprep.mubr.bf16.mxu1 %v2918_v25  ;;  %v616_v36 = vrot.slane %v614_v26, 4  ;;  %v2933_v43 = vld [vmem:[%s3580_s3 + $0x118] sm:$0xff]   ;;  %v426_v47 = vshrl.u32 %v2605_v23, 16  ;;  %v429_v48 = vshll.u32 %v2605_v23, 16  ;;  %v489_v49 = vld [vmem:[#allocation2 + $0x24] sm:$0x1] }
  0x3d   : > { %v2473_v35 = vcombine.low %v749_v18, %v753_v28  ;;  %v619_v38 = vrot.slane %v617_v27, 5  ;;  %v625_v45 = vrot.slane %v623_v30, 5  ;;  %v420_v46 = vrot.slane %v418_v31, 7  ;;  %v495_v54 = vld [vmem:[#allocation2 + $0x2c] sm:$0x1] }
  0x3e   : > { %2741 = vmatpush3.bf16.msra.mxu0 %v2923_v63  ;;  %2785 = vmatpush3.bf16.msra.mxu1 %v2925_v5  ;;  %v490_v53 = vsel %vm3114_vm2, %v416_v8, %v489_v49  ;;  %v3299_v55 = vld [vmem:[#allocation2 + $0x20] sm:$0xe]  ;;  %v3301_v59 = vrot.slane %v426_v47, 7  ;;  %v2927_v0 = vld [vmem:[#allocation2 + $0x10] ss:$8 sps:$4 sm:$0xff]   ;;  %v337_v16 = vmul.f32 %v2630_v2, %v3121_v34  ;;  %v338_v23 = vmul.f32 %v2631_v3, %v3121_v34 }
  0x3f   : > { %2742 = vmatprep.subr.bf16.mxu0 %v2926_v11  ;;  %2786 = vmatprep.subr.bf16.mxu1 %v2930_v13  ;;  %v620_v51 = vor.u32 %v619_v38, %v616_v36  ;;  %v423_v56 = vor.u32 %v421_v39, %v420_v46  ;;  %v424_v57 = vrot.slane %v420_v46, 4  ;;  %491 = vst [vmem:[#allocation2 + $0x24] sm:$0x1] %v490_v53  ;;  %v560_v1 = vld [vmem:[#allocation2 + $0x20] sm:$0xf]  ;;  %v2468_v8 = vrot.slane %v3299_v55, 9 }
  0x40   : > { %2045 = vmatmul.mubr.bf16.gmra.mrb[4].mxu1 %v2473_v35  ;;  %v431_v4 = vor.u32 %v429_v48, %v3301_v59  ;;  %v628_v12 = vshrl.u32 %v560_v1, 16  ;;  %v631_v13 = vshll.u32 %v560_v1, 16  ;;  %v266_v14 = vld [vmem:[#allocation2 + $0x38] sm:$0x1]  ;;  %v269_v15 = vld [vmem:[#allocation2 + $0x40] sm:$0x1]  ;;  %v352_v31 = vadd.f32 %v3136_v40, %v338_v23 }
  0x41   : > { %v621_v63 = vrot.slane %v620_v51, 4  ;;  %v493_v5 = vsel %vm3164_vm6, %v423_v56, %v492_v41  ;;  %v496_v6 = vsel %vm3114_vm2, %v424_v57, %v495_v54  ;;  %v267_v19 = vsel %vm3114_vm2, 0, %v266_v14  ;;  %v295_v25 = vld [vmem:[#allocation2 + $0x34] sm:$0x1]  ;;  %v298_v26 = vld [vmem:[#allocation2 + $0x3c] sm:$0x1] }
  0x42   : > { %2743 = vmatpush3.bf16.msra.mxu0 %v2929_v17  ;;  %2787 = vmatpush3.bf16.msra.mxu1 %v2931_v24  ;;  %494 = vst [vmem:[#allocation2 + $0x28] sm:$0xf] %v493_v5  ;;  %497 = vst [vmem:[#allocation2 + $0x2c] sm:$0x1] %v496_v6  ;;  %v499_v18 = vsel %vm3164_vm6, %v431_v4, %v498_v52  ;;  %v270_v20 = vsel %vm3114_vm2, 0, %v269_v15  ;;  %v630_v21 = vrot.slane %v628_v12, 4 }
  0x43   : > { %2744 = vmatprep.subr.bf16.mxu0 %v2932_v32  ;;  %2788 = vmatprep.subr.bf16.mxu1 %v2934_v44  ;;  %v626_v11 = vsel %vm3201_vm12, %v621_v63, %v625_v45  ;;  %500 = vst [vmem:[#allocation2 + $0x30] sm:$0xf] %v499_v18  ;;  %v633_v22 = vrot.slane %v631_v13, 5  ;;  %268 = vst [vmem:[#allocation2 + $0x38] sm:$0x1] %v267_v19  ;;  %v351_v24 = vadd.f32 %v3136_v40, %v337_v16  ;;  %v2941_v34 = vld [vmem:[%s3580_s3 + $0x1b0] sm:$0xff]  }
  0x44   : > { %v2461_v17 = vcombine.low %v612_v62, %v626_v11  ;;  %271 = vst [vmem:[#allocation2 + $0x40] sm:$0x1] %v270_v20  ;;  %v296_v27 = vsel %vm3128_vm4, 0, %v295_v25  ;;  %v299_v28 = vsel %vm3128_vm4, 0, %v298_v26  ;;  %v360_v38 = vmax.f32 %v352_v31, 0.0  ;;  %v2942_v13 = vld [vmem:[%s3580_s3 + $0x168] sm:$0xff]  }
  0x45   : > { %v359_v32 = vmax.f32 %v351_v24, 0.0  ;;  %297 = vst [vmem:[#allocation2 + $0x34] sm:$0x1] %v296_v27  ;;  %300 = vst [vmem:[#allocation2 + $0x3c] sm:$0x1] %v299_v28  ;;  %v2943_v14 = vld [vmem:[%s3580_s3 + $0x128] sm:$0xff]  }
  0x46   : > { %2745 = vmatpush3.bf16.msra.mxu0 %v2933_v43  ;;  %2789 = vmatpush3.bf16.msra.mxu1 %v2935_v50  ;;  %v712_v29 = vld [vmem:[#allocation2 + $0x24] sm:$0x1]  ;;  %v634_v43 = vor.u32 %v633_v22, %v630_v21  ;;  %v2607_v49 = vpack.c.bf16 %v360_v38, %v360_v38  ;;  %v432_v50 = vrot.slane %v3301_v59, 4  ;;  %v2945_v24 = vld [vmem:[%s3580_s3 + $0x1b8] sm:$0xff]  }
  0x47   : > { %2746 = vmatprep.subr.bf16.mxu0 %v2936_v60  ;;  %2790 = vmatprep.subr.bf16.mxu1 %v2940_v10  ;;  %v561_v30 = vld [vmem:[#allocation2 + $0x24] sm:$0x1]  ;;  %v756_v35 = vrot.slane %v712_v29, 5  ;;  %v2606_v44 = vpack.c.bf16 %v359_v32, %v359_v32  ;;  %v2946_v32 = vld [vmem:[%s3580_s3 + $0x170] sm:$0xff]  }
  0x48   : > { %1979 = vmatprep.mubr.bf16.mxu0 %v2461_v17  ;;  %v637_v36 = vshll.u32 %v561_v30, 16  ;;  %v635_v57 = vrot.slane %v634_v43, 4  ;;  %v442_v1 = vshrl.u32 %v2607_v49, 16  ;;  %v445_v4 = vshll.u32 %v2607_v49, 16  ;;  %v2944_v17 = vld [vmem:[%s3580_s3 + $0x1f8] sm:$0xff]  }
  0x49   : > { %1980 = vmatmul.mubr.bf16.gmra.mrb[4].mxu0 %v2927_v0  ;;  %v713_v39 = vld [vmem:[#allocation2 + $0x28] sm:$0xe]  ;;  %v714_v41 = vld [vmem:[#allocation2 + $0x2c] sm:$0x1]  ;;  %v757_v45 = vsel %vm3190_vm9, %v2468_v8, %v756_v35  ;;  %v434_v61 = vshrl.u32 %v2606_v44, 16  ;;  %v437_v0 = vshll.u32 %v2606_v44, 16 }
  0x4a   : > { %2747 = vmatpush3.bf16.msra.mxu0 %v2939_v9  ;;  %2791 = vmatpush3.bf16.msra.mxu1 %v2941_v34  ;;  %v2469_v40 = vrot.slane %v713_v39, 9  ;;  %v760_v46 = vrot.slane %v714_v41, 5  ;;  %v562_v47 = vld [vmem:[#allocation2 + $0x28] sm:$0xf]  ;;  %v563_v48 = vld [vmem:[#allocation2 + $0x2c] sm:$0x1] }
  0x4b   : > { %v2928_v51 = vld [vmem:[#allocation2 + $0x28] ss:$8 sps:$4 sm:$0xff]   ;;  %v642_v52 = vshrl.u32 %v562_v47, 16  ;;  %v645_v54 = vshll.u32 %v562_v47, 16  ;;  %v651_v55 = vshll.u32 %v563_v48, 16  ;;  %v639_v62 = vrot.slane %v637_v36, 5  ;;  %2748 = vmatprep.subr.bf16.mxu0 %v2942_v13  ;;  %2792 = vmatprep.subr.bf16.mxu1 %v2944_v17 }
  0x4c   : > { %v761_v53 = vsel %vm3190_vm9, %v2469_v40, %v760_v46  ;;  %2052 = vmatprep.mubr.bf16.mxu1 %v2928_v51  ;;  %v504_v2 = vld [vmem:[#allocation2 + $0x38] sm:$0xf]  ;;  %v501_v3 = vld [vmem:[#allocation2 + $0x34] sm:$0x1]  ;;  %v436_v59 = vrot.slane %v434_v61, 7  ;;  %v3348_v11 = vrot.slane %v442_v1, 7 }
  0x4d   : > { %v2474_v56 = vcombine.low %v757_v45, %v761_v53  ;;  %v644_v60 = vrot.slane %v642_v52, 4  ;;  %v647_v63 = vrot.slane %v645_v54, 5  ;;  %v510_v5 = vld [vmem:[#allocation2 + $0x40] sm:$0xf]  ;;  %v502_v6 = vsel %vm3114_vm2, %v432_v50, %v501_v3  ;;  %v507_v8 = vld [vmem:[#allocation2 + $0x3c] sm:$0x1] }
  0x4e   : > { %v653_v10 = vrot.slane %v651_v55, 5  ;;  %503 = vst [vmem:[#allocation2 + $0x34] sm:$0x1] %v502_v6  ;;  %v715_v12 = vld [vmem:[#allocation2 + $0x30] sm:$0xe]  ;;  %v439_v15 = vor.u32 %v437_v0, %v436_v59  ;;  %v440_v16 = vrot.slane %v436_v59, 4  ;;  %v640_v18 = vsel %vm3201_vm12, %v635_v57, %v639_v62  ;;  %2749 = vmatpush3.bf16.msra.mxu0 %v2943_v14  ;;  %2793 = vmatpush3.bf16.msra.mxu1 %v2945_v24 }
  0x4f   : > { %2053 = vmatmul.mubr.bf16.gmra.mrb[8].mxu1 %v2474_v56  ;;  %v648_v9 = vor.u32 %v647_v63, %v644_v60  ;;  %v2937_v20 = vld [vmem:[#allocation2 + $0x20] ss:$8 sps:$4 sm:$0xff]   ;;  %v447_v21 = vor.u32 %v445_v4, %v3348_v11  ;;  %v564_v25 = vld [vmem:[#allocation2 + $0x30] sm:$0xf]  ;;  %v2470_v31 = vrot.slane %v715_v12, 9  ;;  %2750 = vmatprep.subr.bf16.mxu0 %v2946_v32  ;;  %v2951_v54 = vld [vmem:[%s3580_s3 + $0x178] sm:$0xff]  }
  0x50   : > { %v505_v22 = vsel %vm3164_vm6, %v439_v15, %v504_v2  ;;  %v508_v23 = vsel %vm3114_vm2, %v440_v16, %v507_v8  ;;  %v656_v28 = vshrl.u32 %v564_v25, 16  ;;  %v659_v29 = vshll.u32 %v564_v25, 16  ;;  %v2948_v36 = vld [vmem:[%s3580_s3 + $0x130] sm:$0xff]   ;;  %v1097_v46 = vld [vmem:[#allocation2 + $0x18] sm:$0xf]  ;;  %2854 = vmatprep.subr.bf16.mxu1 %v3382_v7 }
  0x51   : > { %v649_v19 = vrot.slane %v648_v9, 4  ;;  %506 = vst [vmem:[#allocation2 + $0x38] sm:$0xf] %v505_v22  ;;  %v511_v27 = vsel %vm3164_vm6, %v447_v21, %v510_v5  ;;  %509 = vst [vmem:[#allocation2 + $0x3c] sm:$0x1] %v508_v23  ;;  %v1126_v50 = vshrl.u32 %v1097_v46, 16 }
  0x52   : > { %512 = vst [vmem:[#allocation2 + $0x40] sm:$0xf] %v511_v27  ;;  %v658_v34 = vrot.slane %v656_v28, 4  ;;  %v661_v35 = vrot.slane %v659_v29, 5  ;;  %v1095_v41 = vld [vmem:[#allocation2 + $0x10] sm:$0xf]  ;;  %2751 = vmatpush3.bf16.msra.mxu0 %v2948_v36 }
  0x53   : > { %v654_v26 = vsel %vm3201_vm12, %v649_v19, %v653_v10  ;;  %v1096_v40 = vld [vmem:[#allocation2 + $0x14] sm:$0x1]  ;;  %v1112_v47 = vshrl.u32 %v1095_v41, 16  ;;  %v1115_v48 = vshll.u32 %v1095_v41, 16  ;;  %v1129_v53 = vshll.u32 %v1097_v46, 16  ;;  %2752 = vmatprep.subr.bf16.mxu0 %v2951_v54  ;;  %v2952_v5 = vld [vmem:[%s3580_s3 + $0x138] sm:$0xff]  }
  0x54   : > { %v2462_v30 = vcombine.low %v640_v18, %v654_v26  ;;  %v662_v44 = vor.u32 %v661_v35, %v658_v34  ;;  %v1121_v49 = vshll.u32 %v1096_v40, 16  ;;  %v1098_v4 = vld [vmem:[#allocation2 + $0x1c] sm:$0x1]  ;;  %v1128_v15 = vrot.slane %v1126_v50, 4  ;;  %v974_v26 = vld [vmem:[#allocation2 + $0x8] sm:$0xe] }
  0x55   : > { %v716_v38 = vld [vmem:[#allocation2 + $0x34] sm:$0x1]  ;;  %v1114_v8 = vrot.slane %v1112_v47, 4  ;;  %v1117_v9 = vrot.slane %v1115_v48, 5  ;;  %v1131_v17 = vrot.slane %v1129_v53, 5  ;;  %v1135_v18 = vshll.u32 %v1098_v4, 16 }
  0x56   : > { %1987 = vmatprep.mubr.bf16.mxu0 %v2462_v30  ;;  %v565_v39 = vld [vmem:[#allocation2 + $0x34] sm:$0x1]  ;;  %v764_v43 = vrot.slane %v716_v38, 5  ;;  %v663_v51 = vrot.slane %v662_v44, 4  ;;  %v1123_v10 = vrot.slane %v1121_v49, 5  ;;  %2753 = vmatpush3.bf16.msra.mxu0 %v2952_v5  ;;  %v2484_v32 = vrot.slane %v974_v26, 9 }
  0x57   : > { %1988 = vmatmul.mubr.bf16.gmra.mrb[8].mxu0 %v2937_v20  ;;  %v665_v45 = vshll.u32 %v565_v39, 16  ;;  %v1118_v16 = vor.u32 %v1117_v9, %v1114_v8  ;;  %2830 = vmatprep.subr.bf16.mxu0 %v3382_v7  ;;  %v1132_v21 = vor.u32 %v1131_v17, %v1128_v15  ;;  %v1137_v22 = vrot.slane %v1135_v18, 5  ;;  %v2949_v29 = vld [vmem:[#allocation2 + $0x10] ss:$8 sps:$4 sm:$0xff]   ;;  %v975_v30 = vld [vmem:[#allocation2 + $0xc] sm:$0x1] }
  0x58   : > { %v717_v55 = vld [vmem:[#allocation2 + $0x38] sm:$0xe]  ;;  %v718_v56 = vld [vmem:[#allocation2 + $0x3c] sm:$0x1]  ;;  %v765_v60 = vsel %vm3190_vm9, %v2470_v31, %v764_v43  ;;  %v976_v31 = vld [vmem:[#allocation2 + $0x10] sm:$0xe] }
  0x59   : > { %v667_v52 = vrot.slane %v665_v45, 5  ;;  %v2938_v57 = vld [vmem:[#allocation2 + $0x38] ss:$8 sps:$4 sm:$0xff]   ;;  %v2471_v61 = vrot.slane %v717_v55, 9  ;;  %v768_v62 = vrot.slane %v718_v56, 5  ;;  %v1119_v20 = vrot.slane %v1118_v16, 4 }
  0x5a   : > { %v566_v63 = vld [vmem:[#allocation2 + $0x38] sm:$0xf]  ;;  %v567_v0 = vld [vmem:[#allocation2 + $0x3c] sm:$0x1]  ;;  %2060 = vmatprep.mubr.bf16.mxu1 %v2938_v57  ;;  %v1133_v28 = vrot.slane %v1132_v21, 4  ;;  %v1008_v36 = vrot.slane %v975_v30, 5 }
  0x5b   : > { %v769_v1 = vsel %vm3190_vm9, %v2471_v61, %v768_v62  ;;  %v670_v2 = vshrl.u32 %v566_v63, 16  ;;  %v673_v3 = vshll.u32 %v566_v63, 16  ;;  %v679_v59 = vshll.u32 %v567_v0, 16  ;;  %v2947_v25 = vld [vmem:[#allocation2 + $0x30] ss:$8 sps:$4 sm:$0xff]   ;;  %v3409_v53 = vld [vmem:[%s3580_s3 + $0x208] sm:$0xff]  }
  0x5c   : > { %v2475_v6 = vcombine.low %v765_v60, %v769_v1  ;;  %v668_v23 = vsel %vm3201_vm12, %v663_v51, %v667_v52  ;;  %v1124_v27 = vsel %vm3201_vm12, %v1119_v20, %v1123_v10  ;;  %v977_v35 = vld [vmem:[#allocation2 + $0x14] sm:$0x1]  ;;  %v2485_v38 = vrot.slane %v976_v31, 9  ;;  %v826_v39 = vld [vmem:[#allocation2 + $0x8] sm:$0xf] }
  0x5d   : > { %v672_v12 = vrot.slane %v670_v2, 4  ;;  %v675_v13 = vrot.slane %v673_v3, 5  ;;  %v681_v14 = vrot.slane %v679_v59, 5  ;;  %v1138_v43 = vsel %vm3201_vm12, %v1133_v28, %v1137_v22  ;;  %v827_v45 = vld [vmem:[#allocation2 + $0xc] sm:$0x1]  ;;  %v3418_v16 = vld [vmem:[%s3580_s3 + $0x210] sm:$0xff]  }
  0x5e   : > { %2061 = vmatmul.mubr.bf16.gmra.mrb[12].mxu1 %v2475_v6  ;;  %v1012_v44 = vrot.slane %v977_v35, 5  ;;  %v828_v40 = vld [vmem:[#allocation2 + $0x10] sm:$0xf]  ;;  %v843_v46 = vshrl.u32 %v826_v39, 16  ;;  %v2500_v47 = vcombine.low %v1124_v27, %v1138_v43  ;;  %v1009_v48 = vsel %vm3190_vm9, %v2484_v32, %v1008_v36  ;;  %v829_v49 = vld [vmem:[#allocation2 + $0x14] sm:$0x1] }
  0x5f   : > { %v676_v19 = vor.u32 %v675_v13, %v672_v12  ;;  %v846_v50 = vshll.u32 %v826_v39, 16  ;;  %v852_v51 = vshll.u32 %v827_v45, 16  ;;  %v1099_v52 = vld [vmem:[#allocation2 + $0x20] sm:$0xf]  ;;  %v857_v56 = vshrl.u32 %v828_v40, 16 }
  0x60   : > { %v1013_v54 = vsel %vm3190_vm9, %v2485_v38, %v1012_v44  ;;  %v845_v55 = vrot.slane %v843_v46, 4  ;;  %v860_v57 = vshll.u32 %v828_v40, 16  ;;  %v1100_v60 = vld [vmem:[#allocation2 + $0x24] sm:$0x1]  ;;  %2166 = vmatprep.mubr.bf16.mxu1 %v2500_v47  ;;  %v866_v0 = vshll.u32 %v829_v49, 16 }
  0x61   : > { %v677_v24 = vrot.slane %v676_v19, 4  ;;  %v2492_v61 = vcombine.low %v1009_v48, %v1013_v54  ;;  %v848_v62 = vrot.slane %v846_v50, 5  ;;  %v854_v63 = vrot.slane %v852_v51, 5  ;;  %v1101_v1 = vld [vmem:[#allocation2 + $0x28] sm:$0xf] }
  0x62   : > { %v859_v2 = vrot.slane %v857_v56, 4  ;;  %v862_v3 = vrot.slane %v860_v57, 5  ;;  %v1102_v59 = vld [vmem:[#allocation2 + $0x2c] sm:$0x1]  ;;  %v1140_v4 = vshrl.u32 %v1099_v52, 16  ;;  %v1143_v5 = vshll.u32 %v1099_v52, 16 }
  0x63   : > { %v682_v34 = vsel %vm3201_vm12, %v677_v24, %v681_v14  ;;  %v849_v6 = vor.u32 %v848_v62, %v845_v55  ;;  %v868_v8 = vrot.slane %v866_v0, 5  ;;  %v1149_v9 = vshll.u32 %v1100_v60, 16  ;;  %v978_v30 = vld [vmem:[#allocation2 + $0x18] sm:$0xe]  ;;  %v979_v31 = vld [vmem:[#allocation2 + $0x1c] sm:$0x1] }
  0x64   : > { %v2463_v41 = vcombine.low %v668_v23, %v682_v34  ;;  %v1154_v10 = vshrl.u32 %v1101_v1, 16  ;;  %v863_v12 = vor.u32 %v862_v3, %v859_v2  ;;  %v1142_v13 = vrot.slane %v1140_v4, 4  ;;  %v980_v34 = vld [vmem:[#allocation2 + $0x20] sm:$0xe]  ;;  %v981_v35 = vld [vmem:[#allocation2 + $0x24] sm:$0x1] }
  0x65   : > { %v1145_v14 = vrot.slane %v1143_v5, 5  ;;  %v1157_v15 = vshll.u32 %v1101_v1, 16  ;;  %v850_v17 = vrot.slane %v849_v6, 4  ;;  %v1151_v18 = vrot.slane %v1149_v9, 5  ;;  %v2954_v43 = vld [vmem:[#allocation2 + $0x20] ss:$8 sps:$4 sm:$0xff]  }
  0x66   : > { %1995 = vmatprep.mubr.bf16.mxu0 %v2463_v41  ;;  %2167 = vmatmul.mubr.bf16.vlgmr.msra.gmra.mrb[16].mxu1 %v2949_v29  ;;  %v1156_v19 = vrot.slane %v1154_v10, 4  ;;  %v1163_v20 = vshll.u32 %v1102_v59, 16  ;;  %v864_v21 = vrot.slane %v863_v12, 4  ;;  %v2486_v36 = vrot.slane %v978_v30, 9  ;;  %v830_v40 = vld [vmem:[#allocation2 + $0x18] sm:$0xf] }
  0x67   : > { %1996 = vmatmul.mubr.bf16.gmra.mrb[12].mxu0 %v2947_v25  ;;  %2862 = vmatpush3.bf16.msra.mxu1 %v3382_v7  ;;  %v1146_v22 = vor.u32 %v1145_v14, %v1142_v13  ;;  %v1159_v23 = vrot.slane %v1157_v15, 5  ;;  %v855_v24 = vsel %vm3201_vm12, %v850_v17, %v854_v63  ;;  %v3426_v25 = vld [vmem:[%s3580_s3 + $0x218] sm:$0xff]   ;;  %v1016_v38 = vrot.slane %v979_v31, 5  ;;  %v832_v48 = vld [vmem:[#allocation2 + $0x20] sm:$0xf]  ;;  %v3453_v14 = vld [vmem:[%s3580_s3 + $0x228] sm:$0xff]  }
  0x68   : > { %2101 = vmatprep.mubr.bf16.mxu0 %v2492_v61  ;;  %2855 = vmatprep.subr.bf16.mxu1 %v3409_v53  ;;  %v869_v26 = vsel %vm3201_vm12, %v864_v21, %v868_v8  ;;  %v1165_v29 = vrot.slane %v1163_v20, 5  ;;  %v2487_v44 = vrot.slane %v980_v34, 9  ;;  %v1020_v45 = vrot.slane %v981_v35, 5  ;;  %v831_v47 = vld [vmem:[#allocation2 + $0x1c] sm:$0x1]  ;;  %v3445_v57 = vld [vmem:[%s3580_s3 + $0x220] sm:$0xff]  }
  0x69   : > { %v1147_v27 = vrot.slane %v1146_v22, 4  ;;  %v1160_v28 = vor.u32 %v1159_v23, %v1156_v19  ;;  %v2480_v32 = vcombine.low %v855_v24, %v869_v26  ;;  %v1017_v46 = vsel %vm3190_vm9, %v2486_v36, %v1016_v38  ;;  %v833_v49 = vld [vmem:[#allocation2 + $0x24] sm:$0x1]  ;;  %v1103_v55 = vld [vmem:[#allocation2 + $0x30] sm:$0xf] }
  0x6a   : > { %v1021_v51 = vsel %vm3190_vm9, %v2487_v44, %v1020_v45  ;;  %v871_v52 = vshrl.u32 %v830_v40, 16  ;;  %v874_v54 = vshll.u32 %v830_v40, 16  ;;  %v1104_v56 = vld [vmem:[#allocation2 + $0x34] sm:$0x1]  ;;  %v880_v62 = vshll.u32 %v831_v47, 16 }
  0x6b   : > { %2863 = vmatpush3.bf16.msra.mxu1 %v3409_v53  ;;  %v1152_v39 = vsel %vm3201_vm12, %v1147_v27, %v1151_v18  ;;  %v1161_v41 = vrot.slane %v1160_v28, 4  ;;  %v2493_v61 = vcombine.low %v1017_v46, %v1021_v51  ;;  %v1105_v63 = vld [vmem:[#allocation2 + $0x38] sm:$0xf]  ;;  %v1106_v0 = vld [vmem:[#allocation2 + $0x3c] sm:$0x1]  ;;  %v888_v3 = vshll.u32 %v832_v48, 16 }
  0x6c   : > { %2856 = vmatprep.subr.bf16.mxu1 %v3418_v16  ;;  %v873_v1 = vrot.slane %v871_v52, 4  ;;  %v876_v2 = vrot.slane %v874_v54, 5  ;;  %v894_v59 = vshll.u32 %v833_v49, 16  ;;  %v882_v4 = vrot.slane %v880_v62, 5  ;;  %v3460_v23 = vld [vmem:[%s3580_s3 + $0x230] sm:$0xff]  }
  0x6d   : > { %v1166_v50 = vsel %vm3201_vm12, %v1161_v41, %v1165_v29  ;;  %v1168_v6 = vshrl.u32 %v1103_v55, 16  ;;  %v1171_v8 = vshll.u32 %v1103_v55, 16  ;;  %v890_v10 = vrot.slane %v888_v3, 5  ;;  %v982_v31 = vld [vmem:[#allocation2 + $0x28] sm:$0xe] }
  0x6e   : > { %v2501_v60 = vcombine.low %v1152_v39, %v1166_v50  ;;  %v877_v9 = vor.u32 %v876_v2, %v873_v1  ;;  %v896_v12 = vrot.slane %v894_v59, 5  ;;  %v1177_v13 = vshll.u32 %v1104_v56, 16  ;;  %v984_v36 = vld [vmem:[#allocation2 + $0x30] sm:$0xe]  ;;  %v985_v38 = vld [vmem:[#allocation2 + $0x34] sm:$0x1] }
  0x6f   : > { %2102 = vmatmul.mubr.bf16.vlgmr.msra.gmra.mrb[16].mxu0 %v2480_v32  ;;  %2864 = vmatpush3.bf16.msra.mxu1 %v3418_v16  ;;  %v1170_v15 = vrot.slane %v1168_v6, 4  ;;  %v1173_v17 = vrot.slane %v1171_v8, 5  ;;  %v1182_v18 = vshrl.u32 %v1105_v63, 16  ;;  %v1185_v19 = vshll.u32 %v1105_v63, 16  ;;  %v983_v32 = vld [vmem:[#allocation2 + $0x2c] sm:$0x1] }
  0x70   : > { %2831 = vmatpush3.bf16.msra.mxu0 %v3382_v7  ;;  %2857 = vmatprep.subr.bf16.mxu1 %v3426_v25  ;;  %v885_v7 = vshrl.u32 %v832_v48, 16  ;;  %v878_v20 = vrot.slane %v877_v9, 4  ;;  %v1179_v22 = vrot.slane %v1177_v13, 5  ;;  %v2488_v39 = vrot.slane %v982_v31, 9  ;;  %v834_v40 = vld [vmem:[#allocation2 + $0x28] sm:$0xf] }
  0x71   : > { %2832 = vmatprep.subr.bf16.mxu0 %v3409_v53  ;;  %2174 = vmatprep.mubr.bf16.mxu1 %v2501_v60  ;;  %v1174_v24 = vor.u32 %v1173_v17, %v1170_v15  ;;  %v1184_v26 = vrot.slane %v1182_v18, 4  ;;  %v1187_v27 = vrot.slane %v1185_v19, 5  ;;  %v2489_v44 = vrot.slane %v984_v36, 9  ;;  %v2957_v48 = vld [vmem:[#allocation2 + $0x30] ss:$8 sps:$4 sm:$0xff]  }
  0x72   : > { %v887_v5 = vrot.slane %v885_v7, 4  ;;  %2175 = vmatmul.mubr.bf16.gmra.mrb[20].mxu1 %v2954_v43  ;;  %2109 = vmatprep.mubr.bf16.mxu0 %v2493_v61  ;;  %v883_v28 = vsel %vm3201_vm12, %v878_v20, %v882_v4  ;;  %v1024_v43 = vrot.slane %v983_v32, 5  ;;  %v1028_v45 = vrot.slane %v985_v38, 5  ;;  %v835_v49 = vld [vmem:[#allocation2 + $0x2c] sm:$0x1]  ;;  %v3485_v6 = vld [vmem:[%s3580_s3 + $0x238] sm:$0xff]  }
  0x73   : > { %2865 = vmatpush3.bf16.msra.mxu1 %v3426_v25  ;;  %v1175_v34 = vrot.slane %v1174_v24, 4  ;;  %v1188_v35 = vor.u32 %v1187_v27, %v1184_v26  ;;  %v836_v50 = vld [vmem:[#allocation2 + $0x30] sm:$0xf]  ;;  %v899_v51 = vshrl.u32 %v834_v40, 16  ;;  %v837_v55 = vld [vmem:[#allocation2 + $0x34] sm:$0x1] }
  0x74   : > { %2833 = vmatpush3.bf16.msra.mxu0 %v3409_v53  ;;  %v891_v21 = vor.u32 %v890_v10, %v887_v5  ;;  %v1191_v53 = vshll.u32 %v1106_v0, 16  ;;  %2858 = vmatprep.subr.bf16.mxu1 %v3445_v57  ;;  %v1025_v52 = vsel %vm3190_vm9, %v2488_v39, %v1024_v43  ;;  %v1029_v54 = vsel %vm3190_vm9, %v2489_v44, %v1028_v45  ;;  %v272_v61 = vld [vmem:[#allocation2 + $0x48] sm:$0x1]  ;;  %v301_v0 = vld [vmem:[#allocation2 + $0x44] sm:$0x1] }
  0x75   : > { %2834 = vmatprep.subr.bf16.mxu0 %v3418_v16  ;;  %v1189_v47 = vrot.slane %v1188_v35, 4  ;;  %v902_v56 = vshll.u32 %v834_v40, 16  ;;  %v908_v60 = vshll.u32 %v835_v49, 16  ;;  %v2494_v7 = vcombine.low %v1025_v52, %v1029_v54  ;;  %v304_v1 = vld [vmem:[#allocation2 + $0x4c] sm:$0x1] }
  0x76   : > { %v892_v29 = vrot.slane %v891_v21, 4  ;;  %v1193_v30 = vrot.slane %v1191_v53, 5  ;;  %v913_v63 = vshrl.u32 %v836_v50, 16  ;;  %v916_v4 = vshll.u32 %v836_v50, 16  ;;  %v1107_v5 = vld [vmem:[#allocation2 + $0x40] sm:$0xf] }
  0x77   : > { %2866 = vmatpush3.bf16.msra.mxu1 %v3445_v57  ;;  %v904_v3 = vrot.slane %v902_v56, 5  ;;  %v910_v59 = vrot.slane %v908_v60, 5  ;;  %v922_v9 = vshll.u32 %v837_v55, 16  ;;  %v273_v10 = vsel %vm3114_vm2, 0, %v272_v61  ;;  %v3497_v24 = vld [vmem:[#allocation2 + $0x38] sm:$0xe] }
  0x78   : > { %2835 = vmatpush3.bf16.msra.mxu0 %v3418_v16  ;;  %2859 = vmatprep.subr.bf16.mxu1 %v3453_v14  ;;  %v897_v41 = vsel %vm3201_vm12, %v892_v29, %v896_v12  ;;  %v1180_v16 = vsel %vm3201_vm12, %v1175_v34, %v1179_v22  ;;  %v1194_v62 = vsel %vm3201_vm12, %v1189_v47, %v1193_v30  ;;  %v915_v8 = vrot.slane %v913_v63, 4  ;;  %v3501_v27 = vld [vmem:[#allocation2 + $0x3c] sm:$0x1]  ;;  %v838_v32 = vld [vmem:[#allocation2 + $0x38] sm:$0xf] }
  0x79   : > { %2836 = vmatprep.subr.bf16.mxu0 %v3426_v25  ;;  %v2481_v46 = vcombine.low %v883_v28, %v897_v41  ;;  %v2502_v2 = vcombine.low %v1180_v16, %v1194_v62  ;;  %v302_v12 = vsel %vm3128_vm4, 0, %v301_v0  ;;  %v918_v15 = vrot.slane %v916_v4, 5  ;;  %274 = vst [vmem:[#allocation2 + $0x48] sm:$0x1] %v273_v10  ;;  %v840_v35 = vld [vmem:[#allocation2 + $0x40] sm:$0xf] }
  0x7a   : > { %303 = vst [vmem:[#allocation2 + $0x44] sm:$0x1] %v302_v12  ;;  %v305_v17 = vsel %vm3128_vm4, 0, %v304_v1  ;;  %v1196_v18 = vshrl.u32 %v1107_v5, 16  ;;  %v924_v19 = vrot.slane %v922_v9, 5  ;;  %v1199_v20 = vshll.u32 %v1107_v5, 16 }
  0x7b   : > { %2867 = vmatpush3.bf16.msra.mxu1 %v3453_v14  ;;  %2110 = vmatmul.mubr.bf16.gmra.mrb[20].mxu0 %v2481_v46  ;;  %306 = vst [vmem:[#allocation2 + $0x4c] sm:$0x1] %v305_v17  ;;  %v919_v22 = vor.u32 %v918_v15, %v915_v8  ;;  %v448_v26 = vrot.slane %v3348_v11, 4  ;;  %v2490_v30 = vrot.slane %v3497_v24, 9  ;;  %v1032_v31 = vrot.slane %v3501_v27, 5 }
  0x7c   : > { %2837 = vmatpush3.bf16.msra.mxu0 %v3426_v25  ;;  %2860 = vmatprep.subr.bf16.mxu1 %v3460_v23  ;;  %v901_v25 = vrot.slane %v899_v51, 4  ;;  %v1198_v53 = vrot.slane %v1196_v18, 4  ;;  %v1201_v37 = vrot.slane %v1199_v20, 5  ;;  %v839_v11 = vld [vmem:[#allocation2 + $0x3c] sm:$0x1]  ;;  %v927_v36 = vshrl.u32 %v838_v32, 16 }
  0x7d   : > { %2838 = vmatprep.subr.bf16.mxu0 %v3445_v57  ;;  %2117 = vmatprep.mubr.bf16.mxu0 %v2494_v7  ;;  %v920_v29 = vrot.slane %v919_v22, 4  ;;  %v930_v38 = vshll.u32 %v838_v32, 16  ;;  %v936_v41 = vshll.u32 %v839_v11, 16  ;;  %v941_v43 = vshrl.u32 %v840_v35, 16  ;;  %v1251_v44 = vld [vmem:[#allocation2 + $0x30] sm:$0xe] }
  0x7e   : > { %2182 = vmatprep.mubr.bf16.mxu1 %v2502_v2  ;;  %v905_v13 = vor.u32 %v904_v3, %v901_v25  ;;  %v1202_v34 = vor.u32 %v1201_v37, %v1198_v53  ;;  %v1252_v45 = vld [vmem:[#allocation2 + $0x34] sm:$0x1]  ;;  %v929_v47 = vrot.slane %v927_v36, 4  ;;  %v944_v33 = vshll.u32 %v840_v35, 16  ;;  %v1253_v7 = vld [vmem:[#allocation2 + $0x38] sm:$0xe] }
  0x7f   : > { %2868 = vmatpush3.bf16.msra.mxu1 %v3460_v23  ;;  %v925_v39 = vsel %vm3201_vm12, %v920_v29, %v924_v19  ;;  %v932_v55 = vrot.slane %v930_v38, 5  ;;  %v3519_v56 = vrot.slane %v936_v41, 5  ;;  %v943_v62 = vrot.slane %v941_v43, 4  ;;  %v1254_v63 = vld [vmem:[#allocation2 + $0x3c] sm:$0x1] }
  0x80   : > { %2839 = vmatpush3.bf16.msra.mxu0 %v3445_v57  ;;  %2183 = vmatmul.mubr.bf16.gmra.mrb[24].mxu1 %v2957_v48  ;;  %v906_v21 = vrot.slane %v905_v13, 4  ;;  %v3503_v57 = vld [vmem:[#allocation2 + $0x40] sm:$0xe]  ;;  %v1109_v46 = vld [vmem:[#allocation2 + $0x48] sm:$0xf]  ;;  %v3517_v52 = vrot.slane %v1202_v34, 4 }
  0x81   : > { %2840 = vmatprep.subr.bf16.mxu0 %v3453_v14  ;;  %2861 = vmatprep.subr.bf16.mxu1 %v3485_v6  ;;  %v513_v40 = vld [vmem:[#allocation2 + $0x44] sm:$0x1]  ;;  %v2491_v16 = vrot.slane %v3503_v57, 9  ;;  %v1210_v50 = vshrl.u32 %v1109_v46, 16  ;;  %v1213_v51 = vshll.u32 %v1109_v46, 16  ;;  %v933_v25 = vor.u32 %v932_v55, %v929_v47 }
  0x82   : > { %v911_v28 = vsel %vm3201_vm12, %v906_v21, %v910_v59  ;;  %v514_v48 = vsel %vm3114_vm2, %v448_v26, %v513_v40  ;;  %v1110_v49 = vld [vmem:[#allocation2 + $0x4c] sm:$0x1]  ;;  %v2508_v0 = vrot.slane %v1251_v44, 9  ;;  %v1293_v1 = vrot.slane %v1252_v45, 5  ;;  %v3522_v4 = vld [vmem:[#allocation2 + $0x40] sm:$0xe] }
  0x83   : > { %2869 = vmatpush3.bf16.msra.mxu1 %v3485_v6  ;;  %515 = vst [vmem:[#allocation2 + $0x44] sm:$0x1] %v514_v48  ;;  %v1219_v54 = vshll.u32 %v1110_v49, 16  ;;  %v1212_v60 = vrot.slane %v1210_v50, 4  ;;  %v1215_v61 = vrot.slane %v1213_v51, 5  ;;  %v946_v3 = vrot.slane %v944_v33, 5 }
  0x84   : > { %2841 = vmatpush3.bf16.msra.mxu0 %v3453_v14  ;;  %v2482_v14 = vcombine.low %v911_v28, %v925_v39  ;;  %v1297_v59 = vrot.slane %v1254_v63, 5  ;;  %v3524_v5 = vld [vmem:[#allocation2 + $0x48] sm:$0xe]  ;;  %v934_v9 = vrot.slane %v933_v25, 4  ;;  %v1258_v10 = vld [vmem:[#allocation2 + $0x4c] sm:$0x1]  ;;  %v1294_v32 = vsel %vm3190_vm9, %v2508_v0, %v1293_v1 }
  0x85   : > { %2842 = vmatprep.subr.bf16.mxu0 %v3460_v23  ;;  %v1216_v2 = vor.u32 %v1215_v61, %v1212_v60  ;;  %v1221_v8 = vrot.slane %v1219_v54, 5  ;;  %v2510_v12 = vrot.slane %v3522_v4, 9  ;;  %v2511_v13 = vrot.slane %v3524_v5, 9  ;;  %v1243_v19 = vld [vmem:[#allocation2 + $0x10] sm:$0xe] }
  0x86   : > { %2118 = vmatmul.mubr.bf16.gmra.mrb[24].mxu0 %v2482_v14  ;;  %v947_v17 = vor.u32 %v946_v3, %v943_v62  ;;  %v1305_v18 = vrot.slane %v1258_v10, 5  ;;  %v1244_v20 = vld [vmem:[#allocation2 + $0x14] sm:$0x1]  ;;  %v1245_v21 = vld [vmem:[#allocation2 + $0x18] sm:$0xe]  ;;  %v2504_v53 = vrot.slane %v1243_v19, 9  ;;  %v939_v27 = vsel %vm3201_vm12, %v934_v9, %v3519_v56 }
  0x87   : > { %v1217_v15 = vrot.slane %v1216_v2, 4  ;;  %v1246_v22 = vld [vmem:[#allocation2 + $0x1c] sm:$0x1]  ;;  %v1277_v26 = vrot.slane %v1244_v20, 5  ;;  %v1247_v41 = vld [vmem:[#allocation2 + $0x20] sm:$0xe] }
  0x88   : > { %2843 = vmatpush3.bf16.msra.mxu0 %v3460_v23  ;;  %v2509_v23 = vrot.slane %v1253_v7, 9  ;;  %v948_v36 = vrot.slane %v947_v17, 4  ;;  %v1248_v40 = vld [vmem:[#allocation2 + $0x24] sm:$0x1]  ;;  %v1249_v46 = vld [vmem:[#allocation2 + $0x28] sm:$0xe]  ;;  %v1306_v63 = vsel %vm3190_vm9, %v2511_v13, %v1305_v18 }
  0x89   : > { %2844 = vmatprep.subr.bf16.mxu0 %v3485_v6  ;;  %v1278_v24 = vsel %vm3190_vm9, %v2504_v53, %v1277_v26  ;;  %v1222_v44 = vsel %vm3201_vm12, %v1217_v15, %v1221_v8  ;;  %v1250_v51 = vld [vmem:[#allocation2 + $0x2c] sm:$0x1]  ;;  %v2960_v55 = vld [vmem:[#allocation2 + $0x40] ss:$8 sps:$4 sm:$0xff]   ;;  %v1285_v62 = vrot.slane %v1248_v40, 5  ;;  %v2507_v33 = vrot.slane %v1249_v46, 9 }
  0x8a   : > { %v1108_v37 = vld [vmem:[#allocation2 + $0x44] sm:$0x1]  ;;  %v1298_v34 = vsel %vm3190_vm9, %v2509_v23, %v1297_v59  ;;  %v1289_v7 = vrot.slane %v1250_v51, 5 }
  0x8b   : > { %v989_v28 = vld [vmem:[#allocation2 + $0x44] sm:$0x1]  ;;  %v1205_v11 = vshll.u32 %v1108_v37, 16  ;;  %v2514_v48 = vcombine.low %v1294_v32, %v1298_v34 }
  0x8c   : > { %2845 = vmatpush3.bf16.msra.mxu0 %v3485_v6  ;;  %v1033_v6 = vsel %vm3190_vm9, %v2490_v30, %v1032_v31  ;;  %v841_v29 = vld [vmem:[#allocation2 + $0x44] sm:$0x1]  ;;  %v1036_v35 = vrot.slane %v989_v28, 5  ;;  %v2505_v30 = vrot.slane %v1245_v21, 9  ;;  %v1281_v31 = vrot.slane %v1246_v22, 5 }
  0x8d   : > { %v950_v38 = vshll.u32 %v841_v29, 16  ;;  %v1256_v39 = vld [vmem:[#allocation2 + $0x44] sm:$0x1]  ;;  %v1207_v43 = vrot.slane %v1205_v11, 5 }
  0x8e   : > { %v1037_v45 = vsel %vm3190_vm9, %v2491_v16, %v1036_v35  ;;  %v1301_v49 = vrot.slane %v1256_v39, 5  ;;  %v1282_v50 = vsel %vm3190_vm9, %v2505_v30, %v1281_v31  ;;  %v2506_v16 = vrot.slane %v1247_v41, 9 }
  0x8f   : > { %v952_v14 = vrot.slane %v950_v38, 5  ;;  %v2495_v47 = vcombine.low %v1033_v6, %v1037_v45  ;;  %v1208_v54 = vsel %vm3201_vm12, %v3517_v52, %v1207_v43  ;;  %v2512_v56 = vcombine.low %v1278_v24, %v1282_v50 }
  0x90   : > { %v2503_v60 = vcombine.low %v1208_v54, %v1222_v44  ;;  %v1286_v25 = vsel %vm3190_vm9, %v2506_v16, %v1285_v62  ;;  %v1290_v52 = vsel %vm3190_vm9, %v2507_v33, %v1289_v7  ;;  %v1302_v58 = vsel %vm3190_vm9, %v2510_v12, %v1301_v49 }
  0x91   : > { %v953_v57 = vsel %vm3201_vm12, %v948_v36, %v952_v14  ;;  %2125 = vmatprep.mubr.bf16.mxu0 %v2495_v47  ;;  %v2513_v0 = vcombine.low %v1286_v25, %v1290_v52  ;;  %v2515_v1 = vcombine.low %v1302_v58, %v1306_v63 }
  0x92   : > { %v2483_v61 = vcombine.low %v939_v27, %v953_v57  ;;  %2190 = vmatprep.mubr.bf16.mxu1 %v2503_v60 }
  0x93   : > { %2191 = vmatmul.mubr.bf16.gmra.mrb[28].mxu1 %v2960_v55 }
  0x94   : > { %2126 = vmatmul.mubr.bf16.gmra.mrb[28].mxu0 %v2483_v61  ;;  %2850 = vmatprep.mubr.bf16.mxu1 %v2514_v48 }
  0x95   : > { %2846 = vmatprep.mubr.bf16.mxu0 %v2512_v56 }
  0x9b   : > { %2851 = vmatmul.mubr.bf16.vlgmr.msra.gmra.mrb[32].mxu1 %v2515_v1 }
  0x9c   : > { %2847 = vmatmul.mubr.bf16.vlgmr.msra.gmra.mrb[32].mxu0 %v2513_v0 }
 0x104   : > { %v2714_v23 = vpop.f32.mrb[0].mxu1 }
 0x105   : > { %v2715_v2 = vpop.f32.mrb[1].mxu1 }
 0x106   : > { %v2716_v3 = vadd.f32 %v2715_v2, %v2714_v23  ;;  %v2717_v59 = vpop.f32.mrb[2].mxu1 }
 0x107   : > { %v2718_v4 = vpop.f32.mrb[3].mxu1 }
 0x108   : > { %v2719_v5 = vadd.f32 %v2718_v4, %v2717_v59 }
 0x10c   : > { %v2674_v8 = vpop.f32.mrb[0].mxu0 }
 0x10d   : > { %v2675_v9 = vpop.f32.mrb[1].mxu0 }
 0x10e   : > { %v2676_v10 = vadd.f32 %v2675_v9, %v2674_v8  ;;  %v2677_v15 = vpop.f32.mrb[2].mxu0 }
 0x10f   : > { %v2678_v17 = vpop.f32.mrb[3].mxu0 }
 0x110   : > { %v2039_v19 = vadd.f32 %v2716_v3, %v2676_v10  ;;  %v2679_v12 = vadd.f32 %v2678_v17, %v2677_v15 }
 0x112   : > { %v2042_v20 = vadd.f32 %v2719_v5, %v2679_v12 }
 0x113   : > { %v2720_v42 = vpop.f32.mrb[4].mxu1 }
 0x114   : > { %v2721_v13 = vpop.f32.mrb[5].mxu1 }
 0x115   : > { %v2722_v18 = vadd.f32 %v2721_v13, %v2720_v42  ;;  %v2723_v21 = vpop.f32.mrb[6].mxu1 }
 0x116   : > { %v2724_v22 = vpop.f32.mrb[7].mxu1 }
 0x117   : > { %v2725_v53 = vadd.f32 %v2724_v22, %v2723_v21 }
 0x11c   : > { %v2680_v26 = vpop.f32.mrb[4].mxu0 }
 0x11d   : > { %v2681_v37 = vpop.f32.mrb[5].mxu0 }
 0x11e   : > { %v2682_v28 = vadd.f32 %v2681_v37, %v2680_v26  ;;  %v2683_v6 = vpop.f32.mrb[6].mxu0 }
 0x11f   : > { %v2684_v29 = vpop.f32.mrb[7].mxu0 }
 0x120   : > { %v2047_v32 = vadd.f32 %v2722_v18, %v2682_v28  ;;  %v2685_v34 = vadd.f32 %v2684_v29, %v2683_v6 }
 0x122   : > { %v2050_v11 = vadd.f32 %v2725_v53, %v2685_v34  ;;  %v2726_v35 = vpop.f32.mrb[8].mxu1 }
 0x123   : > { %v2727_v36 = vpop.f32.mrb[9].mxu1 }
 0x124   : > { %v2728_v38 = vadd.f32 %v2727_v36, %v2726_v35  ;;  %v2729_v39 = vpop.f32.mrb[10].mxu1 }
 0x125   : > { %v2730_v27 = vpop.f32.mrb[11].mxu1 }
 0x126   : > { %v2731_v24 = vadd.f32 %v2730_v27, %v2729_v39 }
 0x12a   : > { %v2686_v30 = vpop.f32.mrb[8].mxu0 }
 0x12b   : > { %v2687_v31 = vpop.f32.mrb[9].mxu0 }
 0x12c   : > { %v2688_v41 = vadd.f32 %v2687_v31, %v2686_v30  ;;  %v2689_v43 = vpop.f32.mrb[10].mxu0 }
 0x12d   : > { %v2690_v44 = vpop.f32.mrb[11].mxu0 }
 0x12e   : > { %v2055_v45 = vadd.f32 %v2728_v38, %v2688_v41  ;;  %v2691_v14 = vadd.f32 %v2690_v44, %v2689_v43 }
 0x130   : > { %v2058_v40 = vadd.f32 %v2731_v24, %v2691_v14 }
 0x131   : > { %v2732_v46 = vpop.f32.mrb[12].mxu1 }
 0x132   : > { %v2733_v47 = vpop.f32.mrb[13].mxu1 }
 0x133   : > { %v2734_v48 = vadd.f32 %v2733_v47, %v2732_v46  ;;  %v2735_v49 = vpop.f32.mrb[14].mxu1 }
 0x134   : > { %v2736_v50 = vpop.f32.mrb[15].mxu1 }
 0x135   : > { %v2737_v51 = vadd.f32 %v2736_v50, %v2735_v49 }
 0x139   : > { %v2794_v57 = vpop.f32.mrb[16].mxu1 }
 0x13a   : > { %v2692_v54 = vpop.f32.mrb[12].mxu0  ;;  %v2795_v60 = vpop.f32.mrb[17].mxu1 }
 0x13b   : > { %v2693_v55 = vpop.f32.mrb[13].mxu0  ;;  %v2796_v62 = vadd.f32 %v2795_v60, %v2794_v57  ;;  %v2797_v33 = vpop.f32.mrb[18].mxu1 }
 0x13c   : > { %v2694_v56 = vadd.f32 %v2693_v55, %v2692_v54  ;;  %v2695_v16 = vpop.f32.mrb[14].mxu0  ;;  %v2798_v52 = vpop.f32.mrb[19].mxu1 }
 0x13d   : > { %v2696_v61 = vpop.f32.mrb[15].mxu0  ;;  %v2799_v58 = vadd.f32 %v2798_v52, %v2797_v33 }
 0x13e   : > { %v2063_v7 = vadd.f32 %v2734_v48, %v2694_v56  ;;  %v2697_v25 = vadd.f32 %v2696_v61, %v2695_v16 }
 0x140   : > { %v2066_v63 = vadd.f32 %v2737_v51, %v2697_v25 }
 0x142   : > { %v2754_v0 = vpop.f32.mrb[16].mxu0 }
 0x143   : > { %v2755_v1 = vpop.f32.mrb[17].mxu0 }
 0x144   : > { %v2756_v23 = vadd.f32 %v2755_v1, %v2754_v0  ;;  %v2757_v2 = vpop.f32.mrb[18].mxu0 }
 0x145   : > { %v2758_v3 = vpop.f32.mrb[19].mxu0  ;;  %v2800_v5 = vpop.f32.mrb[20].mxu1 }
 0x146   : > { %v2104_v59 = vadd.f32 %v2756_v23, %v2039_v19  ;;  %v2759_v4 = vadd.f32 %v2758_v3, %v2757_v2  ;;  %v2801_v9 = vpop.f32.mrb[21].mxu1 }
 0x147   : > { %v2802_v15 = vadd.f32 %v2801_v9, %v2800_v5  ;;  %v2803_v17 = vpop.f32.mrb[22].mxu1 }
 0x148   : > { %v2107_v8 = vadd.f32 %v2759_v4, %v2042_v20  ;;  %v2169_v10 = vadd.f32 %v2796_v62, %v2104_v59  ;;  %v2804_v12 = vpop.f32.mrb[23].mxu1 }
 0x149   : > { %v2805_v13 = vadd.f32 %v2804_v12, %v2803_v17 }
 0x14a   : > { %v2172_v42 = vadd.f32 %v2799_v58, %v2107_v8 }
 0x14e   : > { %v2760_v18 = vpop.f32.mrb[20].mxu0 }
 0x14f   : > { %v2761_v21 = vpop.f32.mrb[21].mxu0 }
 0x150   : > { %v2762_v22 = vadd.f32 %v2761_v21, %v2760_v18  ;;  %v2763_v53 = vpop.f32.mrb[22].mxu0 }
 0x151   : > { %v2764_v26 = vpop.f32.mrb[23].mxu0 }
 0x152   : > { %v2112_v37 = vadd.f32 %v2762_v22, %v2047_v32  ;;  %v2765_v28 = vadd.f32 %v2764_v26, %v2763_v53 }
 0x153   : > { %v2806_v6 = vpop.f32.mrb[24].mxu1 }
 0x154   : > { %v2807_v29 = vpop.f32.mrb[25].mxu1  ;;  %v2115_v19 = vadd.f32 %v2765_v28, %v2050_v11  ;;  %v2177_v20 = vadd.f32 %v2802_v15, %v2112_v37 }
 0x155   : > { %v2808_v34 = vadd.f32 %v2807_v29, %v2806_v6  ;;  %v2809_v35 = vpop.f32.mrb[26].mxu1 }
 0x156   : > { %v2810_v36 = vpop.f32.mrb[27].mxu1  ;;  %v2180_v39 = vadd.f32 %v2805_v13, %v2115_v19 }
 0x157   : > { %v2811_v38 = vadd.f32 %v2810_v36, %v2809_v35 }
 0x159   : > { %v2766_v27 = vpop.f32.mrb[24].mxu0 }
 0x15a   : > { %v2767_v24 = vpop.f32.mrb[25].mxu0 }
 0x15b   : > { %v2768_v30 = vadd.f32 %v2767_v24, %v2766_v27  ;;  %v2769_v31 = vpop.f32.mrb[26].mxu0 }
 0x15c   : > { %v2770_v41 = vpop.f32.mrb[27].mxu0 }
 0x15d   : > { %v2120_v43 = vadd.f32 %v2768_v30, %v2055_v45  ;;  %v2771_v44 = vadd.f32 %v2770_v41, %v2769_v31 }
 0x15f   : > { %v2123_v14 = vadd.f32 %v2771_v44, %v2058_v40  ;;  %v2185_v46 = vadd.f32 %v2808_v34, %v2120_v43 }
 0x161   : > { %v2188_v32 = vadd.f32 %v2811_v38, %v2123_v14 }
 0x166   : > { %v2812_v48 = vpop.f32.mrb[28].mxu1 }
 0x167   : > { %v2772_v47 = vpop.f32.mrb[28].mxu0  ;;  %v2813_v11 = vpop.f32.mrb[29].mxu1 }
 0x168   : > { %v2773_v49 = vpop.f32.mrb[29].mxu0  ;;  %v2814_v54 = vadd.f32 %v2813_v11, %v2812_v48  ;;  %v2815_v55 = vpop.f32.mrb[30].mxu1 }
 0x169   : > { %v2774_v50 = vadd.f32 %v2773_v49, %v2772_v47  ;;  %v2775_v51 = vpop.f32.mrb[30].mxu0  ;;  %v2816_v56 = vpop.f32.mrb[31].mxu1 }
 0x16a   : > { %v2776_v57 = vpop.f32.mrb[31].mxu0  ;;  %v2817_v61 = vadd.f32 %v2816_v56, %v2815_v55 }
 0x16b   : > { %v2128_v16 = vadd.f32 %v2774_v50, %v2063_v7  ;;  %v2777_v60 = vadd.f32 %v2776_v57, %v2775_v51 }
 0x16d   : > { %v2193_v62 = vadd.f32 %v2814_v54, %v2128_v16  ;;  %v2131_v33 = vadd.f32 %v2777_v60, %v2066_v63 }
 0x16e   : > { %v2852_v40 = vpop.f32.mrb[32].mxu1 }
 0x16f   : > { %v2196_v45 = vadd.f32 %v2817_v61, %v2131_v33  ;;  %v2848_v25 = vpop.f32.mrb[32].mxu0  ;;  %v2258_v0 = vadd.f32 %v2852_v40, %v2193_v62  ;;  %v2249_v1 = vpop.f32.mrb[33].mxu1 }
 0x170   : > { %v2242_v52 = vadd.f32 %v2848_v25, %v2177_v20  ;;  %v2233_v58 = vpop.f32.mrb[33].mxu0  ;;  %v2250_v3 = vadd.f32 %v2249_v1, %v2185_v46  ;;  %v2853_v59 = vpop.f32.mrb[34].mxu1 }
 0x171   : > { %v2234_v23 = vadd.f32 %v2233_v58, %v2169_v10  ;;  %v2849_v2 = vpop.f32.mrb[34].mxu0  ;;  %v2261_v8 = vadd.f32 %v2853_v59, %v2196_v45  ;;  %v2252_v7 = vpop.f32.mrb[35].mxu1 }
 0x172   : > { %v2245_v4 = vadd.f32 %v2849_v2, %v2180_v39  ;;  %v2236_v5 = vpop.f32.mrb[35].mxu0  ;;  %v2253_v15 = vadd.f32 %v2252_v7, %v2188_v32 }
 0x173   : > { %v2237_v9 = vadd.f32 %v2236_v5, %v2172_v42  ;;  %v2267_v63 = vpack.c.bf16 %v2261_v8, %v2258_v0 }
 0x174   : > { %v2265_v17 = vpack.c.bf16 %v2245_v4, %v2242_v52  ;;  %v2266_v13 = vpack.c.bf16 %v2253_v15, %v2250_v3 }
 0x175   : > { %v2264_v12 = vpack.c.bf16 %v2237_v9, %v2234_v23  ;;  %2657 = vst [vmem:[%s231_s17 + $0x18] sm:$0xff] %v2267_v63   ;;  %v2310_v38 = vunpack.c.l.bf16 %v2267_v63  ;;  %v2311_v30 = vunpack.c.h.bf16 %v2267_v63 }
 0x176   : > { %2655 = vst [vmem:[%s231_s17 + $0x8] sm:$0xff] %v2265_v17   ;;  %2656 = vst [vmem:[%s231_s17 + $0x10] sm:$0xff] %v2266_v13   ;;  %v2306_v21 = vunpack.c.l.bf16 %v2265_v17  ;;  %v2307_v42 = vunpack.c.h.bf16 %v2265_v17  ;;  %v2308_v28 = vunpack.c.l.bf16 %v2266_v13  ;;  %v2309_v34 = vunpack.c.h.bf16 %v2266_v13 }
 0x177   : > { %2636 = vst [vmem:[%s231_s17] sm:$0xff] %v2264_v12   ;;  %v2304_v10 = vunpack.c.l.bf16 %v2264_v12  ;;  %v2305_v18 = vunpack.c.h.bf16 %v2264_v12  ;;  %v2332_v44 = vmul.f32 %v2310_v38, %v2310_v38  ;;  %v2333_v32 = vmul.f32 %v2311_v30, %v2311_v30 }
 0x178   : > { %v2328_v6 = vmul.f32 %v2306_v21, %v2306_v21  ;;  %v2329_v35 = vmul.f32 %v2307_v42, %v2307_v42  ;;  %v2330_v39 = vmul.f32 %v2308_v28, %v2308_v28  ;;  %v2331_v31 = vmul.f32 %v2309_v34, %v2309_v34 }
 0x179   : > { %v2312_v22 = vadd.f32 %v2305_v18, %v2304_v10  ;;  %v2326_v53 = vmul.f32 %v2304_v10, %v2304_v10  ;;  %v2327_v26 = vmul.f32 %v2305_v18, %v2305_v18 }
 0x17b   : > { %v2313_v37 = vadd.f32 %v2312_v22, %v2306_v21  ;;  %v2334_v29 = vadd.f32 %v2327_v26, %v2326_v53 }
 0x17d   : > { %v2314_v19 = vadd.f32 %v2313_v37, %v2307_v42  ;;  %v2335_v20 = vadd.f32 %v2334_v29, %v2328_v6 }
 0x17f   : > { %v2315_v36 = vadd.f32 %v2314_v19, %v2308_v28  ;;  %v2336_v27 = vadd.f32 %v2335_v20, %v2329_v35 }
 0x181   : > { %v2316_v24 = vadd.f32 %v2315_v36, %v2309_v34  ;;  %v2337_v41 = vadd.f32 %v2336_v27, %v2330_v39 }
 0x183   : > { %v2317_v43 = vadd.f32 %v2316_v24, %v2310_v38  ;;  %v2338_v14 = vadd.f32 %v2337_v41, %v2331_v31 }
 0x185   : > { %v2318_v46 = vadd.f32 %v2317_v43, %v2311_v30  ;;  %v2339_v47 = vadd.f32 %v2338_v14, %v2332_v44 }
 0x187   : > { %v2319_v48 = vrot.slane %v2318_v46, 4  ;;  %v2340_v49 = vadd.f32 %v2339_v47, %v2333_v32 }
 0x189   : > { %v2320_v11 = vadd.f32 %v2319_v48, %v2318_v46  ;;  %v2341_v50 = vrot.slane %v2340_v49, 4 }
 0x18b   : > { %v2321_v51 = vrot.slane %v2320_v11, 2  ;;  %v2342_v54 = vadd.f32 %v2341_v50, %v2340_v49 }
 0x18d   : > { %v2322_v55 = vadd.f32 %v2321_v51, %v2320_v11  ;;  %v2343_v57 = vrot.slane %v2342_v54, 2 }
 0x18f   : > { %v2323_v56 = vrot.slane %v2322_v55, 1  ;;  %v2344_v16 = vadd.f32 %v2343_v57, %v2342_v54 }
 0x191   : > { %v2324_v60 = vadd.f32 %v2323_v56, %v2322_v55  ;;  %v2345_v61 = vrot.slane %v2344_v16, 1 }
 0x193   : > { %2348 = vst [vmem:[%s235_s22] sm:$0x1] %v2324_v60  ;;  %v2346_v62 = vadd.f32 %v2345_v61, %v2344_v16 }
 0x195   : > { %2349 = vst [vmem:[%s235_s22 + $0x1] sm:$0x1] %v2346_v62 }
 0x196 PF: > { %s16_s18 = sadd.s32 1, %s2969_s18  }
 0x197   : > { %p13_p4 = scmp.ge.s32.totalorder %s16_s18, 4  }
 0x199   :  { %15 = sbr.rel (!%p13_p4) target bundleno = 1 (0x1), region = 81 }

</bundles_post_ra>
